<compile_context>
chip_gen: v7x
topology: tpu7x:2x2x1
jax: 0.10.0
libtpu: 0.0.40
codegen_flags: <defaults>
</compile_context>

<pallas_src>
import functools

import jax
import jax.numpy as jnp
from jax import lax
from jax.experimental import pallas as pl
from jax.experimental.pallas import tpu as pltpu

LEAKY_SLOPE = 0.1
BN_EPS = 1e-5
HALO = 3             # 3 chained 3x3 convs -> 3-row halo per strip side
TAP_MIN_C = 128      # use per-tap matmul accumulation (no im2col) for Cin >= 128


# ----------------------------------------------------------------------------
# In-kernel conv helper: 3x3, SAME in width, VALID in height (halo supplied).
# ----------------------------------------------------------------------------
def _conv3x3_fused(xs, w_ref, Hs, W, C, use_taps):
    """xs: (Hs, W, C) bf16 strip; w_ref: (9*C, Cout) bf16 (dy,dx,c packing).

    Returns ((Hs-2)*W, Cout) f32 = conv output rows 1..Hs-1 of the strip.
    """
    f32 = jnp.float32
    Hout = Hs - 2
    zc = jnp.zeros((Hs, 1, C), xs.dtype)
    xp = jnp.concatenate([zc, xs, zc], axis=1)                # (Hs, W+2, C)

    if use_taps:
        # 9 per-tap matmuls accumulated in f32: avoids the 9x im2col VMEM
        # blow-up; K = C already feeds the MXU depth when C >= 128.
        cout = w_ref.shape[-1]
        acc = jnp.zeros((Hout * W, cout), f32)
        for dy in range(3):
            for dx in range(3):
                tap = xp[dy:dy + Hout, dx:dx + W, :].reshape(Hout * W, C)
                wk = w_ref[(dy * 3 + dx) * C:(dy * 3 + dx + 1) * C, :]
                acc = acc + jnp.dot(tap, wk, preferred_element_type=f32)
        return acc

    # im2col path (small C): one fat matmul with K = 9*C.
    # width taps gathered into the lane dim, height taps via leading-dim slices
    # (no W%8 sublane-alignment requirement).
    xw = jnp.concatenate([xp[:, dx:dx + W, :] for dx in range(3)], axis=-1)
    cols = jnp.concatenate([xw[dy:dy + Hout] for dy in range(3)], axis=-1)
    return jnp.dot(cols.reshape(Hout * W, 9 * C), w_ref[...],
                   preferred_element_type=f32)


# ----------------------------------------------------------------------------
# Fused SSH kernel: one (image, row-strip) per grid step.
# ----------------------------------------------------------------------------
def _ssh_kernel(x_ref, w12_ref, b12_ref, w34_ref, b34_ref, w5_ref, b5_ref,
                o_ref, xpad_ref, *,
                H, W, TH, Cin, C2, C4, taps_x, taps_t, direct_store):
    """x_ref:   (1, H, W, Cin) bf16 (whole image, resident across strips)
       w12:     (9*Cin, C2+C4) bf16  conv1||conv2 weights, BN scale folded in
       w34:     (9*C4, 2*C4)   bf16  conv3||conv4 weights
       w5:      (9*C4, C4)     bf16  conv5 weights
       b*:      (1, Cout_fused) f32  folded BN bias
       o_ref:   (1, TH, W, C2+2*C4)  [relu(y1) || relu(y2) || relu(y3)]
       xpad_ref:(H+6, W, Cin) bf16 scratch: zero-padded image (halo rows)."""
    f32 = jnp.float32
    s = pl.program_id(1)

    # Fill the H-padded image scratch once per image (strip axis is "arbitrary"
    # so all strips of one image run in order on the same core).
    @pl.when(s == 0)
    def _():
        zr = jnp.zeros((HALO, W, Cin), x_ref.dtype)
        xpad_ref[...] = jnp.concatenate([zr, x_ref[0], zr], axis=0)

    h0 = s * TH
    if TH % 8 == 0:
        h0 = pl.multiple_of(h0, 8)

    # Input strip: padded rows [h0, h0+TH+6) == image rows [h0-3, h0+TH+3).
    xs = xpad_ref[pl.ds(h0, TH + 2 * HALO), :, :]             # (TH+6, W, Cin)

    # ---- stage 1: conv1 || conv2 (shared input x) ---------------------------
    H1 = TH + 4                                               # image rows [h0-2, h0+TH+2)
    z12 = _conv3x3_fused(xs, w12_ref, TH + 2 * HALO, W, Cin, taps_x) + b12_ref[0]
    z12 = z12.reshape(H1, W, C2 + C4)
    y1 = jnp.maximum(z12[2:2 + TH, :, :C2], 0.0)              # (TH, W, C2)

    t = z12[:, :, C2:]
    t = jnp.where(t >= 0, t, t * LEAKY_SLOPE)
    # Rows outside the real image must be zero (they are conv3/conv4's SAME pad).
    rows1 = h0 - 2 + lax.broadcasted_iota(jnp.int32, (H1, 1, 1), 0)
    t = jnp.where((rows1 >= 0) & (rows1 < H), t, 0.0)
    t = t.astype(jnp.bfloat16)                                # (H1, W, C4)

    # ---- stage 2: conv3 || conv4 (shared input t) ----------------------------
    H2 = TH + 2                                               # image rows [h0-1, h0+TH+1)
    z34 = _conv3x3_fused(t, w34_ref, H1, W, C4, taps_t) + b34_ref[0]
    z34 = z34.reshape(H2, W, 2 * C4)
    y2 = jnp.maximum(z34[1:1 + TH, :, :C4], 0.0)              # (TH, W, C4)

    u = z34[:, :, C4:]
    u = jnp.where(u >= 0, u, u * LEAKY_SLOPE)
    rows2 = h0 - 1 + lax.broadcasted_iota(jnp.int32, (H2, 1, 1), 0)
    u = jnp.where((rows2 >= 0) & (rows2 < H), u, 0.0)
    u = u.astype(jnp.bfloat16)                                # (H2, W, C4)

    # ---- stage 3: conv5 ------------------------------------------------------
    z5 = _conv3x3_fused(u, w5_ref, H2, W, C4, taps_t) + b5_ref[0]
    y3 = jnp.maximum(z5.reshape(TH, W, C4), 0.0)              # (TH, W, C4)

    # ---- store (== torch.cat([y1, y2, y3], dim=1) followed by ReLU) ---------
    if direct_store:
        # lane-aligned channel-slice stores; no full-output concat copy
        o_ref[0, :, :, :C2] = y1.astype(o_ref.dtype)
        o_ref[0, :, :, C2:] = jnp.concatenate([y2, y3], axis=-1).astype(o_ref.dtype)
    else:
        o_ref[0] = jnp.concatenate([y1, y2, y3], axis=-1).astype(o_ref.dtype)


# ----------------------------------------------------------------------------
# Strip-size heuristic: biggest H-divisor whose strip working set fits a budget.
# ----------------------------------------------------------------------------
def _pick_strip_rows(H, W, Cin, C2, C4, strip_rows, budget_bytes=12 << 20):
    if strip_rows is not None:
        assert H % strip_rows == 0, "strip_rows must divide H"
        return int(strip_rows)
    cout = C2 + 2 * C4
    per_row = W * (2 * 9 * Cin          # stage-1 im2col / taps (bf16)
                   + 2 * 2 * 9 * C4     # stage-2/3 im2col / taps (bf16)
                   + 4 * (C2 + 5 * C4)  # z12 / z34 / z5 (f32)
                   + 8 * cout)          # double-buffered output block
    max_rows = max(8, budget_bytes // max(per_row, 1))
    best = 1
    for d in range(1, H + 1):
        if H % d == 0 and d <= max_rows:
            best = d
    return best


# ----------------------------------------------------------------------------
# Wrappers
# ----------------------------------------------------------------------------
def ssh_forward_nhwc(params, x_nhwc, *, out_dtype=jnp.float32, strip_rows=None):
    """NHWC in -> NHWC out (no layout transposes). out_dtype may be bf16."""
    N, H, W, Cin = x_nhwc.shape
    C2 = params["conv1"]["w"].shape[-1]
    C4 = params["conv2"]["w"].shape[-1]
    Cout = C2 + 2 * C4

    x = x_nhwc.astype(jnp.bfloat16)

    def pack_w(p):
        # fold BN scale into the conv weights (host side, free at run time)
        w = p["w"] * p["scale"]
        kh, kw, ci, co = w.shape
        return w.astype(jnp.bfloat16).reshape(kh * kw * ci, co)

    def cat_bias(names):
        return jnp.concatenate(
            [params[n]["bias"] for n in names])[None, :].astype(jnp.float32)

    w12 = jnp.concatenate([pack_w(params["conv1"]), pack_w(params["conv2"])], axis=-1)
    b12 = cat_bias(("conv1", "conv2"))
    w34 = jnp.concatenate([pack_w(params["conv3"]), pack_w(params["conv4"])], axis=-1)
    b34 = cat_bias(("conv3", "conv4"))
    w5 = pack_w(params["conv5"])
    b5 = cat_bias(("conv5",))

    TH = _pick_strip_rows(H, W, Cin, C2, C4, strip_rows)
    n_strips = H // TH
    taps_x = Cin >= TAP_MIN_C
    taps_t = C4 >= TAP_MIN_C
    direct_store = (C2 % 128 == 0) and (C4 % 128 == 0)

    kernel = functools.partial(
        _ssh_kernel, H=H, W=W, TH=TH, Cin=Cin, C2=C2, C4=C4,
        taps_x=taps_x, taps_t=taps_t, direct_store=direct_store)

    def bcast(a):  # weights / biases: same full block for every grid step
        return pl.BlockSpec(a.shape, lambda n, s: (0, 0))

    out = pl.pallas_call(
        kernel,
        out_shape=jax.ShapeDtypeStruct((N, H, W, Cout), out_dtype),
        grid_spec=pltpu.PrefetchScalarGridSpec(
            num_scalar_prefetch=0,
            grid=(N, n_strips),
            in_specs=[
                pl.BlockSpec((1, H, W, Cin), lambda n, s: (n, 0, 0, 0)),
                bcast(w12), bcast(b12),
                bcast(w34), bcast(b34),
                bcast(w5), bcast(b5),
            ],
            out_specs=pl.BlockSpec((1, TH, W, Cout), lambda n, s: (n, s, 0, 0)),
            scratch_shapes=[pltpu.VMEM((H + 2 * HALO, W, Cin), jnp.bfloat16)],
        ),
        compiler_params=pltpu.CompilerParams(
            # batch axis is parallel (megacore); strip axis is arbitrary because
            # the padded-image scratch is filled at strip 0 and reused.
            dimension_semantics=("parallel", "arbitrary"),
            vmem_limit_bytes=48 * 1024 * 1024),
    )(x, w12, b12, w34, b34, w5, b5)
    return out


def ssh_forward(params, x_nchw, *, out_dtype=jnp.float32, strip_rows=None):
    """Matches SSH.forward: NCHW in -> NCHW out."""
    x = jnp.transpose(x_nchw, (0, 2, 3, 1))
    out = ssh_forward_nhwc(params, x, out_dtype=out_dtype, strip_rows=strip_rows)
    return jnp.transpose(out, (0, 3, 1, 2))


# ----------------------------------------------------------------------------
# Parameter construction (deterministic, synthetic)
# ----------------------------------------------------------------------------
def make_conv_unit_params(key, cin, cout):
    """Conv2d(no bias) HWIO weights + folded BatchNorm(eval) scale/bias."""
    k_w, k_g, k_b, k_m, k_v = jax.random.split(key, 5)
    w = jax.random.normal(k_w, (3, 3, cin, cout), jnp.float32) * 0.1
    gamma = 1.0 + 0.1 * jax.random.normal(k_g, (cout,), jnp.float32)
    beta = 0.1 * jax.random.normal(k_b, (cout,), jnp.float32)
    mean = 0.1 * jax.random.normal(k_m, (cout,), jnp.float32)
    var = jax.nn.softplus(jax.random.normal(k_v, (cout,), jnp.float32)) + 0.5
    scale = gamma / jnp.sqrt(var + BN_EPS)
    bias = beta - mean * scale
    return {"w": w, "scale": scale, "bias": bias}


def make_ssh_params(key, cin, cout):
    ks = jax.random.split(key, 5)
    return {
        "conv1": make_conv_unit_params(ks[0], cin, cout // 2),
        "conv2": make_conv_unit_params(ks[1], cin, cout // 4),
        "conv3": make_conv_unit_params(ks[2], cout // 4, cout // 4),
        "conv4": make_conv_unit_params(ks[3], cout // 4, cout // 4),
        "conv5": make_conv_unit_params(ks[4], cout // 4, cout // 4),
    }


# ----------------------------------------------------------------------------
# Pure-JAX reference (same bf16-input / scale-folded-weight quantization points)
# ----------------------------------------------------------------------------
def conv_unit_ref(x_nhwc, p, leaky):
    xq = x_nhwc.astype(jnp.bfloat16).astype(jnp.float32)
    wq = (p["w"] * p["scale"]).astype(jnp.bfloat16).astype(jnp.float32)
    y = lax.conv_general_dilated(
        xq, wq, window_strides=(1, 1), padding="SAME",
        dimension_numbers=("NHWC", "HWIO", "NHWC"),
        precision=lax.Precision.HIGHEST)
    y = y + p["bias"]
    if leaky:
        y = jnp.where(y >= 0, y, y * LEAKY_SLOPE)
    return y


def ssh_forward_ref(params, x_nchw):
    x = jnp.transpose(x_nchw, (0, 2, 3, 1))
    y1 = conv_unit_ref(x, params["conv1"], False)
    t = conv_unit_ref(x, params["conv2"], True)
    y2 = conv_unit_ref(t, params["conv3"], False)
    y3 = conv_unit_ref(conv_unit_ref(t, params["conv4"], True), params["conv5"], False)
    out = jnp.maximum(jnp.concatenate([y1, y2, y3], axis=-1), 0.0)
    return jnp.transpose(out, (0, 3, 1, 2))


# ----------------------------------------------------------------------------
if __name__ == "__main__":
    key = jax.random.PRNGKey(0)
    k1, k2, k3, k4 = jax.random.split(key, 4)

    # --- config A: small channels (im2col path), forced row-strip tiling -----
    N, CIN, H, W, COUT = 2, 4, 16, 16, 32
    params = make_ssh_params(k1, CIN, COUT)
    x = jax.random.normal(k2, (N, CIN, H, W), jnp.float32)       # NCHW like PyTorch
    ref = jax.block_until_ready(ssh_forward_ref(params, x))

    out_strips = jax.block_until_ready(ssh_forward(params, x, strip_rows=8))
    assert out_strips.shape == (N, COUT, H, W), out_strips.shape
    err_a = float(jnp.max(jnp.abs(out_strips - ref)))
    assert err_a < 2e-2, err_a

    out_auto = jax.block_until_ready(ssh_forward(params, x))     # auto strip size
    err_b = float(jnp.max(jnp.abs(out_auto - ref)))
    assert err_b < 2e-2, err_b

    # --- config B: wide channels -> per-tap matmul path + lane-aligned stores
    N2, CIN2, H2, W2, COUT2 = 1, 128, 16, 16, 512
    params2 = make_ssh_params(k3, CIN2, COUT2)
    x2 = jax.random.normal(k4, (N2, CIN2, H2, W2), jnp.float32)
    ref2 = jax.block_until_ready(ssh_forward_ref(params2, x2))

    out_wide = jax.block_until_ready(ssh_forward(params2, x2, strip_rows=8))
    assert out_wide.shape == (N2, COUT2, H2, W2), out_wide.shape
    err_c = float(jnp.max(jnp.abs(out_wide - ref2)))
    assert err_c < 2e-2, err_c

    print("KERNEL_OK")
</pallas_src>

<mosaic_0001>
module attributes {stable_mosaic.version = 11 : i64} {
  func.func @_ssh_kernel(%arg0: i32, %arg1: i32, %arg2: memref<1x16x16x4xbf16, #tpu.memory_space<vmem>>, %arg3: memref<36x24xbf16, #tpu.memory_space<vmem>>, %arg4: memref<1x24xf32, #tpu.memory_space<vmem>>, %arg5: memref<72x16xbf16, #tpu.memory_space<vmem>>, %arg6: memref<1x16xf32, #tpu.memory_space<vmem>>, %arg7: memref<72x8xbf16, #tpu.memory_space<vmem>>, %arg8: memref<1x8xf32, #tpu.memory_space<vmem>>, %arg9: memref<1x8x16x32xf32, #tpu.memory_space<vmem>>, %arg10: memref<22x16x4xbf16, #tpu.memory_space<vmem>>) attributes {dimension_semantics = [#tpu.dimension_semantics<parallel>, #tpu.dimension_semantics<arbitrary>], iteration_bounds = array<i64: 2, 2>, scalar_prefetch = 0 : i64, scratch_operands = 1 : i64, tpu.core_type = #tpu.core_type<tc>, window_params = [{transform_indices = @transform_0, window_bounds = array<i64: 1, 16, 16, 4>}, {pipeline_mode = #tpu.pipeline_mode<synchronous>, transform_indices = @transform_1, window_bounds = array<i64: 36, 24>}, {pipeline_mode = #tpu.pipeline_mode<synchronous>, transform_indices = @transform_2, window_bounds = array<i64: 1, 24>}, {pipeline_mode = #tpu.pipeline_mode<synchronous>, transform_indices = @transform_3, window_bounds = array<i64: 72, 16>}, {pipeline_mode = #tpu.pipeline_mode<synchronous>, transform_indices = @transform_4, window_bounds = array<i64: 1, 16>}, {pipeline_mode = #tpu.pipeline_mode<synchronous>, transform_indices = @transform_5, window_bounds = array<i64: 72, 8>}, {pipeline_mode = #tpu.pipeline_mode<synchronous>, transform_indices = @transform_6, window_bounds = array<i64: 1, 8>}, {transform_indices = @transform_7, window_bounds = array<i64: 1, 8, 16, 32>}]} {
    %c0_i32 = arith.constant 0 : i32
    %0 = arith.cmpi eq, %arg1, %c0_i32 : i32
    %1 = arith.extui %0 : i1 to i32
    %c0_i32_0 = arith.constant 0 : i32
    %2 = arith.cmpi ne, %1, %c0_i32_0 : i32
    scf.if %2 {
      %cst_35 = arith.constant 0.000000e+00 : bf16
      %116 = vector.broadcast %cst_35 : bf16 to vector<3x16x4xbf16>
      %c0_36 = arith.constant 0 : index
      %c0_37 = arith.constant 0 : index
      %c0_38 = arith.constant 0 : index
      %c0_39 = arith.constant 0 : index
      %117 = vector.load %arg2[%c0_36, %c0_37, %c0_38, %c0_39] : memref<1x16x16x4xbf16, #tpu.memory_space<vmem>>, vector<1x16x16x4xbf16>
      %118 = vector.shape_cast %117 : vector<1x16x16x4xbf16> to vector<16x16x4xbf16>
      %119 = tpu.concatenate %116, %118, %116 in 0 : vector<3x16x4xbf16>, vector<16x16x4xbf16>, vector<3x16x4xbf16> -> vector<22x16x4xbf16>
      %c0_40 = arith.constant 0 : index
      %c0_41 = arith.constant 0 : index
      %c0_42 = arith.constant 0 : index
      %120 = vector.load %arg10[%c0_40, %c0_41, %c0_42] : memref<22x16x4xbf16, #tpu.memory_space<vmem>>, vector<22x16x4xbf16>
      tpu.vector_store %arg10[%c0_40, %c0_41, %c0_42], %119 {strides = array<i32>} : memref<22x16x4xbf16, #tpu.memory_space<vmem>>, vector<22x16x4xbf16>,
    } else {
    }
    %c8_i32 = arith.constant 8 : i32
    %3 = arith.muli %arg1, %c8_i32 : i32
    %4 = tpu.assume_multiple %3, 8 : i32
    %5 = arith.index_cast %4 : i32 to index
    %c0 = arith.constant 0 : index
    %c0_1 = arith.constant 0 : index
    %6 = vector.load %arg10[%5, %c0, %c0_1] : memref<22x16x4xbf16, #tpu.memory_space<vmem>>, vector<14x16x4xbf16>
    %cst = arith.constant 0.000000e+00 : bf16
    %7 = vector.broadcast %cst : bf16 to vector<14x1x4xbf16>
    %8 = tpu.concatenate %7, %6, %7 in 1 : vector<14x1x4xbf16>, vector<14x16x4xbf16>, vector<14x1x4xbf16> -> vector<14x18x4xbf16>
    %9 = vector.extract_strided_slice %8 {offsets = [0, 0, 0], sizes = [14, 16, 4], strides = [1, 1, 1]} : vector<14x18x4xbf16> to vector<14x16x4xbf16>
    %10 = vector.extract_strided_slice %8 {offsets = [0, 1, 0], sizes = [14, 16, 4], strides = [1, 1, 1]} : vector<14x18x4xbf16> to vector<14x16x4xbf16>
    %11 = vector.extract_strided_slice %8 {offsets = [0, 2, 0], sizes = [14, 16, 4], strides = [1, 1, 1]} : vector<14x18x4xbf16> to vector<14x16x4xbf16>
    %12 = tpu.concatenate %9, %10, %11 in 2 : vector<14x16x4xbf16>, vector<14x16x4xbf16>, vector<14x16x4xbf16> -> vector<14x16x12xbf16>
    %13 = vector.extract_strided_slice %12 {offsets = [0, 0, 0], sizes = [12, 16, 12], strides = [1, 1, 1]} : vector<14x16x12xbf16> to vector<12x16x12xbf16>
    %14 = vector.extract_strided_slice %12 {offsets = [1, 0, 0], sizes = [12, 16, 12], strides = [1, 1, 1]} : vector<14x16x12xbf16> to vector<12x16x12xbf16>
    %15 = vector.extract_strided_slice %12 {offsets = [2, 0, 0], sizes = [12, 16, 12], strides = [1, 1, 1]} : vector<14x16x12xbf16> to vector<12x16x12xbf16>
    %16 = tpu.concatenate %13, %14, %15 in 2 : vector<12x16x12xbf16>, vector<12x16x12xbf16>, vector<12x16x12xbf16> -> vector<12x16x36xbf16>
    %17 = vector.shape_cast %16 : vector<12x16x36xbf16> to vector<192x36xbf16>
    %c0_2 = arith.constant 0 : index
    %c0_3 = arith.constant 0 : index
    %18 = vector.load %arg3[%c0_2, %c0_3] : memref<36x24xbf16, #tpu.memory_space<vmem>>, vector<36x24xbf16>
    %cst_4 = arith.constant dense<0.000000e+00> : vector<192x24xf32>
    %19 = tpu.matmul %17, %18, %cst_4 {dimension_numbers = #tpu.dot_dimension_numbers<[1], [0], [0], [1], [0, 0, 1, 1], [], []>} : vector<192x36xbf16>, vector<36x24xbf16>, vector<192x24xf32> -> vector<192x24xf32>
    %c0_5 = arith.constant 0 : index
    %c0_6 = arith.constant 0 : index
    %20 = vector.load %arg4[%c0_5, %c0_6] : memref<1x24xf32, #tpu.memory_space<vmem>>, vector<1x24xf32>
    %21 = vector.shape_cast %20 : vector<1x24xf32> to vector<24xf32>
    %22 = vector.shape_cast %21 : vector<24xf32> to vector<1x24xf32>
    %23 = vector.broadcast %22 : vector<1x24xf32> to vector<192x24xf32>
    %24 = arith.addf %19, %23 : vector<192x24xf32>
    %25 = vector.shape_cast %24 : vector<192x24xf32> to vector<12x16x24xf32>
    %26 = vector.extract_strided_slice %25 {offsets = [2, 0, 0], sizes = [8, 16, 16], strides = [1, 1, 1]} : vector<12x16x24xf32> to vector<8x16x16xf32>
    %cst_7 = arith.constant 0.000000e+00 : f32
    %27 = vector.broadcast %cst_7 : f32 to vector<8x16x16xf32>
    %28 = arith.maximumf %26, %27 : vector<8x16x16xf32>
    %29 = vector.extract_strided_slice %25 {offsets = [0, 0, 16], sizes = [12, 16, 8], strides = [1, 1, 1]} : vector<12x16x24xf32> to vector<12x16x8xf32>
    %cst_8 = arith.constant 0.000000e+00 : f32
    %30 = vector.broadcast %cst_8 : f32 to vector<12x16x8xf32>
    %31 = arith.cmpf oge, %29, %30 : vector<12x16x8xf32>
    %cst_9 = arith.constant 1.000000e-01 : f32
    %32 = vector.broadcast %cst_9 : f32 to vector<12x16x8xf32>
    %33 = arith.mulf %29, %32 : vector<12x16x8xf32>
    %34 = arith.select %31, %29, %33 : vector<12x16x8xi1>, vector<12x16x8xf32>
    %c2_i32 = arith.constant 2 : i32
    %35 = arith.subi %4, %c2_i32 : i32
    %36 = tpu.iota {dimensions = array<i32: 0>} : vector<12x1x1xi32>
    %37 = vector.broadcast %35 : i32 to vector<12x1x1xi32>
    %38 = arith.addi %37, %36 : vector<12x1x1xi32>
    %c0_i32_10 = arith.constant 0 : i32
    %39 = vector.broadcast %c0_i32_10 : i32 to vector<12x1x1xi32>
    %40 = arith.cmpi sge, %38, %39 : vector<12x1x1xi32>
    %c16_i32 = arith.constant 16 : i32
    %41 = vector.broadcast %c16_i32 : i32 to vector<12x1x1xi32>
    %42 = arith.cmpi slt, %38, %41 : vector<12x1x1xi32>
    %43 = arith.andi %40, %42 : vector<12x1x1xi1>
    %cst_11 = arith.constant 0.000000e+00 : f32
    %44 = vector.shape_cast %43 : vector<12x1x1xi1> to vector<12x1x1xi1>
    %45 = vector.broadcast %44 : vector<12x1x1xi1> to vector<12x16x8xi1>
    %46 = vector.broadcast %cst_11 : f32 to vector<12x16x8xf32>
    %47 = arith.select %45, %34, %46 : vector<12x16x8xi1>, vector<12x16x8xf32>
    %48 = arith.truncf %47 : vector<12x16x8xf32> to vector<12x16x8xbf16>
    %cst_12 = arith.constant 0.000000e+00 : bf16
    %49 = vector.broadcast %cst_12 : bf16 to vector<12x1x8xbf16>
    %50 = tpu.concatenate %49, %48, %49 in 1 : vector<12x1x8xbf16>, vector<12x16x8xbf16>, vector<12x1x8xbf16> -> vector<12x18x8xbf16>
    %51 = vector.extract_strided_slice %50 {offsets = [0, 0, 0], sizes = [12, 16, 8], strides = [1, 1, 1]} : vector<12x18x8xbf16> to vector<12x16x8xbf16>
    %52 = vector.extract_strided_slice %50 {offsets = [0, 1, 0], sizes = [12, 16, 8], strides = [1, 1, 1]} : vector<12x18x8xbf16> to vector<12x16x8xbf16>
    %53 = vector.extract_strided_slice %50 {offsets = [0, 2, 0], sizes = [12, 16, 8], strides = [1, 1, 1]} : vector<12x18x8xbf16> to vector<12x16x8xbf16>
    %54 = tpu.concatenate %51, %52, %53 in 2 : vector<12x16x8xbf16>, vector<12x16x8xbf16>, vector<12x16x8xbf16> -> vector<12x16x24xbf16>
    %55 = vector.extract_strided_slice %54 {offsets = [0, 0, 0], sizes = [10, 16, 24], strides = [1, 1, 1]} : vector<12x16x24xbf16> to vector<10x16x24xbf16>
    %56 = vector.extract_strided_slice %54 {offsets = [1, 0, 0], sizes = [10, 16, 24], strides = [1, 1, 1]} : vector<12x16x24xbf16> to vector<10x16x24xbf16>
    %57 = vector.extract_strided_slice %54 {offsets = [2, 0, 0], sizes = [10, 16, 24], strides = [1, 1, 1]} : vector<12x16x24xbf16> to vector<10x16x24xbf16>
    %58 = tpu.concatenate %55, %56, %57 in 2 : vector<10x16x24xbf16>, vector<10x16x24xbf16>, vector<10x16x24xbf16> -> vector<10x16x72xbf16>
    %59 = vector.shape_cast %58 : vector<10x16x72xbf16> to vector<160x72xbf16>
    %c0_13 = arith.constant 0 : index
    %c0_14 = arith.constant 0 : index
    %60 = vector.load %arg5[%c0_13, %c0_14] : memref<72x16xbf16, #tpu.memory_space<vmem>>, vector<72x16xbf16>
    %cst_15 = arith.constant dense<0.000000e+00> : vector<160x16xf32>
    %61 = tpu.matmul %59, %60, %cst_15 {dimension_numbers = #tpu.dot_dimension_numbers<[1], [0], [0], [1], [0, 0, 1, 1], [], []>} : vector<160x72xbf16>, vector<72x16xbf16>, vector<160x16xf32> -> vector<160x16xf32>
    %c0_16 = arith.constant 0 : index
    %c0_17 = arith.constant 0 : index
    %62 = vector.load %arg6[%c0_16, %c0_17] : memref<1x16xf32, #tpu.memory_space<vmem>>, vector<1x16xf32>
    %63 = vector.shape_cast %62 : vector<1x16xf32> to vector<16xf32>
    %64 = vector.shape_cast %63 : vector<16xf32> to vector<1x16xf32>
    %65 = vector.broadcast %64 : vector<1x16xf32> to vector<160x16xf32>
    %66 = arith.addf %61, %65 : vector<160x16xf32>
    %67 = vector.shape_cast %66 : vector<160x16xf32> to vector<10x16x16xf32>
    %68 = vector.extract_strided_slice %67 {offsets = [1, 0, 0], sizes = [8, 16, 8], strides = [1, 1, 1]} : vector<10x16x16xf32> to vector<8x16x8xf32>
    %cst_18 = arith.constant 0.000000e+00 : f32
    %69 = vector.broadcast %cst_18 : f32 to vector<8x16x8xf32>
    %70 = arith.maximumf %68, %69 : vector<8x16x8xf32>
    %71 = vector.extract_strided_slice %67 {offsets = [0, 0, 8], sizes = [10, 16, 8], strides = [1, 1, 1]} : vector<10x16x16xf32> to vector<10x16x8xf32>
    %cst_19 = arith.constant 0.000000e+00 : f32
    %72 = vector.broadcast %cst_19 : f32 to vector<10x16x8xf32>
    %73 = arith.cmpf oge, %71, %72 : vector<10x16x8xf32>
    %cst_20 = arith.constant 1.000000e-01 : f32
    %74 = vector.broadcast %cst_20 : f32 to vector<10x16x8xf32>
    %75 = arith.mulf %71, %74 : vector<10x16x8xf32>
    %76 = arith.select %73, %71, %75 : vector<10x16x8xi1>, vector<10x16x8xf32>
    %c1_i32 = arith.constant 1 : i32
    %77 = arith.subi %4, %c1_i32 : i32
    %78 = tpu.iota {dimensions = array<i32: 0>} : vector<10x1x1xi32>
    %79 = vector.broadcast %77 : i32 to vector<10x1x1xi32>
    %80 = arith.addi %79, %78 : vector<10x1x1xi32>
    %c0_i32_21 = arith.constant 0 : i32
    %81 = vector.broadcast %c0_i32_21 : i32 to vector<10x1x1xi32>
    %82 = arith.cmpi sge, %80, %81 : vector<10x1x1xi32>
    %c16_i32_22 = arith.constant 16 : i32
    %83 = vector.broadcast %c16_i32_22 : i32 to vector<10x1x1xi32>
    %84 = arith.cmpi slt, %80, %83 : vector<10x1x1xi32>
    %85 = arith.andi %82, %84 : vector<10x1x1xi1>
    %cst_23 = arith.constant 0.000000e+00 : f32
    %86 = vector.shape_cast %85 : vector<10x1x1xi1> to vector<10x1x1xi1>
    %87 = vector.broadcast %86 : vector<10x1x1xi1> to vector<10x16x8xi1>
    %88 = vector.broadcast %cst_23 : f32 to vector<10x16x8xf32>
    %89 = arith.select %87, %76, %88 : vector<10x16x8xi1>, vector<10x16x8xf32>
    %90 = arith.truncf %89 : vector<10x16x8xf32> to vector<10x16x8xbf16>
    %cst_24 = arith.constant 0.000000e+00 : bf16
    %91 = vector.broadcast %cst_24 : bf16 to vector<10x1x8xbf16>
    %92 = tpu.concatenate %91, %90, %91 in 1 : vector<10x1x8xbf16>, vector<10x16x8xbf16>, vector<10x1x8xbf16> -> vector<10x18x8xbf16>
    %93 = vector.extract_strided_slice %92 {offsets = [0, 0, 0], sizes = [10, 16, 8], strides = [1, 1, 1]} : vector<10x18x8xbf16> to vector<10x16x8xbf16>
    %94 = vector.extract_strided_slice %92 {offsets = [0, 1, 0], sizes = [10, 16, 8], strides = [1, 1, 1]} : vector<10x18x8xbf16> to vector<10x16x8xbf16>
    %95 = vector.extract_strided_slice %92 {offsets = [0, 2, 0], sizes = [10, 16, 8], strides = [1, 1, 1]} : vector<10x18x8xbf16> to vector<10x16x8xbf16>
    %96 = tpu.concatenate %93, %94, %95 in 2 : vector<10x16x8xbf16>, vector<10x16x8xbf16>, vector<10x16x8xbf16> -> vector<10x16x24xbf16>
    %97 = vector.extract_strided_slice %96 {offsets = [0, 0, 0], sizes = [8, 16, 24], strides = [1, 1, 1]} : vector<10x16x24xbf16> to vector<8x16x24xbf16>
    %98 = vector.extract_strided_slice %96 {offsets = [1, 0, 0], sizes = [8, 16, 24], strides = [1, 1, 1]} : vector<10x16x24xbf16> to vector<8x16x24xbf16>
    %99 = vector.extract_strided_slice %96 {offsets = [2, 0, 0], sizes = [8, 16, 24], strides = [1, 1, 1]} : vector<10x16x24xbf16> to vector<8x16x24xbf16>
    %100 = tpu.concatenate %97, %98, %99 in 2 : vector<8x16x24xbf16>, vector<8x16x24xbf16>, vector<8x16x24xbf16> -> vector<8x16x72xbf16>
    %101 = vector.shape_cast %100 : vector<8x16x72xbf16> to vector<128x72xbf16>
    %c0_25 = arith.constant 0 : index
    %c0_26 = arith.constant 0 : index
    %102 = vector.load %arg7[%c0_25, %c0_26] : memref<72x8xbf16, #tpu.memory_space<vmem>>, vector<72x8xbf16>
    %cst_27 = arith.constant dense<0.000000e+00> : vector<128x8xf32>
    %103 = tpu.matmul %101, %102, %cst_27 {dimension_numbers = #tpu.dot_dimension_numbers<[1], [0], [0], [1], [0, 0, 1, 1], [], []>} : vector<128x72xbf16>, vector<72x8xbf16>, vector<128x8xf32> -> vector<128x8xf32>
    %c0_28 = arith.constant 0 : index
    %c0_29 = arith.constant 0 : index
    %104 = vector.load %arg8[%c0_28, %c0_29] : memref<1x8xf32, #tpu.memory_space<vmem>>, vector<1x8xf32>
    %105 = vector.shape_cast %104 : vector<1x8xf32> to vector<8xf32>
    %106 = vector.shape_cast %105 : vector<8xf32> to vector<1x8xf32>
    %107 = vector.broadcast %106 : vector<1x8xf32> to vector<128x8xf32>
    %108 = arith.addf %103, %107 : vector<128x8xf32>
    %109 = vector.shape_cast %108 : vector<128x8xf32> to vector<8x16x8xf32>
    %cst_30 = arith.constant 0.000000e+00 : f32
    %110 = vector.broadcast %cst_30 : f32 to vector<8x16x8xf32>
    %111 = arith.maximumf %109, %110 : vector<8x16x8xf32>
    %112 = tpu.concatenate %28, %70, %111 in 2 : vector<8x16x16xf32>, vector<8x16x8xf32>, vector<8x16x8xf32> -> vector<8x16x32xf32>
    %c0_31 = arith.constant 0 : index
    %c0_32 = arith.constant 0 : index
    %c0_33 = arith.constant 0 : index
    %c0_34 = arith.constant 0 : index
    %113 = vector.load %arg9[%c0_31, %c0_32, %c0_33, %c0_34] : memref<1x8x16x32xf32, #tpu.memory_space<vmem>>, vector<1x8x16x32xf32>
    %114 = vector.shape_cast %113 : vector<1x8x16x32xf32> to vector<8x16x32xf32>
    %115 = vector.shape_cast %112 : vector<8x16x32xf32> to vector<1x8x16x32xf32>
    tpu.vector_store %arg9[%c0_31, %c0_32, %c0_33, %c0_34], %115 {strides = array<i32>} : memref<1x8x16x32xf32, #tpu.memory_space<vmem>>, vector<1x8x16x32xf32>,
    return
  }
  func.func @transform_0(%arg0: i32, %arg1: i32) -> (i32, i32, i32, i32) {
    %c0_i32 = arith.constant 0 : i32
    %c0_i32_0 = arith.constant 0 : i32
    %c0_i32_1 = arith.constant 0 : i32
    %c0_i32_2 = arith.constant 0 : i32
    return %arg0, %c0_i32, %c0_i32_0, %c0_i32_1 : i32, i32, i32, i32
  }
  func.func @transform_1(%arg0: i32, %arg1: i32) -> (i32, i32) {
    %c0_i32 = arith.constant 0 : i32
    %c0_i32_0 = arith.constant 0 : i32
    %c0_i32_1 = arith.constant 0 : i32
    return %c0_i32, %c0_i32_0 : i32, i32
  }
  func.func @transform_2(%arg0: i32, %arg1: i32) -> (i32, i32) {
    %c0_i32 = arith.constant 0 : i32
    %c0_i32_0 = arith.constant 0 : i32
    %c0_i32_1 = arith.constant 0 : i32
    return %c0_i32, %c0_i32_0 : i32, i32
  }
  func.func @transform_3(%arg0: i32, %arg1: i32) -> (i32, i32) {
    %c0_i32 = arith.constant 0 : i32
    %c0_i32_0 = arith.constant 0 : i32
    %c0_i32_1 = arith.constant 0 : i32
    return %c0_i32, %c0_i32_0 : i32, i32
  }
  func.func @transform_4(%arg0: i32, %arg1: i32) -> (i32, i32) {
    %c0_i32 = arith.constant 0 : i32
    %c0_i32_0 = arith.constant 0 : i32
    %c0_i32_1 = arith.constant 0 : i32
    return %c0_i32, %c0_i32_0 : i32, i32
  }
  func.func @transform_5(%arg0: i32, %arg1: i32) -> (i32, i32) {
    %c0_i32 = arith.constant 0 : i32
    %c0_i32_0 = arith.constant 0 : i32
    %c0_i32_1 = arith.constant 0 : i32
    return %c0_i32, %c0_i32_0 : i32, i32
  }
  func.func @transform_6(%arg0: i32, %arg1: i32) -> (i32, i32) {
    %c0_i32 = arith.constant 0 : i32
    %c0_i32_0 = arith.constant 0 : i32
    %c0_i32_1 = arith.constant 0 : i32
    return %c0_i32, %c0_i32_0 : i32, i32
  }
  func.func @transform_7(%arg0: i32, %arg1: i32) -> (i32, i32, i32, i32) {
    %c0_i32 = arith.constant 0 : i32
    %c0_i32_0 = arith.constant 0 : i32
    %c0_i32_1 = arith.constant 0 : i32
    return %arg0, %arg1, %c0_i32, %c0_i32_0 : i32, i32, i32, i32
  }
}

</mosaic_0001>

<bundles_post_ra>
// kernel: tpu_custom_call.1
= control target key start
LH: loop header
LB: loop body
LE: loop exit
PB: predicated region body
PF: predicated region fallthrough
CT: control target
= control target key end

     0   :  { %12 = vsyncpa [#allocation4], 0  ;;  %s5667_s0 = inlined_call_operand.vmem [shape: bf16[2,16,16,4], index: 0, kind: input, shape index: {}]   ;;  %s5668_s1 = inlined_call_operand.vmem [shape: bf16[36,24], index: 1, kind: input, shape index: {}]   ;;  %s5669_s2 = inlined_call_operand.vmem [shape: f32[1,24], index: 2, kind: input, shape index: {}]   ;;  %s5670_s3 = inlined_call_operand.vmem [shape: bf16[72,16], index: 3, kind: input, shape index: {}]   ;;  %s5671_s4 = inlined_call_operand.vmem [shape: f32[1,16], index: 4, kind: input, shape index: {}]   ;;  %s5672_s5 = inlined_call_operand.vmem [shape: bf16[72,8], index: 5, kind: input, shape index: {}]   ;;  %s5673_s6 = inlined_call_operand.vmem [shape: f32[1,8], index: 6, kind: input, shape index: {}]   ;;  %s5674_s7 = inlined_call_operand.hbm [shape: f32[2,16,16,32], index: 7, kind: output, shape index: {}]  }
   0x1   :  { %14 = vsyncpa [#allocation4 + $0x1], 0  ;;  %s3791_s24 = smov 0   ;;  %s3793_s25 = smov 0  }
   0x2   :  { %s3795_s26 = smov 0   ;;  %s3797_s27 = smov 0  }
   0x3   :  { %s3799_s28 = smov 0   ;;  %s3801_s29 = smov 0  }
   0x4   :  { %s3803_s30 = smov 0   ;;  %s3805_s8 = smov 0  }
   0x5 LB: > { %s3310_s9 = sadd.s32 4294967295, %s3738_s8   ;;  %s3311_s10 = sadd.s32 4294967294, %s3738_s8   ;;  %s3738_s8 = sphi %s3805_s8, %s20_s8   ;;  %s3734_s30 = sphi %s3803_s30, %s5846_s30   ;;  %s3730_s29 = sphi %s3801_s29, %s5845_s29   ;;  %s3726_s28 = sphi %s3799_s28, %s5844_s28   ;;  %s3722_s27 = sphi %s3797_s27, %s5843_s27   ;;  %s3718_s26 = sphi %s3795_s26, %s5842_s26   ;;  %s3714_s25 = sphi %s3793_s25, %s5841_s25   ;;  %s3710_s24 = sphi %s3791_s24, %s5840_s24  }
   0x6   : > { %s29_s11 = sadd.s32 1, %s3730_s29  ;;  %s32_s12 = sadd.s32 1, %s3734_s30 }
   0x7   : > { %p30_p0 = scmp.ge.s32.totalorder %s29_s11, 2  ;;  %p203_p1 = scmp.ne.s32.totalorder %s3718_s26, %s3714_s25 }
   0x8   : > { %p204_p2 = scmp.eq.s32.totalorder %s3310_s9, 3  ;;  %p209_p5 = scmp.ne.s32.totalorder %s3714_s25, %s3710_s24 }
   0x9   : > { %s5848_s11 = smov (%p30_p0, %s29_s11), 0  ;;  %s5850_s12 = smov (!%p30_p0, %s32_s12), %s3734_s30 }
   0xa   : > { %s189_s13 = ssub.s32 %s3730_s29, %s5848_s11  ;;  %p3842_p3 = por %p204_p2, %p203_p1 }
   0xb   : > { %p34_p4 = scmp.ge.s32.totalorder %s5850_s12, 2  ;;  %p210_p6 = scmp.eq.s32.totalorder %s3311_s10, 3 }
   0xc   : > { %p3314_p7 = scmp.ge.s32.totalorder %s3738_s8, 1  ;;  %p254_p9 = scmp.lt.s32.totalorder %s3738_s8, 5 }
   0xd   : > { %s5852_s12 = smov (%p34_p4, %s5850_s12), 0  ;;  %p3851_p8 = por %p210_p6, %p209_p5 }
   0xe   : > { %5688 = sst [smem:[#allocation6_spill]] %s5852_s12  ;;  %s188_s16 = ssub.s32 %s3734_s30, %s5852_s12 }
   0xf   : > { %s193_s17 = sadd.s32 1, %s3718_s26  ;;  %s190_s18 = sor.u32 %s189_s13, %s188_s16 }
  0x10   : > { %p255_p10 = pnand %p3314_p7, %p254_p9  ;;  %p191_p11 = scmp.eq.s32.totalorder %s190_s18, 0 }
  0x12   : > { %s3860_s19 = scalar_select %p191_p11, %s3718_s26, %s193_s17  }
  0x13   : > { %258 = sbr.rel (%p255_p10) target bundleno = 1900 (0x76c), region = 48 }
  0x1a   : > { %s5678_s20 = sand.u32 1, %s3714_s25   ;;  %p286_p12 = scmp.lt.s32.totalorder %s3726_s28, 1 }
  0x1b   : > { %s3315_s21 = sshll.u32 %s5678_s20, 7  ;;  %p3318_p13 = scmp.ne.s32.totalorder %s3722_s27, 0 }
  0x1c   : > { %s287_s22 = scalar_select %p286_p12, %s3726_s28, 1 }
  0x1d   : > { %s3872_s13 = scalar_lea.vmem [#allocation3], %s3315_s21  ;;  %296 = sbr.rel (%p3318_p13) target bundleno = 41 (0x29), region = 52  ;;  %vm425_vm0 = vcmask (!%p3318_p13), 31744   ;;  %v3740_v0 = vmov (!%p3318_p13), 0  }
  0x1e   : > { %s3392_s23 = sshll.u32 %s287_s22, 7  ;;  %426 = vst.msk [vmem:[#allocation2] sm:$0xff] (!%p3318_p13), %vm425_vm0, %v3740_v0  ;;  %427 = vst.msk [vmem:[#allocation2 + $0x8] sm:$0xff] (!%p3318_p13), %vm425_vm0, %v3740_v0 }
  0x1f   : > { %s3870_s12 = scalar_lea.vmem %s5667_s0, %s3392_s23  ;;  %428 = vst.msk [vmem:[#allocation2 + $0x10] sm:$0xff] (!%p3318_p13), %vm425_vm0, %v3740_v0  ;;  %445 = vst.msk [vmem:[#allocation2 + $0x98] sm:$0xff] (!%p3318_p13), %vm425_vm0, %v3740_v0 }
  0x20   : > { %446 = vst.msk [vmem:[#allocation2 + $0xa0] sm:$0xff] (!%p3318_p13), %vm425_vm0, %v3740_v0  ;;  %447 = vst.msk [vmem:[#allocation2 + $0xa8] sm:$0xff] (!%p3318_p13), %vm425_vm0, %v3740_v0  ;;  %v3615_v1 = vld [vmem:[%s3870_s12] sm:$0xff] (!%p3318_p13)   ;;  %v3616_v2 = vld [vmem:[%s3870_s12 + $0x8] sm:$0xff] (!%p3318_p13)  }
  0x21   : > { %429 = vst.msk [vmem:[#allocation2 + $0x18] sm:$0xff] (!%p3318_p13), %vm425_vm0, %v3615_v1  ;;  %v3617_v3 = vld [vmem:[%s3870_s12 + $0x10] sm:$0xff] (!%p3318_p13)   ;;  %430 = vst.msk [vmem:[#allocation2 + $0x20] sm:$0xff] (!%p3318_p13), %vm425_vm0, %v3616_v2  ;;  %v3618_v4 = vld [vmem:[%s3870_s12 + $0x18] sm:$0xff] (!%p3318_p13)  }
  0x22   : > { %431 = vst.msk [vmem:[#allocation2 + $0x28] sm:$0xff] (!%p3318_p13), %vm425_vm0, %v3617_v3  ;;  %v3619_v5 = vld [vmem:[%s3870_s12 + $0x20] sm:$0xff] (!%p3318_p13)   ;;  %432 = vst.msk [vmem:[#allocation2 + $0x30] sm:$0xff] (!%p3318_p13), %vm425_vm0, %v3618_v4  ;;  %v3620_v6 = vld [vmem:[%s3870_s12 + $0x28] sm:$0xff] (!%p3318_p13)  }
  0x23   : > { %433 = vst.msk [vmem:[#allocation2 + $0x38] sm:$0xff] (!%p3318_p13), %vm425_vm0, %v3619_v5  ;;  %v3621_v7 = vld [vmem:[%s3870_s12 + $0x30] sm:$0xff] (!%p3318_p13)   ;;  %434 = vst.msk [vmem:[#allocation2 + $0x40] sm:$0xff] (!%p3318_p13), %vm425_vm0, %v3620_v6  ;;  %v3622_v8 = vld [vmem:[%s3870_s12 + $0x38] sm:$0xff] (!%p3318_p13)  }
  0x24   : > { %435 = vst.msk [vmem:[#allocation2 + $0x48] sm:$0xff] %vm425_vm0, %v3621_v7  ;;  %v3623_v9 = vld [vmem:[%s3870_s12 + $0x40] sm:$0xff]   ;;  %436 = vst.msk [vmem:[#allocation2 + $0x50] sm:$0xff] %vm425_vm0, %v3622_v8  ;;  %v3624_v10 = vld [vmem:[%s3870_s12 + $0x48] sm:$0xff]  }
  0x25   : > { %437 = vst.msk [vmem:[#allocation2 + $0x58] sm:$0xff] %vm425_vm0, %v3623_v9  ;;  %v3625_v11 = vld [vmem:[%s3870_s12 + $0x50] sm:$0xff]   ;;  %438 = vst.msk [vmem:[#allocation2 + $0x60] sm:$0xff] %vm425_vm0, %v3624_v10  ;;  %v3626_v12 = vld [vmem:[%s3870_s12 + $0x58] sm:$0xff]  }
  0x26   : > { %439 = vst.msk [vmem:[#allocation2 + $0x68] sm:$0xff] %vm425_vm0, %v3625_v11  ;;  %v3627_v13 = vld [vmem:[%s3870_s12 + $0x60] sm:$0xff]   ;;  %440 = vst.msk [vmem:[#allocation2 + $0x70] sm:$0xff] %vm425_vm0, %v3626_v12  ;;  %v3628_v14 = vld [vmem:[%s3870_s12 + $0x68] sm:$0xff]  }
  0x27   : > { %441 = vst.msk [vmem:[#allocation2 + $0x78] sm:$0xff] %vm425_vm0, %v3627_v13  ;;  %v3629_v15 = vld [vmem:[%s3870_s12 + $0x70] sm:$0xff]   ;;  %442 = vst.msk [vmem:[#allocation2 + $0x80] sm:$0xff] %vm425_vm0, %v3628_v14  ;;  %v3630_v16 = vld [vmem:[%s3870_s12 + $0x78] sm:$0xff]  }
  0x28   : > { %443 = vst.msk [vmem:[#allocation2 + $0x88] sm:$0xff] %vm425_vm0, %v3629_v15  ;;  %444 = vst.msk [vmem:[#allocation2 + $0x90] sm:$0xff] %vm425_vm0, %v3630_v16 }
  0x29 PF: > { %s3393_s16 = sshll.u32 %s3722_s27, 6  ;;  %vm591_vm1 = vcmask 1040384   ;;  %vm592_vm2 = vsmask.f32 256  ;;  %vm622_vm3 = vsmask.f32 7424 }
  0x2a   : > { %s3914_s17 = scalar_lea.vmem [#allocation2], %s3393_s16  ;;  %vm847_vm4 = vcmask 1046528   ;;  %vm3928_vm5 = vmand %vm591_vm1, %vm592_vm2  ;;  %s5684_s12 = smov 8   ;;  %vm1139_vm6 = vcmask 1041408   ;;  %vm918_vm7 = vcmask 31744   ;;  %vm5677_vm8 = vcmask 64512  }
  0x2b   : > { %s3742_s18 = smov 4   ;;  %vm1037_vm9 = vcmask 97280   ;;  %vm5676_vm10 = vcmask 195584   ;;  %vm1114_vm11 = vcmask 293888   ;;  %s3335_s21 = sshll.u32 %s3722_s27, 3 }
  0x2c   : > { %s3353_s22 = sadd.s32 4294967294, %s3335_s21  ;;  %s3745_s10 = smov 112  }
  0x2d   : > { %s3746_s16 = smov 16   ;;  %s5685_s20 = smov 48  }
  0x2e   : > { %s5837_s9 = sand.u32 1, %s3714_s25  }
  0x2f   : > { %v452_v17 = vld [vmem:[%s3914_s17 + $0x8] sm:$0xff]  ;;  %v453_v18 = vld [vmem:[%s3914_s17 + $0x10] sm:$0xff]  ;;  %v454_v19 = vld [vmem:[%s3914_s17 + $0x18] sm:$0xff] }
  0x30   : > { %v473_v20 = vshrl.u32 %v452_v17, 16  ;;  %v476_v21 = vshll.u32 %v452_v17, 16  ;;  %v480_v22 = vshrl.u32 %v453_v18, 16  ;;  %v483_v23 = vshll.u32 %v453_v18, 16  ;;  %v455_v24 = vld [vmem:[%s3914_s17 + $0x20] sm:$0xff]  ;;  %v3921_v25 = vld [vmem:[%s3914_s17 + $0x28] sm:$0xff] }
  0x31   : > { %v487_v26 = vshrl.u32 %v454_v19, 16  ;;  %v490_v27 = vshll.u32 %v454_v19, 16  ;;  %v494_v28 = vshrl.u32 %v455_v24, 16  ;;  %v497_v31 = vshll.u32 %v455_v24, 16  ;;  %v3924_v32 = vld [vmem:[%s3914_s17 + $0x30] sm:$0xff]  ;;  %v458_v6 = vld [vmem:[%s3914_s17 + $0x38] sm:$0xff] }
  0x32   : > { %v475_v29 = vrot.slane %v473_v20, 7  ;;  %v482_v30 = vrot.slane %v480_v22, 7  ;;  %v501_v36 = vshrl.u32 %v3921_v25, 16  ;;  %v504_v37 = vshll.u32 %v3921_v25, 16 }
  0x33   : > { %v489_v34 = vrot.slane %v487_v26, 7  ;;  %v496_v35 = vrot.slane %v494_v28, 7  ;;  %v508_v45 = vshrl.u32 %v3924_v32, 16  ;;  %v511_v49 = vshll.u32 %v3924_v32, 16 }
  0x34   : > { %v478_v38 = vor.u32 %v476_v21, %v475_v29  ;;  %v609_v39 = vsel %vm3928_vm5, %v475_v29, 0  ;;  %v485_v40 = vor.u32 %v483_v23, %v482_v30  ;;  %v610_v41 = vsel %vm3928_vm5, %v482_v30, 0 }
  0x35   : > { %v643_v42 = vshll.u32 %v609_v39, 16  ;;  %v852_v43 = vrot.slane %v609_v39, 1  ;;  %v492_v44 = vor.u32 %v490_v27, %v489_v34  ;;  %v655_v48 = vshll.u32 %v610_v41, 16  ;;  %v459_v39 = vld [vmem:[%s3914_s17 + $0x40] sm:$0xff] }
  0x36   : > { %v3941_v46 = vsel %vm3928_vm5, 0, %v478_v38  ;;  %v3945_v47 = vsel %vm3928_vm5, 0, %v485_v40  ;;  %v611_v53 = vsel %vm3928_vm5, %v489_v34, 0  ;;  %v855_v1 = vrot.slane %v610_v41, 1 }
  0x37   : > { %v636_v50 = vshrl.u32 %v3941_v46, 16  ;;  %v638_v51 = vshll.u32 %v3941_v46, 16  ;;  %v851_v52 = vrot.slane %v3941_v46, 1  ;;  %v645_v54 = vrot.slane %v643_v42, 1 }
  0x38   : > { %v648_v55 = vshrl.u32 %v3945_v47, 16  ;;  %v650_v56 = vshll.u32 %v3945_v47, 16  ;;  %v3957_v57 = vsel %vm3928_vm5, 0, %v492_v44  ;;  %v657_v63 = vrot.slane %v655_v48, 1 }
  0x39   : > { %v640_v58 = vrot.slane %v638_v51, 1  ;;  %v853_v59 = vsel %vm847_vm4, %v851_v52, %v852_v43  ;;  %v660_v60 = vshrl.u32 %v3957_v57, 16  ;;  %v662_v61 = vshll.u32 %v3957_v57, 16 }
  0x3a   : > { %892 = vrot.lane.b32.xlu1 %v853_v59, %s5684_s12  ;;  %v652_v62 = vrot.slane %v650_v56, 1  ;;  %v667_v0 = vshll.u32 %v611_v53, 16  ;;  %v857_v4 = vrot.slane %v3957_v57, 1  ;;  %v499_v5 = vor.u32 %v497_v31, %v496_v35 }
  0x3b   : > { %v641_v2 = vor.u32 %v640_v58, %v636_v50  ;;  %v664_v3 = vrot.slane %v662_v61, 1  ;;  %v612_v9 = vsel %vm3928_vm5, %v496_v35, 0  ;;  %v858_v12 = vrot.slane %v611_v53, 1 }
  0x3c   : > { %v653_v7 = vor.u32 %v652_v62, %v648_v55  ;;  %v669_v8 = vrot.slane %v667_v0, 1  ;;  %v3970_v13 = vsel %vm3928_vm5, 0, %v499_v5  ;;  %v854_v15 = vrot.slane %v3945_v47, 1 }
  0x3d   : > { %v646_v10 = vsel %vm622_vm3, %v641_v2, %v645_v54  ;;  %v665_v11 = vor.u32 %v664_v3, %v660_v60  ;;  %v674_v16 = vshll.u32 %v3970_v13, 16  ;;  %v679_v17 = vshll.u32 %v612_v9, 16 }
  0x3e   : > { %793 = vrot.lane.b32.xlu0 %v646_v10, %s3742_s18  ;;  %v658_v14 = vsel %vm622_vm3, %v653_v7, %v657_v63  ;;  %v672_v19 = vshrl.u32 %v3970_v13, 16  ;;  %v503_v20 = vrot.slane %v501_v36, 7  ;;  %v860_v21 = vrot.slane %v3970_v13, 1  ;;  %v460_v63 = vld [vmem:[%s3914_s17 + $0x48] sm:$0xff] }
  0x3f   : > { %v670_v18 = vsel %vm622_vm3, %v665_v11, %v669_v8  ;;  %v676_v22 = vrot.slane %v674_v16, 1  ;;  %v861_v23 = vrot.slane %v612_v9, 1  ;;  %v510_v24 = vrot.slane %v508_v45, 7  ;;  %v461_v8 = vld [vmem:[%s3914_s17 + $0x50] sm:$0xff] }
  0x40   : > { %797 = vrot.lane.b32.xlu1 %v670_v18, %s3742_s18  ;;  %v515_v25 = vshrl.u32 %v458_v6, 16  ;;  %v859_v26 = vsel %vm847_vm4, %v857_v4, %v858_v12  ;;  %v506_v27 = vor.u32 %v504_v37, %v503_v20  ;;  %v613_v28 = vsel %vm3928_vm5, %v503_v20, 0 }
  0x41   : > { %v518_v29 = vshll.u32 %v458_v6, 16  ;;  %v856_v30 = vsel %vm847_vm4, %v854_v15, %v855_v1  ;;  %v681_v31 = vrot.slane %v679_v17, 1  ;;  %v691_v32 = vshll.u32 %v613_v28, 16 }
  0x42   : > { %795 = vrot.lane.b32.xlu0 %v658_v14, %s3742_s18  ;;  %v513_v34 = vor.u32 %v511_v49, %v510_v24  ;;  %v677_v35 = vor.u32 %v676_v22, %v672_v19  ;;  %v3987_v36 = vsel %vm3928_vm5, 0, %v506_v27  ;;  %v3991_v38 = vsel %vm3928_vm5, %v510_v24, 0 }
  0x43   : > { %v517_v37 = vrot.slane %v515_v25, 7  ;;  %v684_v40 = vshrl.u32 %v3987_v36, 16  ;;  %v686_v41 = vshll.u32 %v3987_v36, 16  ;;  %v693_v42 = vrot.slane %v691_v32, 1 }
  0x44   : > { %896 = vrot.lane.b32.xlu1 %v859_v26, %s5684_s12  ;;  %v864_v43 = vrot.slane %v613_v28, 1  ;;  %v863_v44 = vrot.slane %v3987_v36, 1  ;;  %v4000_v45 = vsel %vm3928_vm5, 0, %v513_v34  ;;  %v703_v48 = vshll.u32 %v3991_v38, 16 }
  0x45   : > { %v520_v49 = vor.u32 %v518_v29, %v517_v37  ;;  %v688_v50 = vrot.slane %v686_v41, 1  ;;  %v696_v51 = vshrl.u32 %v4000_v45, 16  ;;  %v698_v52 = vshll.u32 %v4000_v45, 16 }
  0x46   : > { %894 = vrot.lane.b32.xlu0 %v856_v30, %s5684_s12  ;;  %v615_v53 = vsel %vm3928_vm5, %v517_v37, 0  ;;  %v682_v54 = vsel %vm622_vm3, %v677_v35, %v681_v31  ;;  %v522_v58 = vshrl.u32 %v459_v39, 16  ;;  %v862_v0 = vsel %vm847_vm4, %v860_v21, %v861_v23 }
  0x47   : > { %v4011_v55 = vsel %vm3928_vm5, 0, %v520_v49  ;;  %v715_v56 = vshll.u32 %v615_v53, 16  ;;  %v689_v59 = vor.u32 %v688_v50, %v684_v40  ;;  %v700_v60 = vrot.slane %v698_v52, 1 }
  0x48   : > { %v708_v61 = vshrl.u32 %v4011_v55, 16  ;;  %v710_v62 = vshll.u32 %v4011_v55, 16  ;;  %v865_v1 = vsel %vm847_vm4, %v863_v44, %v864_v43  ;;  %v705_v2 = vrot.slane %v703_v48, 1  ;;  %v462_v43 = vld [vmem:[%s3914_s17 + $0x58] sm:$0xff] }
  0x49   : > { %v717_v3 = vrot.slane %v715_v56, 1  ;;  %v694_v4 = vsel %vm622_vm3, %v689_v59, %v693_v42  ;;  %v701_v5 = vor.u32 %v700_v60, %v696_v51  ;;  %v866_v7 = vrot.slane %v4000_v45, 1  ;;  %v463_v56 = vld [vmem:[%s3914_s17 + $0x60] sm:$0xff] }
  0x4a   : > { %799 = vrot.lane.b32.xlu0 %v682_v54, %s3742_s18  ;;  %v712_v6 = vrot.slane %v710_v62, 1  ;;  %801 = vrot.lane.b32.xlu1 %v694_v4, %s3742_s18  ;;  %v867_v9 = vrot.slane %v3991_v38, 1  ;;  %v524_v10 = vrot.slane %v522_v58, 7  ;;  %v525_v11 = vshll.u32 %v459_v39, 16  ;;  %v464_v62 = vld [vmem:[%s3914_s17 + $0x68] sm:$0xff] }
  0x4b   : > { %v529_v12 = vshrl.u32 %v460_v63, 16  ;;  %v869_v15 = vrot.slane %v4011_v55, 1  ;;  %v870_v16 = vrot.slane %v615_v53, 1  ;;  %v532_v17 = vshll.u32 %v460_v63, 16 }
  0x4c   : > { %v713_v14 = vor.u32 %v712_v6, %v708_v61  ;;  %v527_v18 = vor.u32 %v525_v11, %v524_v10  ;;  %v616_v19 = vsel %vm3928_vm5, %v524_v10, 0  ;;  %v536_v21 = vshrl.u32 %v461_v8, 16 }
  0x4d   : > { %v531_v20 = vrot.slane %v529_v12, 7  ;;  %v706_v22 = vsel %vm622_vm3, %v701_v5, %v705_v2  ;;  %v727_v23 = vshll.u32 %v616_v19, 16  ;;  %v539_v24 = vshll.u32 %v461_v8, 16 }
  0x4e   : > { %898 = vrot.lane.b32.xlu0 %v862_v0, %s5684_s12  ;;  %900 = vrot.lane.b32.xlu1 %v865_v1, %s5684_s12  ;;  %v4032_v25 = vsel %vm3928_vm5, 0, %v527_v18  ;;  %v538_v28 = vrot.slane %v536_v21, 7  ;;  %v718_v29 = vsel %vm622_vm3, %v713_v14, %v717_v3  ;;  %v868_v34 = vsel %vm847_vm4, %v866_v7, %v867_v9 }
  0x4f   : > { %v534_v26 = vor.u32 %v532_v17, %v531_v20  ;;  %v617_v27 = vsel %vm3928_vm5, %v531_v20, 0  ;;  %v720_v30 = vshrl.u32 %v4032_v25, 16  ;;  %v722_v31 = vshll.u32 %v4032_v25, 16 }
  0x50   : > { %v739_v32 = vshll.u32 %v617_v27, 16  ;;  %v871_v35 = vsel %vm847_vm4, %v869_v15, %v870_v16  ;;  %v541_v37 = vor.u32 %v539_v24, %v538_v28  ;;  %v873_v42 = vrot.slane %v616_v19, 1 }
  0x51   : > { %v4043_v38 = vsel %vm3928_vm5, 0, %v534_v26  ;;  %v724_v39 = vrot.slane %v722_v31, 1  ;;  %v729_v44 = vrot.slane %v727_v23, 1  ;;  %v4056_v50 = vsel %vm3928_vm5, %v538_v28, 0 }
  0x52   : > { %803 = vrot.lane.b32.xlu0 %v706_v22, %s3742_s18  ;;  %v732_v40 = vshrl.u32 %v4043_v38, 16  ;;  %v734_v41 = vshll.u32 %v4043_v38, 16  ;;  %805 = vrot.lane.b32.xlu1 %v718_v29, %s3742_s18  ;;  %v741_v48 = vrot.slane %v739_v32, 1  ;;  %v4052_v49 = vsel %vm3928_vm5, 0, %v541_v37 }
  0x53   : > { %v725_v51 = vor.u32 %v724_v39, %v720_v30  ;;  %v744_v53 = vshrl.u32 %v4052_v49, 16  ;;  %v746_v54 = vshll.u32 %v4052_v49, 16  ;;  %v872_v58 = vrot.slane %v4032_v25, 1 }
  0x54   : > { %v736_v52 = vrot.slane %v734_v41, 1  ;;  %v751_v59 = vshll.u32 %v4056_v50, 16  ;;  %v543_v60 = vshrl.u32 %v462_v43, 16  ;;  %v546_v61 = vshll.u32 %v462_v43, 16 }
  0x55   : > { %v875_v0 = vrot.slane %v4043_v38, 1  ;;  %v876_v1 = vrot.slane %v617_v27, 1  ;;  %v748_v2 = vrot.slane %v746_v54, 1  ;;  %v730_v3 = vsel %vm622_vm3, %v725_v51, %v729_v44  ;;  %v451_v44 = vld [vmem:[%s3914_s17] sm:$0xff]  ;;  %s3743_s17 = smov 12  }
  0x56   : > { %902 = vrot.lane.b32.xlu0 %v868_v34, %s5684_s12  ;;  %v737_v63 = vor.u32 %v736_v52, %v732_v40  ;;  %904 = vrot.lane.b32.xlu1 %v871_v35, %s5684_s12  ;;  %v753_v4 = vrot.slane %v751_v59, 1  ;;  %v545_v5 = vrot.slane %v543_v60, 7  ;;  %v550_v6 = vshrl.u32 %v463_v56, 16 }
  0x57   : > { %v749_v8 = vor.u32 %v748_v2, %v744_v53  ;;  %v553_v9 = vshll.u32 %v463_v56, 16  ;;  %v557_v10 = vshrl.u32 %v464_v62, 16  ;;  %v874_v11 = vsel %vm847_vm4, %v872_v58, %v873_v42 }
  0x58   : > { %v742_v7 = vsel %vm622_vm3, %v737_v63, %v741_v48  ;;  %v548_v12 = vor.u32 %v546_v61, %v545_v5  ;;  %v619_v14 = vsel %vm3928_vm5, %v545_v5, 0  ;;  %v552_v15 = vrot.slane %v550_v6, 7 }
  0x59   : > { %v877_v16 = vsel %vm847_vm4, %v875_v0, %v876_v1  ;;  %v763_v17 = vshll.u32 %v619_v14, 16  ;;  %v878_v18 = vrot.slane %v4052_v49, 1  ;;  %v559_v19 = vrot.slane %v557_v10, 7 }
  0x5a   : > { %807 = vrot.lane.b32.xlu0 %v730_v3, %s3742_s18  ;;  %809 = vrot.lane.b32.xlu1 %v742_v7, %s3742_s18  ;;  %v4078_v20 = vsel %vm3928_vm5, 0, %v548_v12  ;;  %v879_v21 = vrot.slane %v4056_v50, 1  ;;  %v555_v22 = vor.u32 %v553_v9, %v552_v15  ;;  %v560_v23 = vshll.u32 %v464_v62, 16 }
  0x5b   : > { %v754_v24 = vsel %vm622_vm3, %v749_v8, %v753_v4  ;;  %v756_v26 = vshrl.u32 %v4078_v20, 16  ;;  %v758_v27 = vshll.u32 %v4078_v20, 16  ;;  %v620_v28 = vsel %vm3928_vm5, %v552_v15, 0 }
  0x5c   : > { %v882_v29 = vrot.slane %v619_v14, 1  ;;  %v4088_v30 = vsel %vm3928_vm5, 0, %v555_v22  ;;  %v562_v31 = vor.u32 %v560_v23, %v559_v19  ;;  %v621_v32 = vsel %vm3928_vm5, %v559_v19, 0 }
  0x5d   : > { %v760_v34 = vrot.slane %v758_v27, 1  ;;  %v765_v35 = vrot.slane %v763_v17, 1  ;;  %v881_v37 = vrot.slane %v4078_v20, 1  ;;  %v770_v39 = vshll.u32 %v4088_v30, 16  ;;  %v3632_v27 = vld [vmem:[%s5668_s1 + $0x8] sm:$0xff]  }
  0x5e   : > { %906 = vrot.lane.b32.xlu0 %v874_v11, %s5684_s12  ;;  %908 = vrot.lane.b32.xlu1 %v877_v16, %s5684_s12  ;;  %v768_v40 = vshrl.u32 %v4088_v30, 16  ;;  %v775_v41 = vshll.u32 %v620_v28, 16  ;;  %v4099_v42 = vsel %vm3928_vm5, 0, %v562_v31  ;;  %v787_v43 = vshll.u32 %v621_v32, 16 }
  0x5f   : > { %v761_v48 = vor.u32 %v760_v34, %v756_v26  ;;  %v772_v50 = vrot.slane %v770_v39, 1  ;;  %v780_v51 = vshrl.u32 %v4099_v42, 16  ;;  %v782_v52 = vshll.u32 %v4099_v42, 16  ;;  %v3631_v26 = vld [vmem:[%s5668_s1] sm:$0xff]  }
  0x60   : > { %v466_v56 = vshrl.u32 %v451_v44, 16  ;;  %v880_v58 = vsel %vm847_vm4, %v878_v18, %v879_v21  ;;  %v777_v60 = vrot.slane %v775_v41, 1  ;;  %v469_v61 = vshll.u32 %v451_v44, 16  ;;  %3438 = vmatprep.subr.bf16.mxu0 %v3631_v26  ;;  %3524 = vmatprep.subr.bf16.mxu1 %v3631_v26 }
  0x61   : > { %v766_v53 = vsel %vm622_vm3, %v761_v48, %v765_v35  ;;  %v784_v54 = vrot.slane %v782_v52, 1  ;;  %v773_v59 = vor.u32 %v772_v50, %v768_v40  ;;  %v883_v62 = vsel %vm847_vm4, %v881_v37, %v882_v29  ;;  %3439 = vmatpush3.bf16.msra.mxu0 %v3631_v26  ;;  %3527 = vmatpush3.bf16.msra.mxu1 %v3631_v26  ;;  %v3633_v29 = vld [vmem:[%s5668_s1 + $0x10] ss:$0 sps:$4 sm:$0x33]  }
  0x62   : > { %811 = vrot.lane.b32.xlu0 %v754_v24, %s3742_s18  ;;  %813 = vrot.lane.b32.xlu1 %v766_v53, %s3742_s18  ;;  %v789_v0 = vrot.slane %v787_v43, 1  ;;  %v468_v1 = vrot.slane %v466_v56, 7  ;;  %v884_v5 = vrot.slane %v4088_v30, 1  ;;  %v885_v6 = vrot.slane %v620_v28, 1 }
  0x63   : > { %v785_v63 = vor.u32 %v784_v54, %v780_v51  ;;  %v778_v4 = vsel %vm622_vm3, %v773_v59, %v777_v60  ;;  %v887_v9 = vrot.slane %v4099_v42, 1  ;;  %v888_v10 = vrot.slane %v621_v32, 1  ;;  %3440 = vmatprep.subr.bf16.mxu0 %v3632_v27  ;;  %3525 = vmatprep.subr.bf16.mxu1 %v3632_v27 }
  0x64   : > { %v471_v2 = vor.u32 %v469_v61, %v468_v1  ;;  %v608_v3 = vsel %vm3928_vm5, %v468_v1, 0  ;;  %v886_v15 = vsel %vm847_vm4, %v884_v5, %v885_v6  ;;  %v1141_v31 = vsel %vm1139_vm6, %v3633_v29, 0 }
  0x65   : > { %v631_v7 = vshll.u32 %v608_v3, 16  ;;  %v790_v8 = vsel %vm622_vm3, %v785_v63, %v789_v0  ;;  %v889_v18 = vsel %vm847_vm4, %v887_v9, %v888_v10  ;;  %v849_v21 = vrot.slane %v608_v3, 1  ;;  %3441 = vmatpush3.bf16.msra.mxu0 %v3632_v27  ;;  %3528 = vmatpush3.bf16.msra.mxu1 %v3632_v27 }
  0x66   : > { %910 = vrot.lane.b32.xlu0 %v880_v58, %s5684_s12  ;;  %912 = vrot.lane.b32.xlu1 %v883_v62, %s5684_s12  ;;  %v4119_v11 = vsel %vm3928_vm5, 0, %v471_v2 }
  0x67   : > { %v624_v12 = vshrl.u32 %v4119_v11, 16  ;;  %v626_v14 = vshll.u32 %v4119_v11, 16  ;;  %v633_v17 = vrot.slane %v631_v7, 1  ;;  %v848_v19 = vrot.slane %v4119_v11, 1  ;;  %3530 = vmatprep.subr.msk.bf16.mxu0 %vm1139_vm6, %v3633_v29  ;;  %3531 = vmatprep.subr.msk.bf16.mxu1 %vm1139_vm6, %v3633_v29 }
  0x69   : > { %v628_v16 = vrot.slane %v626_v14, 1  ;;  %v850_v24 = vsel %vm847_vm4, %v848_v19, %v849_v21  ;;  %3443 = vmatpush3.bf16.msra.mxu0 %v1141_v31  ;;  %3529 = vmatpush3.bf16.msra.mxu1 %v1141_v31 }
  0x6a   : > { %815 = vrot.lane.b32.xlu0 %v778_v4, %s3742_s18  ;;  %817 = vrot.lane.b32.xlu1 %v790_v8, %s3742_s18 }
  0x6b   : > { %v629_v22 = vor.u32 %v628_v16, %v624_v12 }
  0x6d   : > { %v634_v23 = vsel %vm622_vm3, %v629_v22, %v633_v17 }
  0x6e   : > { %914 = vrot.lane.b32.xlu0 %v886_v15, %s5684_s12  ;;  %916 = vrot.lane.b32.xlu1 %v889_v18, %s5684_s12 }
  0x72   : > { %791 = vrot.lane.b32.xlu0 %v634_v23, %s3742_s18  ;;  %890 = vrot.lane.b32.xlu1 %v850_v24, %s5684_s12  ;;  %s3744_s18 = smov 24  }
  0xac   : > { %v893_v28 = vpop.permute.xlu1 %892 }
  0xb0   : > { %v794_v32 = vpop.permute.xlu0 %793 }
  0xb1   : > { %v922_v34 = vsel %vm918_vm7, %v3941_v46, %v794_v32 }
  0xb2   : > { %v4146_v35 = vsel %vm5677_vm8, %v922_v34, %v893_v28  ;;  %v798_v37 = vpop.permute.xlu1 %797 }
  0xb3   : > { %988 = vrot.lane.b32.xlu0 %v4146_v35, %s3743_s17  ;;  %v926_v46 = vsel %vm918_vm7, %v3957_v57, %v798_v37 }
  0xb4   : > { %v796_v39 = vpop.permute.xlu0 %795 }
  0xb5   : > { %v924_v41 = vsel %vm918_vm7, %v3945_v47, %v796_v39 }
  0xb6   : > { %v897_v40 = vpop.permute.xlu1 %896 }
  0xb7   : > { %v4162_v51 = vsel %vm5677_vm8, %v926_v46, %v897_v40 }
  0xb8   : > { %v895_v43 = vpop.permute.xlu0 %894 }
  0xb9   : > { %v4153_v44 = vsel %vm5677_vm8, %v924_v41, %v895_v43 }
  0xba   : > { %990 = vrot.lane.b32.xlu1 %v4153_v44, %s3743_s17  ;;  %1013 = vrot.lane.b32.xlu0 %v4153_v44, %s3744_s18 }
  0xbc   : > { %v800_v48 = vpop.permute.xlu0 %799  ;;  %v802_v50 = vpop.permute.xlu1 %801 }
  0xbd   : > { %v928_v47 = vsel %vm918_vm7, %v3970_v13, %v800_v48  ;;  %v930_v54 = vsel %vm918_vm7, %v3987_v36, %v802_v50 }
  0xbe   : > { %1015 = vrot.lane.b32.xlu1 %v4162_v51, %s3744_s18  ;;  %992 = vrot.lane.b32.xlu0 %v4162_v51, %s3743_s17 }
  0xc0   : > { %v899_v57 = vpop.permute.xlu0 %898  ;;  %v901_v52 = vpop.permute.xlu1 %900 }
  0xc1   : > { %v4171_v53 = vsel %vm5677_vm8, %v928_v47, %v899_v57  ;;  %v4180_v58 = vsel %vm5677_vm8, %v930_v54, %v901_v52 }
  0xc2   : > { %994 = vrot.lane.b32.xlu1 %v4171_v53, %s3743_s17  ;;  %1017 = vrot.lane.b32.xlu0 %v4171_v53, %s3744_s18 }
  0xc4   : > { %v804_v56 = vpop.permute.xlu0 %803  ;;  %v806_v59 = vpop.permute.xlu1 %805 }
  0xc5   : > { %v932_v13 = vsel %vm918_vm7, %v4000_v45, %v804_v56  ;;  %v934_v36 = vsel %vm918_vm7, %v4011_v55, %v806_v59 }
  0xc6   : > { %1019 = vrot.lane.b32.xlu1 %v4180_v58, %s3744_s18  ;;  %996 = vrot.lane.b32.xlu0 %v4180_v58, %s3743_s17 }
  0xc8   : > { %v903_v60 = vpop.permute.xlu0 %902  ;;  %v905_v62 = vpop.permute.xlu1 %904 }
  0xc9   : > { %v4191_v61 = vsel %vm5677_vm8, %v932_v13, %v903_v60  ;;  %v4198_v45 = vsel %vm5677_vm8, %v934_v36, %v905_v62 }
  0xca   : > { %998 = vrot.lane.b32.xlu1 %v4191_v61, %s3743_s17  ;;  %1021 = vrot.lane.b32.xlu0 %v4191_v61, %s3744_s18 }
  0xcc   : > { %v808_v63 = vpop.permute.xlu0 %807  ;;  %v810_v0 = vpop.permute.xlu1 %809 }
  0xcd   : > { %v936_v1 = vsel %vm918_vm7, %v4032_v25, %v808_v63  ;;  %v938_v55 = vsel %vm918_vm7, %v4043_v38, %v810_v0 }
  0xce   : > { %1023 = vrot.lane.b32.xlu1 %v4198_v45, %s3744_s18  ;;  %1000 = vrot.lane.b32.xlu0 %v4198_v45, %s3743_s17 }
  0xd0   : > { %v907_v2 = vpop.permute.xlu0 %906  ;;  %v909_v4 = vpop.permute.xlu1 %908 }
  0xd1   : > { %v4209_v3 = vsel %vm5677_vm8, %v936_v1, %v907_v2  ;;  %v4216_v25 = vsel %vm5677_vm8, %v938_v55, %v909_v4 }
  0xd2   : > { %1002 = vrot.lane.b32.xlu1 %v4209_v3, %s3743_s17  ;;  %1025 = vrot.lane.b32.xlu0 %v4209_v3, %s3744_s18 }
  0xd4   : > { %v812_v5 = vpop.permute.xlu0 %811  ;;  %v814_v6 = vpop.permute.xlu1 %813 }
  0xd5   : > { %v940_v7 = vsel %vm918_vm7, %v4052_v49, %v812_v5  ;;  %v942_v38 = vsel %vm918_vm7, %v4078_v20, %v814_v6 }
  0xd6   : > { %1027 = vrot.lane.b32.xlu1 %v4216_v25, %s3744_s18  ;;  %1004 = vrot.lane.b32.xlu0 %v4216_v25, %s3743_s17 }
  0xd8   : > { %v911_v8 = vpop.permute.xlu0 %910  ;;  %v913_v10 = vpop.permute.xlu1 %912 }
  0xd9   : > { %v4227_v9 = vsel %vm5677_vm8, %v940_v7, %v911_v8  ;;  %v4234_v49 = vsel %vm5677_vm8, %v942_v38, %v913_v10  ;;  %v4302_v10 = vstv %s3353_s22 }
  0xda   : > { %1006 = vrot.lane.b32.xlu1 %v4227_v9, %s3743_s17  ;;  %1029 = vrot.lane.b32.xlu0 %v4227_v9, %s3744_s18  ;;  %vm1373_vm14 = vcmp.ge.s32.totalorder %v4302_v10, 0  ;;  %vm1385_vm15 = vcmp.lt.s32.totalorder %v4302_v10, 16 }
  0xdc   : > { %v816_v12 = vpop.permute.xlu0 %815  ;;  %v818_v14 = vpop.permute.xlu1 %817 }
  0xdd   : > { %v944_v15 = vsel %vm918_vm7, %v4088_v30, %v816_v12  ;;  %v946_v20 = vsel %vm918_vm7, %v4099_v42, %v818_v14  ;;  %v4308_v12 = vld [vmem:[%s5669_s2] ss:$0 sm:$0xff] }
  0xde   : > { %1031 = vrot.lane.b32.xlu1 %v4234_v49, %s3744_s18  ;;  %1008 = vrot.lane.b32.xlu0 %v4234_v49, %s3743_s17 }
  0xe0   : > { %v915_v16 = vpop.permute.xlu0 %914  ;;  %v917_v18 = vpop.permute.xlu1 %916 }
  0xe1   : > { %v973_v17 = vsel %vm5677_vm8, %v944_v15, %v915_v16  ;;  %v975_v19 = vsel %vm5677_vm8, %v946_v20, %v917_v18 }
  0xe2   : > { %1010 = vrot.lane.b32.xlu1 %v973_v17, %s3743_s17  ;;  %1033 = vrot.lane.b32.xlu0 %v973_v17, %s3744_s18 }
  0xe4   : > { %v792_v30 = vpop.permute.xlu0 %791  ;;  %v891_v22 = vpop.permute.xlu1 %890 }
  0xe5   : > { %v920_v21 = vsel %vm918_vm7, %v4119_v11, %v792_v30  ;;  %v1364_v30 = vadd.s32 3, %v4302_v10  ;;  %vm4328_vm7 = vmand %vm1373_vm14, %vm1385_vm15 }
  0xe6   : > { %1035 = vrot.lane.b32.xlu1 %v975_v19, %s3744_s18  ;;  %v949_v42 = vsel %vm5677_vm8, %v920_v21, %v891_v22 }
 0x125   : > { %v989_v23 = vpop.permute.xlu0 %988 }
 0x126   : > { %v1039_v24 = vsel %vm1037_vm9, %v949_v42, %v989_v23  ;;  %v1363_v23 = vadd.s32 2, %v4302_v10 }
 0x12c   : > { %v991_v26 = vpop.permute.xlu1 %990  ;;  %v1014_v27 = vpop.permute.xlu0 %1013 }
 0x12d   : > { %v1064_v28 = vsel %vm5676_vm10, %v1039_v24, %v1014_v27  ;;  %v1041_v29 = vsel %vm1037_vm9, %v4146_v35, %v991_v26 }
 0x12e   : > { %3444 = vmatprep.mubr.msk.bf16.mxu0 %vm1114_vm11, %v1064_v28 }
 0x130   : > { %v1016_v31 = vpop.permute.xlu1 %1015  ;;  %v993_v11 = vpop.permute.xlu0 %992 }
 0x131   : > { %v1066_v32 = vsel %vm5676_vm10, %v1041_v29, %v1016_v31  ;;  %v1043_v34 = vsel %vm1037_vm9, %v4153_v44, %v993_v11  ;;  %v4333_v11 = vadd.s32 5, %v4302_v10 }
 0x132   : > { %3445 = vmatmul.mubr.msk.bf16.vlgmr.msra.gmra.mrb[0].mxu0 %vm1114_vm11, %v1066_v32 }
 0x133   : > { %vm1378_vm15 = vcmp.ge.s32.totalorder %v4333_v11, 0 }
 0x134   : > { %v995_v37 = vpop.permute.xlu1 %994  ;;  %v1018_v39 = vpop.permute.xlu0 %1017 }
 0x135   : > { %v1068_v40 = vsel %vm5676_vm10, %v1043_v34, %v1018_v39  ;;  %v1045_v41 = vsel %vm1037_vm9, %v4162_v51, %v995_v37 }
 0x136   : > { %3448 = vmatprep.mubr.msk.bf16.mxu0 %vm1114_vm11, %v1068_v40 }
 0x138   : > { %v1020_v43 = vpop.permute.xlu1 %1019  ;;  %v997_v35 = vpop.permute.xlu0 %996 }
 0x139   : > { %v1070_v46 = vsel %vm5676_vm10, %v1045_v41, %v1020_v43  ;;  %v1047_v48 = vsel %vm1037_vm9, %v4171_v53, %v997_v35 }
 0x13a   : > { %3449 = vmatmul.mubr.msk.bf16.gmra.mrb[4].mxu0 %vm1114_vm11, %v1070_v46 }
 0x13c   : > { %v999_v50 = vpop.permute.xlu1 %998  ;;  %v1022_v44 = vpop.permute.xlu0 %1021 }
 0x13d   : > { %v1072_v47 = vsel %vm5676_vm10, %v1047_v48, %v1022_v44  ;;  %v1049_v57 = vsel %vm1037_vm9, %v4180_v58, %v999_v50 }
 0x13e   : > { %3452 = vmatprep.mubr.msk.bf16.mxu0 %vm1114_vm11, %v1072_v47  ;;  %v1365_v47 = vadd.s32 4, %v4302_v10 }
 0x140   : > { %v1024_v52 = vpop.permute.xlu1 %1023  ;;  %v1001_v51 = vpop.permute.xlu0 %1000 }
 0x141   : > { %v1074_v54 = vsel %vm5676_vm10, %v1049_v57, %v1024_v52  ;;  %v1051_v56 = vsel %vm1037_vm9, %v4191_v61, %v1001_v51 }
 0x142   : > { %3453 = vmatmul.mubr.msk.bf16.gmra.mrb[8].mxu0 %vm1114_vm11, %v1074_v54 }
 0x144   : > { %v1003_v59 = vpop.permute.xlu1 %1002  ;;  %v1026_v53 = vpop.permute.xlu0 %1025 }
 0x145   : > { %v1076_v13 = vsel %vm5676_vm10, %v1051_v56, %v1026_v53  ;;  %v1053_v36 = vsel %vm1037_vm9, %v4198_v45, %v1003_v59  ;;  %v4365_v53 = vadd.s32 7, %v4302_v10 }
 0x146   : > { %3456 = vmatprep.mubr.msk.bf16.mxu1 %vm1114_vm11, %v1076_v13 }
 0x148   : > { %v1028_v60 = vpop.permute.xlu1 %1027  ;;  %v1005_v58 = vpop.permute.xlu0 %1004 }
 0x149   : > { %v1078_v62 = vsel %vm5676_vm10, %v1053_v36, %v1028_v60  ;;  %v1055_v63 = vsel %vm1037_vm9, %v4209_v3, %v1005_v58 }
 0x14a   : > { %3457 = vmatmul.mubr.msk.bf16.vlgmr.msra.gmra.mrb[0].mxu1 %vm1114_vm11, %v1078_v62 }
 0x14c   : > { %v1007_v0 = vpop.permute.xlu1 %1006  ;;  %v1030_v61 = vpop.permute.xlu0 %1029 }
 0x14d   : > { %v1080_v1 = vsel %vm5676_vm10, %v1055_v63, %v1030_v61  ;;  %v1057_v45 = vsel %vm1037_vm9, %v4216_v25, %v1007_v0 }
 0x14e   : > { %3460 = vmatprep.mubr.msk.bf16.mxu1 %vm1114_vm11, %v1080_v1 }
 0x150   : > { %v1032_v55 = vpop.permute.xlu1 %1031  ;;  %v1009_v2 = vpop.permute.xlu0 %1008 }
 0x151   : > { %v1082_v4 = vsel %vm5676_vm10, %v1057_v45, %v1032_v55  ;;  %v1059_v3 = vsel %vm1037_vm9, %v4227_v9, %v1009_v2  ;;  %v1362_v9 = vadd.s32 1, %v4302_v10  ;;  %v4388_v45 = vadd.s32 6, %v4302_v10 }
 0x152   : > { %3461 = vmatmul.mubr.msk.bf16.gmra.mrb[4].mxu1 %vm1114_vm11, %v1082_v4 }
 0x153   : > { %vm1374_vm12 = vcmp.ge.s32.totalorder %v1362_v9, 0  ;;  %vm1386_vm13 = vcmp.lt.s32.totalorder %v1362_v9, 16 }
 0x154   : > { %v1011_v5 = vpop.permute.xlu1 %1010  ;;  %v1034_v6 = vpop.permute.xlu0 %1033  ;;  %vm4320_vm2 = vmand %vm1374_vm12, %vm1386_vm13  ;;  %vm1375_vm12 = vcmp.ge.s32.totalorder %v1363_v23, 0  ;;  %vm1387_vm13 = vcmp.lt.s32.totalorder %v1363_v23, 16 }
 0x155   : > { %v1084_v7 = vsel %vm5676_vm10, %v1059_v3, %v1034_v6  ;;  %v1061_v38 = vsel %vm1037_vm9, %v4234_v49, %v1011_v5 }
 0x156   : > { %3464 = vmatprep.mubr.msk.bf16.mxu1 %vm1114_vm11, %v1084_v7 }
 0x158   : > { %v1036_v8 = vpop.permute.xlu1 %1035 }
 0x159   : > { %v1086_v25 = vsel %vm5676_vm10, %v1061_v38, %v1036_v8 }
 0x15a   : > { %3465 = vmatmul.mubr.msk.bf16.gmra.mrb[8].mxu1 %vm1114_vm11, %v1086_v25  ;;  %vm1376_vm11 = vcmp.ge.s32.totalorder %v1364_v30, 0 }
 0x205   : > { %v3446_v14 = vpop.f32.mrb[0].mxu0 }
 0x206   : > { %v1186_v49 = vadd.f32 %v3446_v14, %v4308_v12  ;;  %v1177_v15 = vpop.f32.mrb[1].mxu0 }
 0x207   : > { %v1178_v20 = vadd.f32 %v4308_v12, %v1177_v15  ;;  %v3447_v16 = vpop.f32.mrb[2].mxu0  ;;  %v4408_v15 = vadd.s32 8, %v4302_v10 }
 0x208   : > { %vm1290_vm0 = vcmp.ge.f32.partialorder %v1186_v49, 0.0  ;;  %v1314_v17 = vmul.f32 0.1, %v1186_v49  ;;  %v1189_v18 = vadd.f32 %v3447_v16, %v4308_v12  ;;  %v1180_v19 = vpop.f32.mrb[3].mxu0 }
 0x209   : > { %vm1288_vm1 = vcmp.ge.f32.partialorder %v1178_v20, 0.0  ;;  %v1312_v21 = vmul.f32 0.1, %v1178_v20  ;;  %v1181_v22 = vadd.f32 %v4308_v12, %v1180_v19 }
 0x20a   : > { %v1338_v42 = vsel %vm1290_vm0, %v1186_v49, %v1314_v17  ;;  %vm1291_vm6 = vcmp.ge.f32.partialorder %v1189_v18, 0.0  ;;  %v1315_v26 = vmul.f32 0.1, %v1189_v18  ;;  %vm1388_vm0 = vcmp.lt.s32.totalorder %v1364_v30, 16 }
 0x20b   : > { %v1336_v27 = vsel %vm1288_vm1, %v1178_v20, %v1312_v21  ;;  %vm1289_vm9 = vcmp.ge.f32.partialorder %v1181_v22, 0.0  ;;  %v1313_v29 = vmul.f32 0.1, %v1181_v22  ;;  %v1435_v32 = vsel %vm4320_vm2, %v1338_v42, 0.0 }
 0x20c   : > { %v1339_v31 = vsel %vm1291_vm6, %v1189_v18, %v1315_v26  ;;  %v1433_v40 = vsel %vm4328_vm7, %v1336_v27, 0.0  ;;  %vm1390_vm1 = vcmp.lt.s32.totalorder %v4333_v11, 16  ;;  %v4411_v20 = vadd.s32 9, %v4302_v10 }
 0x20d   : > { %v1436_v34 = vsel %vm4320_vm2, %v1339_v31, 0.0  ;;  %v1337_v37 = vsel %vm1289_vm9, %v1181_v22, %v1313_v29  ;;  %v3450_v39 = vpop.f32.mrb[4].mxu0  ;;  %v1371_v31 = vadd.s32 10, %v4302_v10 }
 0x20e   : > { %v1434_v41 = vsel %vm4328_vm7, %v1337_v37, 0.0  ;;  %v4344_v43 = vadd.f32 %v3450_v39, %v4308_v12  ;;  %v1193_v35 = vpop.f32.mrb[5].mxu0  ;;  %v1458_v46 = vpack.c.bf16 %v1436_v34, %v1435_v32  ;;  %vm4372_vm7 = vmand %vm1376_vm11, %vm1388_vm0  ;;  %vm1377_vm11 = vcmp.ge.s32.totalorder %v1365_v47, 0 }
 0x20f   : > { %v4346_v48 = vpack.c.bf16 %v1434_v41, %v1433_v40  ;;  %v4349_v50 = vadd.f32 %v4308_v12, %v1193_v35  ;;  %v3451_v44 = vpop.f32.mrb[6].mxu0  ;;  %vm1389_vm0 = vcmp.lt.s32.totalorder %v1365_v47, 16 }
 0x210   : > { %vm1294_vm14 = vcmp.ge.f32.partialorder %v4344_v43, 0.0  ;;  %v1318_v57 = vmul.f32 0.1, %v4344_v43  ;;  %v4355_v52 = vadd.f32 %v3451_v44, %v4308_v12  ;;  %v1196_v51 = vpop.f32.mrb[7].mxu0  ;;  %v1477_v54 = vshrl.u32 %v1458_v46, 16 }
 0x211   : > { %vm1292_vm2 = vcmp.ge.f32.partialorder %v4349_v50, 0.0  ;;  %v1316_v56 = vmul.f32 0.1, %v4349_v50  ;;  %v4362_v59 = vadd.f32 %v4308_v12, %v1196_v51  ;;  %v1480_v63 = vshll.u32 %v1458_v46, 16 }
 0x212   : > { %v1342_v13 = vsel %vm1294_vm14, %v4344_v43, %v1318_v57  ;;  %vm1295_vm6 = vcmp.ge.f32.partialorder %v4355_v52, 0.0  ;;  %v1319_v36 = vmul.f32 0.1, %v4355_v52  ;;  %v1479_v60 = vrot.slane %v1477_v54, 7  ;;  %vm4381_vm14 = vmand %vm1375_vm12, %vm1387_vm13 }
 0x213   : > { %vm1293_vm9 = vcmp.ge.f32.partialorder %v4362_v59, 0.0  ;;  %v1317_v62 = vmul.f32 0.1, %v4362_v59  ;;  %v1340_v0 = vsel %vm1292_vm2, %v4349_v50, %v1316_v56  ;;  %v1439_v3 = vsel %vm4372_vm7, %v1342_v13, 0.0 }
 0x214   : > { %v1343_v1 = vsel %vm1295_vm6, %v4355_v52, %v1319_v36  ;;  %1559 = vrot.lane.b32.xlu0 %v1479_v60, %s3745_s10  ;;  %v1482_v2 = vor.u32 %v1480_v63, %v1479_v60  ;;  %v1437_v38 = vsel %vm4381_vm14, %v1340_v0, 0.0  ;;  %vm1380_vm12 = vcmp.ge.s32.totalorder %v4365_v53, 0 }
 0x215   : > { %v3454_v55 = vpop.f32.mrb[8].mxu0  ;;  %v1341_v4 = vsel %vm1293_vm9, %v4362_v59, %v1317_v62  ;;  %v1440_v5 = vsel %vm4372_vm7, %v1343_v1, 0.0  ;;  %vm1392_vm13 = vcmp.lt.s32.totalorder %v4365_v53, 16  ;;  %vm4431_vm9 = vmand %vm1377_vm11, %vm1389_vm0  ;;  %vm1379_vm11 = vcmp.ge.s32.totalorder %v4388_v45, 0 }
 0x216   : > { %v4396_v6 = vadd.f32 %v3454_v55, %v4308_v12  ;;  %v1209_v7 = vpop.f32.mrb[9].mxu0  ;;  %v1438_v8 = vsel %vm4381_vm14, %v1341_v4, 0.0  ;;  %v1460_v25 = vpack.c.bf16 %v1440_v5, %v1439_v3  ;;  %vm1391_vm0 = vcmp.lt.s32.totalorder %v4388_v45, 16  ;;  %vm4499_vm8 = vmand %vm1380_vm12, %vm1392_vm13 }
 0x217   : > { %v4403_v9 = vadd.f32 %v4308_v12, %v1209_v7  ;;  %v3455_v14 = vpop.f32.mrb[10].mxu0  ;;  %v1459_v49 = vpack.c.bf16 %v1438_v8, %v1437_v38  ;;  %v4469_v36 = vadd.s32 11, %v4302_v10 }
 0x218   : > { %vm1298_vm2 = vcmp.ge.f32.partialorder %v4396_v6, 0.0  ;;  %v1322_v16 = vmul.f32 0.1, %v4396_v6  ;;  %v4416_v17 = vadd.f32 %v3455_v14, %v4308_v12  ;;  %v1212_v18 = vpop.f32.mrb[11].mxu0  ;;  %1557 = vrot.lane.b32.xlu0 %v1482_v2, %s3745_s10  ;;  %v1491_v19 = vshrl.u32 %v1460_v25, 16 }
 0x219   : > { %vm1296_vm6 = vcmp.ge.f32.partialorder %v4403_v9, 0.0  ;;  %v1320_v30 = vmul.f32 0.1, %v4403_v9  ;;  %v4422_v21 = vadd.f32 %v4308_v12, %v1212_v18  ;;  %v1484_v22 = vshrl.u32 %v1459_v49, 16 }
 0x21a   : > { %v1346_v23 = vsel %vm1298_vm2, %v4396_v6, %v1322_v16  ;;  %vm1299_vm7 = vcmp.ge.f32.partialorder %v4416_v17, 0.0  ;;  %v1323_v42 = vmul.f32 0.1, %v4416_v17  ;;  %v4427_v24 = vrot.slane %v1491_v19, 7  ;;  %vm4442_vm2 = vmand %vm1378_vm15, %vm1390_vm1 }
 0x21b   : > { %v1344_v27 = vsel %vm1296_vm6, %v4403_v9, %v1320_v30  ;;  %vm1297_vm14 = vcmp.ge.f32.partialorder %v4422_v21, 0.0  ;;  %v1321_v28 = vmul.f32 0.1, %v4422_v21  ;;  %v1486_v29 = vrot.slane %v1484_v22, 7 }
 0x21c   : > { %v1347_v32 = vsel %vm1299_vm7, %v4416_v17, %v1323_v42  ;;  %v1494_v34 = vshll.u32 %v1460_v25, 16  ;;  %v1487_v40 = vshll.u32 %v1459_v49, 16  ;;  %v1441_v11 = vsel %vm4431_vm9, %v1344_v27, 0.0 }
 0x21d   : > { %v1345_v37 = vsel %vm1297_vm14, %v4422_v21, %v1321_v28  ;;  %v3458_v39 = vpop.f32.mrb[0].mxu1  ;;  %1563 = vrot.lane.b32.xlu0 %v1486_v29, %s3745_s10  ;;  %v1444_v41 = vsel %vm4442_vm2, %v1347_v32, 0.0  ;;  %v1443_v57 = vsel %vm4442_vm2, %v1346_v23, 0.0  ;;  %vm1381_vm15 = vcmp.ge.s32.totalorder %v4408_v15, 0  ;;  %vm4488_vm2 = vmand %vm1379_vm11, %vm1391_vm0 }
 0x21e   : > { %v4456_v35 = vadd.f32 %v3458_v39, %v4308_v12  ;;  %v1225_v46 = vpop.f32.mrb[1].mxu1  ;;  %v1496_v44 = vor.u32 %v1494_v34, %v4427_v24  ;;  %v1442_v47 = vsel %vm4431_vm9, %v1345_v37, 0.0  ;;  %vm1393_vm1 = vcmp.lt.s32.totalorder %v4408_v15, 16 }
 0x21f   : > { %v4466_v51 = vadd.f32 %v4308_v12, %v1225_v46  ;;  %v3459_v54 = vpop.f32.mrb[2].mxu1  ;;  %v1461_v56 = vpack.c.bf16 %v1442_v47, %v1441_v11  ;;  %v1462_v13 = vpack.c.bf16 %v1444_v41, %v1443_v57  ;;  %vm1382_vm6 = vcmp.ge.s32.totalorder %v4411_v20, 0  ;;  %vm4544_vm13 = vmand %vm1381_vm15, %vm1393_vm1 }
 0x220   : > { %vm1394_vm7 = vcmp.lt.s32.totalorder %v4411_v20, 16  ;;  %vm1302_vm9 = vcmp.ge.f32.partialorder %v4456_v35, 0.0  ;;  %v1326_v60 = vmul.f32 0.1, %v4456_v35  ;;  %1565 = vrot.lane.b32.xlu1 %v1496_v44, %s3745_s10  ;;  %v4477_v58 = vadd.f32 %v3459_v54, %v4308_v12  ;;  %v1228_v62 = vpop.f32.mrb[3].mxu1 }
 0x221   : > { %v1489_v63 = vor.u32 %v1487_v40, %v1486_v29  ;;  %vm1300_vm14 = vcmp.ge.f32.partialorder %v4466_v51, 0.0  ;;  %v1324_v0 = vmul.f32 0.1, %v4466_v51  ;;  %v4482_v61 = vadd.f32 %v4308_v12, %v1228_v62 }
 0x222   : > { %v1498_v1 = vshrl.u32 %v1461_v56, 16  ;;  %v1350_v2 = vsel %vm1302_vm9, %v4456_v35, %v1326_v60  ;;  %vm1303_vm10 = vcmp.ge.f32.partialorder %v4477_v58, 0.0  ;;  %v1327_v4 = vmul.f32 0.1, %v4477_v58  ;;  %vm4555_vm9 = vmand %vm1382_vm6, %vm1394_vm7 }
 0x223   : > { %v1501_v3 = vshll.u32 %v1461_v56, 16  ;;  %v1348_v45 = vsel %vm1300_vm14, %v4466_v51, %v1324_v0  ;;  %vm1301_vm11 = vcmp.ge.f32.partialorder %v4482_v61, 0.0  ;;  %v1325_v7 = vmul.f32 0.1, %v4482_v61 }
 0x224   : > { %v1500_v38 = vrot.slane %v1498_v1, 7  ;;  %v1351_v8 = vsel %vm1303_vm10, %v4477_v58, %v1327_v4  ;;  %1561 = vrot.lane.b32.xlu1 %v1489_v63, %s3745_s10  ;;  %v1505_v25 = vshrl.u32 %v1462_v13, 16  ;;  %v1508_v14 = vshll.u32 %v1462_v13, 16 }
 0x225   : > { %v1445_v53 = vsel %vm4488_vm2, %v1348_v45, 0.0  ;;  %v1349_v49 = vsel %vm1301_vm11, %v4482_v61, %v1325_v7  ;;  %v3462_v16 = vpop.f32.mrb[4].mxu1  ;;  %v1447_v19 = vsel %vm4499_vm8, %v1350_v2, 0.0  ;;  %v1448_v30 = vsel %vm4499_vm8, %v1351_v8, 0.0 }
 0x226   : > { %v1503_v18 = vor.u32 %v1501_v3, %v1500_v38  ;;  %v4516_v22 = vadd.f32 %v3462_v16, %v4308_v12  ;;  %v1241_v23 = vpop.f32.mrb[5].mxu1  ;;  %v1507_v42 = vrot.slane %v1505_v25, 7  ;;  %v1446_v26 = vsel %vm4488_vm2, %v1349_v49, 0.0 }
 0x227   : > { %v4520_v27 = vpack.c.bf16 %v1448_v30, %v1447_v19  ;;  %v4523_v28 = vadd.f32 %v4308_v12, %v1241_v23  ;;  %v3463_v29 = vpop.f32.mrb[6].mxu1  ;;  %vm1384_vm10 = vcmp.ge.s32.totalorder %v4469_v36, 0  ;;  %v1463_v32 = vpack.c.bf16 %v1446_v26, %v1445_v53 }
 0x228   : > { %1569 = vrot.lane.b32.xlu0 %v1503_v18, %s3745_s10  ;;  %vm1306_vm8 = vcmp.ge.f32.partialorder %v4516_v22, 0.0  ;;  %v1330_v34 = vmul.f32 0.1, %v4516_v22  ;;  %1567 = vrot.lane.b32.xlu1 %v4427_v24, %s3745_s10  ;;  %v4533_v37 = vadd.f32 %v3463_v29, %v4308_v12  ;;  %v1244_v39 = vpop.f32.mrb[7].mxu1  ;;  %v1510_v40 = vor.u32 %v1508_v14, %v1507_v42 }
 0x229   : > { %vm1304_vm12 = vcmp.ge.f32.partialorder %v4523_v28, 0.0  ;;  %v1328_v11 = vmul.f32 0.1, %v4523_v28  ;;  %v4538_v41 = vadd.f32 %v4308_v12, %v1244_v39  ;;  %v1512_v10 = vshrl.u32 %v1463_v32, 16 }
 0x22a   : > { %5708 = vst [vmem:[#allocation7_spill] sm:$0xff] %v4533_v37  ;;  %v1354_v24 = vsel %vm1306_vm8, %v4516_v22, %v1330_v34  ;;  %vm1307_vm0 = vcmp.ge.f32.partialorder %v4533_v37, 0.0  ;;  %v1331_v44 = vmul.f32 0.1, %v4533_v37  ;;  %v1515_v47 = vshll.u32 %v1463_v32, 16 }
 0x22b   : > { %v1352_v15 = vsel %vm1304_vm12, %v4523_v28, %v1328_v11  ;;  %vm1305_vm15 = vcmp.ge.f32.partialorder %v4538_v41, 0.0  ;;  %v1329_v54 = vmul.f32 0.1, %v4538_v41  ;;  %v1514_v56 = vrot.slane %v1512_v10, 7 }
 0x22c   : > { %1571 = vrot.lane.b32.xlu0 %v1500_v38, %s3745_s10  ;;  %v1355_v13 = vsel %vm1307_vm0, %v4533_v37, %v1331_v44  ;;  %1573 = vrot.lane.b32.xlu1 %v1510_v40, %s3745_s10  ;;  %vm1396_vm1 = vcmp.lt.s32.totalorder %v4469_v36, 16  ;;  %v1519_v20 = vshrl.u32 %v4520_v27, 16  ;;  %v1449_v60 = vsel %vm4544_vm13, %v1352_v15, 0.0 }
 0x22d   : > { %v1353_v62 = vsel %vm1305_vm15, %v4538_v41, %v1329_v54  ;;  %v3466_v63 = vpop.f32.mrb[8].mxu1  ;;  %v1517_v0 = vor.u32 %v1515_v47, %v1514_v56  ;;  %v1451_v1 = vsel %vm4555_vm9, %v1354_v24, 0.0  ;;  %v1452_v55 = vsel %vm4555_vm9, %v1355_v13, 0.0  ;;  %vm4586_vm2 = vmand %vm1384_vm10, %vm1396_vm1 }
 0x22e   : > { %v1266_v2 = vadd.f32 %v3466_v63, %v4308_v12  ;;  %v1257_v4 = vpop.f32.mrb[9].mxu1  ;;  %v1521_v3 = vrot.slane %v1519_v20, 7  ;;  %v1450_v5 = vsel %vm4544_vm13, %v1353_v62, 0.0  ;;  %v1466_v45 = vpack.c.bf16 %v1452_v55, %v1451_v1 }
 0x22f   : > { %v1258_v7 = vadd.f32 %v4308_v12, %v1257_v4  ;;  %vm1383_vm6 = vcmp.ge.s32.totalorder %v1371_v31, 0  ;;  %vm1395_vm7 = vcmp.lt.s32.totalorder %v1371_v31, 16  ;;  %v3467_v38 = vpop.f32.mrb[10].mxu1  ;;  %v1465_v8 = vpack.c.bf16 %v1450_v5, %v1449_v60 }
 0x230   : > { %1577 = vrot.lane.b32.xlu0 %v1517_v0, %s3745_s10  ;;  %vm1310_vm14 = vcmp.ge.f32.partialorder %v1266_v2, 0.0  ;;  %v1334_v25 = vmul.f32 0.1, %v1266_v2  ;;  %1575 = vrot.lane.b32.xlu1 %v1507_v42, %s3745_s10  ;;  %v1269_v14 = vadd.f32 %v3467_v38, %v4308_v12  ;;  %v1260_v53 = vpop.f32.mrb[11].mxu1  ;;  %v1522_v49 = vshll.u32 %v4520_v27, 16  ;;  %vm4593_vm8 = vmand %vm1383_vm6, %vm1395_vm7 }
 0x231   : > { %vm1308_vm11 = vcmp.ge.f32.partialorder %v1258_v7, 0.0  ;;  %v1332_v18 = vmul.f32 0.1, %v1258_v7  ;;  %v1261_v19 = vadd.f32 %v4308_v12, %v1260_v53  ;;  %v1526_v30 = vshrl.u32 %v1465_v8, 16 }
 0x232   : > { %v1358_v23 = vsel %vm1310_vm14, %v1266_v2, %v1334_v25  ;;  %vm1311_vm12 = vcmp.ge.f32.partialorder %v1269_v14, 0.0  ;;  %v1335_v26 = vmul.f32 0.1, %v1269_v14  ;;  %v1524_v27 = vor.u32 %v1522_v49, %v1521_v3 }
 0x233   : > { %v1356_v36 = vsel %vm1308_vm11, %v1258_v7, %v1332_v18  ;;  %vm1309_vm10 = vcmp.ge.f32.partialorder %v1261_v19, 0.0  ;;  %v1333_v29 = vmul.f32 0.1, %v1261_v19  ;;  %v1528_v12 = vrot.slane %v1526_v30, 7 }
 0x234   : > { %1579 = vrot.lane.b32.xlu0 %v1514_v56, %s3745_s10  ;;  %v1359_v32 = vsel %vm1311_vm12, %v1269_v14, %v1335_v26  ;;  %1581 = vrot.lane.b32.xlu1 %v1524_v27, %s3745_s10  ;;  %v1529_v34 = vshll.u32 %v1465_v8, 16  ;;  %v1533_v39 = vshrl.u32 %v1466_v45, 16  ;;  %v1455_v31 = vsel %vm4586_vm2, %v1358_v23, 0.0 }
 0x235   : > { %v1453_v40 = vsel %vm4593_vm8, %v1356_v36, 0.0  ;;  %v1456_v11 = vsel %vm4586_vm2, %v1359_v32, 0.0  ;;  %v1357_v10 = vsel %vm1309_vm10, %v1261_v19, %v1333_v29  ;;  %v1536_v15 = vshll.u32 %v1466_v45, 16 }
 0x236   : > { %v1468_v46 = vpack.c.bf16 %v1456_v11, %v1455_v31  ;;  %v1454_v24 = vsel %vm4593_vm8, %v1357_v10, 0.0  ;;  %v1531_v44 = vor.u32 %v1529_v34, %v1528_v12  ;;  %v1535_v47 = vrot.slane %v1533_v39, 7 }
 0x237   : > { %v1467_v57 = vpack.c.bf16 %v1454_v24, %v1453_v40  ;;  %v1470_v0 = vshrl.u32 %v4346_v48, 16  ;;  %v1473_v4 = vshll.u32 %v4346_v48, 16  ;;  %vm5682_vm13 = vcmask 130048  }
 0x238   : > { %1583 = vrot.lane.b32.xlu1 %v1521_v3, %s3745_s10  ;;  %1585 = vrot.lane.b32.xlu0 %v1531_v44, %s3745_s10  ;;  %v1538_v56 = vor.u32 %v1536_v15, %v1535_v47  ;;  %v1547_v13 = vshrl.u32 %v1468_v46, 16  ;;  %v1550_v1 = vshll.u32 %v1468_v46, 16  ;;  %vm5717_vm0 = vcmask 64512  }
 0x239   : > { %v1540_v54 = vshrl.u32 %v1467_v57, 16  ;;  %v1543_v60 = vshll.u32 %v1467_v57, 16  ;;  %v1472_v2 = vrot.slane %v1470_v0, 7  ;;  %vm5681_vm9 = vcmask 1043456   ;;  %vm5718_vm15 = vmmov %vm5717_vm0 }
 0x23a   : > { %v1549_v63 = vrot.slane %v1547_v13, 7  ;;  %vm5719_vm1 = vmmov %vm5717_vm0 }
 0x23b   : > { %v1542_v20 = vrot.slane %v1540_v54, 7  ;;  %v1475_v3 = vor.u32 %v1473_v4, %v1472_v2  ;;  %vm5720_vm6 = vmmov %vm5717_vm0 }
 0x23c   : > { %1589 = vrot.lane.b32.xlu1 %v1538_v56, %s3745_s10  ;;  %1587 = vrot.lane.b32.xlu0 %v1528_v12, %s3745_s10  ;;  %v1552_v55 = vor.u32 %v1550_v1, %v1549_v63  ;;  %vm5721_vm7 = vmmov %vm5717_vm0 }
 0x23d   : > { %v1545_v62 = vor.u32 %v1543_v60, %v1542_v20  ;;  %vm5722_vm14 = vmmov %vm5717_vm0 }
 0x23e   : > { %vm5723_vm2 = vmmov %vm5717_vm0 }
 0x23f   : > { %vm5724_vm11 = vmmov %vm5717_vm0 }
 0x240   : > { %1591 = vrot.lane.b32.xlu1 %v1535_v47, %s3745_s10  ;;  %1593 = vrot.lane.b32.xlu0 %v1545_v62, %s3745_s10  ;;  %vm5725_vm8 = vmmov %vm5717_vm0 }
 0x241   : > { %vm5726_vm12 = vmmov %vm5717_vm0 }
 0x242   : > { %vm5727_vm10 = vmmov %vm5717_vm0 }
 0x244   : > { %1597 = vrot.lane.b32.xlu1 %v1552_v55, %s3745_s10  ;;  %1595 = vrot.lane.b32.xlu0 %v1542_v20, %s3745_s10 }
 0x248   : > { %1599 = vrot.lane.b32.xlu1 %v1549_v63, %s3745_s10  ;;  %1553 = vrot.lane.b32.xlu0 %v1475_v3, %s3745_s10 }
 0x24c   : > { %1555 = vrot.lane.b32.xlu1 %v1472_v2, %s3745_s10  ;;  %s3370_s10 = sadd.s32 4294967295, %s3335_s21  ;;  %s3748_s21 = smov 120  }
 0x286   : > { %v1560_v5 = vpop.permute.xlu0 %1559 }
 0x287   : > { %v1638_v45 = vsel %vm3928_vm5, %v1560_v5, 0 }
 0x288   : > { %v1669_v8 = vshll.u32 %v1638_v45, 16  ;;  %v1845_v25 = vrot.slane %v1638_v45, 1 }
 0x28a   : > { %v1558_v7 = vpop.permute.xlu0 %1557  ;;  %v1671_v18 = vrot.slane %v1669_v8, 1 }
 0x28b   : > { %v4624_v38 = vsel %vm3928_vm5, 0, %v1558_v7 }
 0x28c   : > { %v1664_v48 = vshll.u32 %v4624_v38, 16  ;;  %v1844_v14 = vrot.slane %v4624_v38, 1  ;;  %v1662_v53 = vshrl.u32 %v4624_v38, 16 }
 0x28e   : > { %v1666_v49 = vrot.slane %v1664_v48, 1  ;;  %v1846_v16 = vsel %vm847_vm4, %v1844_v14, %v1845_v25 }
 0x28f   : > { %1879 = vrot.lane.b32.xlu0 %v1846_v16, %s3746_s16  ;;  %v1564_v30 = vpop.permute.xlu0 %1563 }
 0x290   : > { %v1667_v19 = vor.u32 %v1666_v49, %v1662_v53  ;;  %v1639_v27 = vsel %vm3928_vm5, %v1564_v30, 0 }
 0x291   : > { %v1848_v12 = vrot.slane %v1639_v27, 1  ;;  %v1681_v54 = vshll.u32 %v1639_v27, 16 }
 0x292   : > { %v1566_v23 = vpop.permute.xlu1 %1565  ;;  %v1672_v42 = vsel %vm622_vm3, %v1667_v19, %v1671_v18 }
 0x293   : > { %v4634_v26 = vsel %vm3928_vm5, 0, %v1566_v23  ;;  %1795 = vrot.lane.b32.xlu0 %v1672_v42, %s5684_s12  ;;  %v1683_v7 = vrot.slane %v1681_v54, 1 }
 0x294   : > { %v1688_v36 = vshll.u32 %v4634_v26, 16  ;;  %v1686_v47 = vshrl.u32 %v4634_v26, 16 }
 0x296   : > { %v1562_v29 = vpop.permute.xlu1 %1561  ;;  %v1690_v40 = vrot.slane %v1688_v36, 1  ;;  %v1850_v36 = vrot.slane %v4634_v26, 1 }
 0x297   : > { %v4642_v32 = vsel %vm3928_vm5, 0, %v1562_v29 }
 0x298   : > { %v1676_v34 = vshll.u32 %v4642_v32, 16  ;;  %v1847_v39 = vrot.slane %v4642_v32, 1  ;;  %v1674_v56 = vshrl.u32 %v4642_v32, 16  ;;  %v1691_v0 = vor.u32 %v1690_v40, %v1686_v47 }
 0x29a   : > { %v1570_v31 = vpop.permute.xlu0 %1569  ;;  %v1568_v11 = vpop.permute.xlu1 %1567  ;;  %v1849_v10 = vsel %vm847_vm4, %v1847_v39, %v1848_v12  ;;  %v1678_v57 = vrot.slane %v1676_v34, 1 }
 0x29b   : > { %v4649_v46 = vsel %vm3928_vm5, 0, %v1570_v31  ;;  %v1640_v24 = vsel %vm3928_vm5, %v1568_v11, 0  ;;  %1881 = vrot.lane.b32.xlu0 %v1849_v10, %s3746_s16 }
 0x29c   : > { %v1700_v44 = vshll.u32 %v4649_v46, 16  ;;  %v1693_v15 = vshll.u32 %v1640_v24, 16  ;;  %v1698_v2 = vshrl.u32 %v4649_v46, 16  ;;  %v1679_v3 = vor.u32 %v1678_v57, %v1674_v56 }
 0x29d   : > { %v1851_v53 = vrot.slane %v1640_v24, 1  ;;  %v1853_v29 = vrot.slane %v4649_v46, 1 }
 0x29e   : > { %v1572_v13 = vpop.permute.xlu0 %1571  ;;  %v1695_v20 = vrot.slane %v1693_v15, 1  ;;  %v1702_v60 = vrot.slane %v1700_v44, 1  ;;  %v1574_v62 = vpop.permute.xlu1 %1573  ;;  %v1684_v30 = vsel %vm622_vm3, %v1679_v3, %v1683_v7 }
 0x29f   : > { %v1641_v63 = vsel %vm3928_vm5, %v1572_v13, 0  ;;  %v4661_v1 = vsel %vm3928_vm5, 0, %v1574_v62  ;;  %v1852_v44 = vsel %vm847_vm4, %v1850_v36, %v1851_v53 }
 0x2a0   : > { %v1705_v55 = vshll.u32 %v1641_v63, 16  ;;  %v1696_v4 = vsel %vm622_vm3, %v1691_v0, %v1695_v20  ;;  %v1712_v8 = vshll.u32 %v4661_v1, 16  ;;  %v1703_v14 = vor.u32 %v1702_v60, %v1698_v2 }
 0x2a1   : > { %1799 = vrot.lane.b32.xlu1 %v1696_v4, %s5684_s12  ;;  %v1854_v18 = vrot.slane %v1641_v63, 1  ;;  %v1710_v10 = vshrl.u32 %v4661_v1, 16 }
 0x2a2   : > { %v1707_v5 = vrot.slane %v1705_v55, 1  ;;  %v1578_v45 = vpop.permute.xlu0 %1577  ;;  %v1576_v25 = vpop.permute.xlu1 %1575  ;;  %v1714_v12 = vrot.slane %v1712_v8, 1 }
 0x2a3   : > { %v4669_v48 = vsel %vm3928_vm5, 0, %v1578_v45  ;;  %v1642_v49 = vsel %vm3928_vm5, %v1576_v25, 0  ;;  %v1855_v47 = vsel %vm847_vm4, %v1853_v29, %v1854_v18 }
 0x2a4   : > { %v1724_v16 = vshll.u32 %v4669_v48, 16  ;;  %v1717_v19 = vshll.u32 %v1642_v49, 16  ;;  %v1708_v23 = vsel %vm622_vm3, %v1703_v14, %v1707_v5  ;;  %v1722_v31 = vshrl.u32 %v4669_v48, 16 }
 0x2a5   : > { %1797 = vrot.lane.b32.xlu1 %v1684_v30, %s5684_s12  ;;  %1801 = vrot.lane.b32.xlu0 %v1708_v23, %s5684_s12  ;;  %v1715_v20 = vor.u32 %v1714_v12, %v1710_v10  ;;  %v1857_v60 = vrot.slane %v1642_v49, 1  ;;  %v1856_v5 = vrot.slane %v4661_v1, 1  ;;  %v1859_v45 = vrot.slane %v4669_v48, 1 }
 0x2a6   : > { %v1726_v42 = vrot.slane %v1724_v16, 1  ;;  %v1580_v27 = vpop.permute.xlu0 %1579  ;;  %v1582_v34 = vpop.permute.xlu1 %1581  ;;  %v1719_v24 = vrot.slane %v1717_v19, 1 }
 0x2a7   : > { %v1643_v39 = vsel %vm3928_vm5, %v1580_v27, 0  ;;  %v4685_v40 = vsel %vm3928_vm5, 0, %v1582_v34  ;;  %v1858_v16 = vsel %vm847_vm4, %v1856_v5, %v1857_v60 }
 0x2a8   : > { %v1729_v11 = vshll.u32 %v1643_v39, 16  ;;  %v1727_v15 = vor.u32 %v1726_v42, %v1722_v31  ;;  %v1736_v54 = vshll.u32 %v4685_v40, 16  ;;  %v1860_v55 = vrot.slane %v1643_v39, 1 }
 0x2a9   : > { %1883 = vrot.lane.b32.xlu1 %v1852_v44, %s3746_s16  ;;  %1885 = vrot.lane.b32.xlu0 %v1855_v47, %s3746_s16  ;;  %v1720_v3 = vsel %vm622_vm3, %v1715_v20, %v1719_v24  ;;  %v1734_v18 = vshrl.u32 %v4685_v40, 16 }
 0x2aa   : > { %v1731_v57 = vrot.slane %v1729_v11, 1  ;;  %v1584_v56 = vpop.permute.xlu1 %1583  ;;  %v1586_v13 = vpop.permute.xlu0 %1585  ;;  %v1738_v7 = vrot.slane %v1736_v54, 1  ;;  %v1861_v23 = vsel %vm847_vm4, %v1859_v45, %v1860_v55  ;;  %v1862_v54 = vrot.slane %v4685_v40, 1 }
 0x2ab   : > { %v1644_v62 = vsel %vm3928_vm5, %v1584_v56, 0  ;;  %v4697_v63 = vsel %vm3928_vm5, 0, %v1586_v13 }
 0x2ac   : > { %v1732_v0 = vsel %vm622_vm3, %v1727_v15, %v1731_v57  ;;  %v1741_v2 = vshll.u32 %v1644_v62, 16  ;;  %v1748_v4 = vshll.u32 %v4697_v63, 16  ;;  %v1746_v42 = vshrl.u32 %v4697_v63, 16 }
 0x2ad   : > { %1803 = vrot.lane.b32.xlu1 %v1720_v3, %s5684_s12  ;;  %1805 = vrot.lane.b32.xlu0 %v1732_v0, %s5684_s12  ;;  %v1739_v34 = vor.u32 %v1738_v7, %v1734_v18  ;;  %v1863_v10 = vrot.slane %v1644_v62, 1  ;;  %v1865_v60 = vrot.slane %v4697_v63, 1 }
 0x2ae   : > { %v1590_v8 = vpop.permute.xlu1 %1589  ;;  %v1588_v25 = vpop.permute.xlu0 %1587  ;;  %v1750_v14 = vrot.slane %v1748_v4, 1  ;;  %v1743_v19 = vrot.slane %v1741_v2, 1 }
 0x2af   : > { %v4708_v53 = vsel %vm3928_vm5, 0, %v1590_v8  ;;  %v1645_v49 = vsel %vm3928_vm5, %v1588_v25, 0  ;;  %v1864_v5 = vsel %vm847_vm4, %v1862_v54, %v1863_v10 }
 0x2b0   : > { %v1753_v30 = vshll.u32 %v1645_v49, 16  ;;  %v1760_v27 = vshll.u32 %v4708_v53, 16  ;;  %v1751_v11 = vor.u32 %v1750_v14, %v1746_v42  ;;  %v1744_v47 = vsel %vm622_vm3, %v1739_v34, %v1743_v19 }
 0x2b1   : > { %1887 = vrot.lane.b32.xlu1 %v1858_v16, %s3746_s16  ;;  %1889 = vrot.lane.b32.xlu0 %v1861_v23, %s3746_s16  ;;  %v1866_v57 = vrot.slane %v1645_v49, 1  ;;  %v1758_v2 = vshrl.u32 %v4708_v53, 16 }
 0x2b2   : > { %v1755_v36 = vrot.slane %v1753_v30, 1  ;;  %v1592_v29 = vpop.permute.xlu1 %1591  ;;  %v1594_v12 = vpop.permute.xlu0 %1593  ;;  %v1762_v56 = vrot.slane %v1760_v27, 1 }
 0x2b3   : > { %v1646_v39 = vsel %vm3928_vm5, %v1592_v29, 0  ;;  %v4723_v31 = vsel %vm3928_vm5, 0, %v1594_v12  ;;  %v1867_v7 = vsel %vm847_vm4, %v1865_v60, %v1866_v57  ;;  %v1868_v29 = vrot.slane %v4708_v53, 1 }
 0x2b4   : > { %v1765_v24 = vshll.u32 %v1646_v39, 16  ;;  %v1772_v44 = vshll.u32 %v4723_v31, 16  ;;  %v1756_v15 = vsel %vm622_vm3, %v1751_v11, %v1755_v36  ;;  %v1770_v45 = vshrl.u32 %v4723_v31, 16 }
 0x2b5   : > { %1807 = vrot.lane.b32.xlu1 %v1744_v47, %s5684_s12  ;;  %1809 = vrot.lane.b32.xlu0 %v1756_v15, %s5684_s12  ;;  %v1763_v16 = vor.u32 %v1762_v56, %v1758_v2  ;;  %v1869_v18 = vrot.slane %v1646_v39, 1 }
 0x2b6   : > { %v1598_v13 = vpop.permute.xlu1 %1597  ;;  %v1596_v20 = vpop.permute.xlu0 %1595  ;;  %v1774_v62 = vrot.slane %v1772_v44, 1  ;;  %v1767_v4 = vrot.slane %v1765_v24, 1  ;;  %v1871_v44 = vrot.slane %v4723_v31, 1 }
 0x2b7   : > { %v4734_v0 = vsel %vm3928_vm5, 0, %v1598_v13  ;;  %v1647_v55 = vsel %vm3928_vm5, %v1596_v20, 0  ;;  %v1870_v57 = vsel %vm847_vm4, %v1868_v29, %v1869_v18  ;;  %v3634_v20 = vld [vmem:[%s5670_s3] sm:$0xff]  }
 0x2b8   : > { %v1777_v3 = vshll.u32 %v1647_v55, 16  ;;  %v1784_v8 = vshll.u32 %v4734_v0, 16  ;;  %v1775_v23 = vor.u32 %v1774_v62, %v1770_v45  ;;  %v1768_v36 = vsel %vm622_vm3, %v1763_v16, %v1767_v4  ;;  %3468 = vmatprep.subr.bf16.mxu1 %v3634_v20  ;;  %v3637_v16 = vld [vmem:[%s5670_s3 + $0x18] sm:$0xff]  }
 0x2b9   : > { %1891 = vrot.lane.b32.xlu1 %v1864_v5, %s3746_s16  ;;  %1893 = vrot.lane.b32.xlu0 %v1867_v7, %s3746_s16  ;;  %v1872_v12 = vrot.slane %v1647_v55, 1  ;;  %v1782_v15 = vshrl.u32 %v4734_v0, 16  ;;  %v1874_v5 = vrot.slane %v4734_v0, 1 }
 0x2ba   : > { %v1779_v25 = vrot.slane %v1777_v3, 1  ;;  %v1600_v14 = vpop.permute.xlu1 %1599  ;;  %v1554_v49 = vpop.permute.xlu0 %1553  ;;  %v1786_v39 = vrot.slane %v1784_v8, 1  ;;  %3469 = vmatpush3.bf16.msra.mxu1 %v3634_v20 }
 0x2bb   : > { %v1648_v19 = vsel %vm3928_vm5, %v1600_v14, 0  ;;  %v4749_v30 = vsel %vm3928_vm5, 0, %v1554_v49  ;;  %v1873_v60 = vsel %vm847_vm4, %v1871_v44, %v1872_v12  ;;  %v3635_v14 = vld [vmem:[%s5670_s3 + $0x8] sm:$0xff]   ;;  %v3636_v49 = vld [vmem:[%s5670_s3 + $0x10] sm:$0xff]  }
 0x2bc   : > { %v1789_v42 = vshll.u32 %v1648_v19, 16  ;;  %v1652_v27 = vshll.u32 %v4749_v30, 16  ;;  %v1780_v34 = vsel %vm622_vm3, %v1775_v23, %v1779_v25  ;;  %v1650_v11 = vshrl.u32 %v4749_v30, 16  ;;  %3470 = vmatprep.subr.bf16.mxu1 %v3635_v14 }
 0x2bd   : > { %1811 = vrot.lane.b32.xlu1 %v1768_v36, %s5684_s12  ;;  %1813 = vrot.lane.b32.xlu0 %v1780_v34, %s5684_s12  ;;  %v1787_v55 = vor.u32 %v1786_v39, %v1782_v15  ;;  %v1875_v2 = vrot.slane %v1648_v19, 1  ;;  %v1841_v8 = vrot.slane %v4749_v30, 1 }
 0x2be   : > { %v1654_v10 = vrot.slane %v1652_v27, 1  ;;  %v1556_v24 = vpop.permute.xlu1 %1555  ;;  %v1791_v54 = vrot.slane %v1789_v42, 1  ;;  %3471 = vmatpush3.bf16.msra.mxu1 %v3635_v14  ;;  %v3638_v27 = vld [vmem:[%s5670_s3 + $0x20] ss:$0 sps:$4 sm:$0xff]  }
 0x2bf   : > { %v1637_v47 = vsel %vm3928_vm5, %v1556_v24, 0  ;;  %v1876_v7 = vsel %vm847_vm4, %v1874_v5, %v1875_v2  ;;  %3472 = vmatprep.subr.bf16.mxu1 %v3636_v49  ;;  %v2108_v36 = vsel %vm5681_vm9, %v3638_v27, 0 }
 0x2c0   : > { %v1655_v56 = vor.u32 %v1654_v10, %v1650_v11  ;;  %v1657_v13 = vshll.u32 %v1637_v47, 16  ;;  %v1792_v4 = vsel %vm622_vm3, %v1787_v55, %v1791_v54  ;;  %v1842_v45 = vrot.slane %v1637_v47, 1 }
 0x2c1   : > { %1895 = vrot.lane.b32.xlu1 %v1870_v57, %s3746_s16  ;;  %1897 = vrot.lane.b32.xlu0 %v1873_v60, %s3746_s16 }
 0x2c2   : > { %v1659_v62 = vrot.slane %v1657_v13, 1  ;;  %v1843_v25 = vsel %vm847_vm4, %v1841_v8, %v1842_v45  ;;  %3473 = vmatpush3.bf16.msra.mxu1 %v3636_v49 }
 0x2c3   : > { %3474 = vmatprep.subr.bf16.mxu1 %v3637_v16 }
 0x2c4   : > { %v1660_v3 = vsel %vm622_vm3, %v1655_v56, %v1659_v62 }
 0x2c5   : > { %1815 = vrot.lane.b32.xlu1 %v1792_v4, %s5684_s12  ;;  %1793 = vrot.lane.b32.xlu0 %v1660_v3, %s5684_s12 }
 0x2c6   : > { %3475 = vmatpush3.bf16.msra.mxu1 %v3637_v16 }
 0x2c7   : > { %3532 = vmatprep.subr.msk.bf16.mxu1 %vm5681_vm9, %v3638_v27 }
 0x2c9   : > { %1899 = vrot.lane.b32.xlu1 %v1876_v7, %s3746_s16 }
 0x2ca   : > { %3477 = vmatpush3.bf16.msra.mxu1 %v2108_v36 }
 0x2cd   : > { %1877 = vrot.lane.b32.xlu1 %v1843_v25, %s3746_s16 }
 0x301   : > { %v1880_v18 = vpop.permute.xlu0 %1879 }
 0x305   : > { %v1796_v19 = vpop.permute.xlu0 %1795 }
 0x306   : > { %v1904_v23 = vsel %vm5717_vm0, %v4624_v38, %v1796_v19 }
 0x307   : > { %v4791_v42 = vsel %vm5682_vm13, %v1904_v23, %v1880_v18 }
 0x308   : > { %1960 = vrot.lane.b32.xlu0 %v4791_v42, %s3744_s18 }
 0x30d   : > { %v1882_v29 = vpop.permute.xlu0 %1881 }
 0x313   : > { %v1800_v12 = vpop.permute.xlu1 %1799 }
 0x314   : > { %v1908_v10 = vsel %vm5719_vm1, %v4634_v26, %v1800_v12  ;;  %vm5679_vm1 = vcmask 588800  }
 0x317   : > { %v1798_v38 = vpop.permute.xlu1 %1797  ;;  %v1802_v34 = vpop.permute.xlu0 %1801 }
 0x318   : > { %v1906_v39 = vsel %vm5718_vm15, %v4642_v32, %v1798_v38  ;;  %v1910_v15 = vsel %vm5720_vm6, %v4649_v46, %v1802_v34  ;;  %vm5680_vm15 = vcmask 392192   ;;  %vm5728_vm6 = vcmask 195584  }
 0x319   : > { %v4803_v11 = vsel %vm5682_vm13, %v1906_v39, %v1882_v29 }
 0x31a   : > { %1981 = vrot.lane.b32.xlu0 %v4803_v11, %s5685_s20  ;;  %1962 = vrot.lane.b32.xlu1 %v4803_v11, %s3744_s18 }
 0x31b   : > { %v1884_v24 = vpop.permute.xlu1 %1883  ;;  %v1886_v44 = vpop.permute.xlu0 %1885 }
 0x31c   : > { %v4812_v47 = vsel %vm5682_vm13, %v1908_v10, %v1884_v24  ;;  %v4821_v54 = vsel %vm5682_vm13, %v1910_v15, %v1886_v44 }
 0x31e   : > { %1964 = vrot.lane.b32.xlu0 %v4812_v47, %s3744_s18  ;;  %1983 = vrot.lane.b32.xlu1 %v4812_v47, %s5685_s20 }
 0x31f   : > { %v1804_v32 = vpop.permute.xlu1 %1803  ;;  %v1806_v57 = vpop.permute.xlu0 %1805 }
 0x320   : > { %v1912_v26 = vsel %vm5721_vm7, %v4661_v1, %v1804_v32  ;;  %v1914_v60 = vsel %vm5722_vm14, %v4669_v48, %v1806_v57  ;;  %vm5729_vm7 = vmmov %vm5728_vm6 }
 0x321   : > { %vm5730_vm14 = vmmov %vm5728_vm6 }
 0x322   : > { %1985 = vrot.lane.b32.xlu0 %v4821_v54, %s5685_s20  ;;  %1966 = vrot.lane.b32.xlu1 %v4821_v54, %s3744_s18 }
 0x323   : > { %v1888_v56 = vpop.permute.xlu1 %1887  ;;  %v1890_v13 = vpop.permute.xlu0 %1889 }
 0x324   : > { %v4830_v20 = vsel %vm5682_vm13, %v1912_v26, %v1888_v56  ;;  %v4839_v55 = vsel %vm5682_vm13, %v1914_v60, %v1890_v13 }
 0x326   : > { %1968 = vrot.lane.b32.xlu0 %v4830_v20, %s3744_s18  ;;  %1987 = vrot.lane.b32.xlu1 %v4830_v20, %s5685_s20 }
 0x327   : > { %v1808_v46 = vpop.permute.xlu1 %1807  ;;  %v1810_v62 = vpop.permute.xlu0 %1809 }
 0x328   : > { %v1916_v1 = vsel %vm5723_vm2, %v4685_v40, %v1808_v46  ;;  %v1918_v5 = vsel %vm5724_vm11, %v4697_v63, %v1810_v62  ;;  %vm5731_vm2 = vmmov %vm5728_vm6 }
 0x329   : > { %vm5732_vm11 = vmmov %vm5731_vm2 }
 0x32a   : > { %1989 = vrot.lane.b32.xlu0 %v4839_v55, %s5685_s20  ;;  %1970 = vrot.lane.b32.xlu1 %v4839_v55, %s3744_s18 }
 0x32b   : > { %v1892_v2 = vpop.permute.xlu1 %1891  ;;  %v1894_v3 = vpop.permute.xlu0 %1893 }
 0x32c   : > { %v4848_v4 = vsel %vm5682_vm13, %v1916_v1, %v1892_v2  ;;  %v4857_v7 = vsel %vm5682_vm13, %v1918_v5, %v1894_v3 }
 0x32e   : > { %1972 = vrot.lane.b32.xlu0 %v4848_v4, %s3744_s18  ;;  %1991 = vrot.lane.b32.xlu1 %v4848_v4, %s5685_s20 }
 0x32f   : > { %v1812_v48 = vpop.permute.xlu1 %1811  ;;  %v1814_v45 = vpop.permute.xlu0 %1813 }
 0x330   : > { %v1920_v40 = vsel %vm5725_vm8, %v4708_v53, %v1812_v48  ;;  %v1922_v49 = vsel %vm5726_vm12, %v4723_v31, %v1814_v45  ;;  %vm5733_vm8 = vmmov %vm5731_vm2 }
 0x331   : > { %vm5734_vm12 = vmmov %vm5731_vm2 }
 0x332   : > { %1993 = vrot.lane.b32.xlu0 %v4857_v7, %s5685_s20  ;;  %1974 = vrot.lane.b32.xlu1 %v4857_v7, %s3744_s18 }
 0x333   : > { %v1896_v8 = vpop.permute.xlu1 %1895  ;;  %v1898_v14 = vpop.permute.xlu0 %1897 }
 0x334   : > { %v4866_v25 = vsel %vm5682_vm13, %v1920_v40, %v1896_v8  ;;  %v1947_v16 = vsel %vm5682_vm13, %v1922_v49, %v1898_v14 }
 0x336   : > { %1976 = vrot.lane.b32.xlu0 %v4866_v25, %s3744_s18  ;;  %1995 = vrot.lane.b32.xlu1 %v4866_v25, %s5685_s20 }
 0x337   : > { %v1816_v63 = vpop.permute.xlu1 %1815  ;;  %v1794_v23 = vpop.permute.xlu0 %1793 }
 0x338   : > { %v1924_v53 = vsel %vm5727_vm10, %v4734_v0, %v1816_v63  ;;  %v1902_v31 = vsel %vm5717_vm0, %v4749_v30, %v1794_v23  ;;  %vm5735_vm10 = vmmov %vm5731_vm2 }
 0x339   : > { %vm5736_vm0 = vmmov %vm5731_vm2 }
 0x33a   : > { %1997 = vrot.lane.b32.xlu0 %v1947_v16, %s5685_s20  ;;  %1978 = vrot.lane.b32.xlu1 %v1947_v16, %s3744_s18 }
 0x33b   : > { %v1900_v18 = vpop.permute.xlu1 %1899 }
 0x33c   : > { %v1949_v19 = vsel %vm5682_vm13, %v1924_v53, %v1900_v18 }
 0x33e   : > { %1999 = vrot.lane.b32.xlu1 %v1949_v19, %s5685_s20  ;;  %v4925_v19 = vstv %s3370_s10  ;;  %s3388_s10 = sshll.u32 %s3726_s28, 5  ;;  %s3749_s20 = smov [#allocation3]  }
 0x33f   : > { %v1878_v27 = vpop.permute.xlu1 %1877  ;;  %v2301_v23 = vadd.s32 1, %v4925_v19 }
 0x340   : > { %v1927_v29 = vsel %vm5682_vm13, %v1902_v31, %v1878_v27 }
 0x37a   : > { %v1961_v36 = vpop.permute.xlu0 %1960 }
 0x37b   : > { %v2002_v12 = vsel %vm5728_vm6, %v1927_v29, %v1961_v36  ;;  %vm5737_vm6 = vmmov %vm5736_vm0 }
 0x38c   : > { %v1963_v38 = vpop.permute.xlu1 %1962  ;;  %v1982_v34 = vpop.permute.xlu0 %1981 }
 0x38d   : > { %v2023_v0 = vsel %vm5680_vm15, %v2002_v12, %v1982_v34  ;;  %v2004_v39 = vsel %vm5729_vm7, %v4791_v42, %v1963_v38  ;;  %vm2310_vm7 = vcmp.ge.s32.totalorder %v4925_v19, 0  ;;  %v2303_v12 = vadd.s32 3, %v4925_v19 }
 0x38e   : > { %3478 = vmatprep.mubr.msk.bf16.mxu1 %vm5679_vm1, %v2023_v0 }
 0x390   : > { %v1984_v10 = vpop.permute.xlu1 %1983  ;;  %v1965_v24 = vpop.permute.xlu0 %1964 }
 0x391   : > { %v2025_v44 = vsel %vm5680_vm15, %v2004_v39, %v1984_v10  ;;  %v2006_v30 = vsel %vm5730_vm14, %v4803_v11, %v1965_v24  ;;  %vm2320_vm14 = vcmp.lt.s32.totalorder %v4925_v19, 16  ;;  %v2302_v39 = vadd.s32 2, %v4925_v19 }
 0x392   : > { %3479 = vmatmul.mubr.msk.bf16.vlgmr.msra.gmra.mrb[12].mxu1 %vm5679_vm1, %v2025_v44 }
 0x394   : > { %v1967_v32 = vpop.permute.xlu1 %1966  ;;  %v1986_v57 = vpop.permute.xlu0 %1985 }
 0x395   : > { %v2027_v15 = vsel %vm5680_vm15, %v2006_v30, %v1986_v57  ;;  %v2008_v26 = vsel %vm5731_vm2, %v4812_v47, %v1967_v32  ;;  %vm2311_vm2 = vcmp.ge.s32.totalorder %v2301_v23, 0 }
 0x396   : > { %3482 = vmatprep.mubr.msk.bf16.mxu1 %vm5679_vm1, %v2027_v15 }
 0x398   : > { %v1988_v56 = vpop.permute.xlu1 %1987  ;;  %v1969_v42 = vpop.permute.xlu0 %1968 }
 0x399   : > { %v2029_v13 = vsel %vm5680_vm15, %v2008_v26, %v1988_v56  ;;  %v2010_v46 = vsel %vm5732_vm11, %v4821_v54, %v1969_v42  ;;  %vm2321_vm11 = vcmp.lt.s32.totalorder %v2301_v23, 16  ;;  %v5008_v23 = vadd.s32 6, %v4925_v19 }
 0x39a   : > { %3483 = vmatmul.mubr.msk.bf16.gmra.mrb[16].mxu1 %vm5679_vm1, %v2029_v13 }
 0x39c   : > { %v1971_v60 = vpop.permute.xlu1 %1970  ;;  %v1990_v11 = vpop.permute.xlu0 %1989 }
 0x39d   : > { %v2031_v62 = vsel %vm5680_vm15, %v2010_v46, %v1990_v11  ;;  %v2012_v1 = vsel %vm5733_vm8, %v4830_v20, %v1971_v60  ;;  %v4968_v11 = vadd.s32 5, %v4925_v19 }
 0x39e   : > { %3486 = vmatprep.mubr.msk.bf16.mxu1 %vm5679_vm1, %v2031_v62 }
 0x3a0   : > { %v1992_v2 = vpop.permute.xlu1 %1991  ;;  %v1973_v47 = vpop.permute.xlu0 %1972 }
 0x3a1   : > { %v2033_v3 = vsel %vm5680_vm15, %v2012_v1, %v1992_v2  ;;  %v2014_v48 = vsel %vm5734_vm12, %v4839_v55, %v1973_v47 }
 0x3a2   : > { %3487 = vmatmul.mubr.msk.bf16.gmra.mrb[20].mxu1 %vm5679_vm1, %v2033_v3 }
 0x3a4   : > { %v1975_v5 = vpop.permute.xlu1 %1974  ;;  %v1994_v54 = vpop.permute.xlu0 %1993 }
 0x3a5   : > { %v2035_v45 = vsel %vm5680_vm15, %v2014_v48, %v1994_v54  ;;  %v2016_v40 = vsel %vm5735_vm10, %v4848_v4, %v1975_v5  ;;  %vm4948_vm10 = vmand %vm2311_vm2, %vm2321_vm11  ;;  %vm2313_vm2 = vcmp.ge.s32.totalorder %v2303_v12, 0  ;;  %vm2323_vm11 = vcmp.lt.s32.totalorder %v2303_v12, 16 }
 0x3a6   : > { %3490 = vmatprep.mubr.msk.bf16.mxu1 %vm5679_vm1, %v2035_v45  ;;  %v2304_v45 = vadd.s32 4, %v4925_v19 }
 0x3a8   : > { %v1996_v20 = vpop.permute.xlu1 %1995  ;;  %v1977_v8 = vpop.permute.xlu0 %1976 }
 0x3a9   : > { %v2037_v14 = vsel %vm5680_vm15, %v2016_v40, %v1996_v20  ;;  %v2018_v63 = vsel %vm5736_vm0, %v4857_v7, %v1977_v8  ;;  %v4930_v7 = vld [vmem:[%s5671_s4] ss:$0 sm:$0xff] }
 0x3aa   : > { %3491 = vmatmul.mubr.msk.bf16.gmra.mrb[24].mxu1 %vm5679_vm1, %v2037_v14 }
 0x3ac   : > { %v1979_v55 = vpop.permute.xlu1 %1978  ;;  %v1998_v49 = vpop.permute.xlu0 %1997 }
 0x3ad   : > { %v2039_v16 = vsel %vm5680_vm15, %v2018_v63, %v1998_v49  ;;  %v2020_v53 = vsel %vm5737_vm6, %v4866_v25, %v1979_v55  ;;  %vm4958_vm6 = vmand %vm2310_vm7, %vm2320_vm14  ;;  %v4992_v55 = vadd.s32 7, %v4925_v19 }
 0x3ae   : > { %3494 = vmatprep.mubr.msk.bf16.mxu1 %vm5679_vm1, %v2039_v16 }
 0x3b0   : > { %v2000_v18 = vpop.permute.xlu1 %1999 }
 0x3b1   : > { %v2041_v4 = vsel %vm5680_vm15, %v2020_v53, %v2000_v18  ;;  %vm2314_vm15 = vcmp.ge.s32.totalorder %v2304_v45, 0 }
 0x3b2   : > { %3495 = vmatmul.mubr.msk.bf16.gmra.mrb[28].mxu1 %vm5679_vm1, %v2041_v4 }
 0x465   : > { %v3480_v27 = vpop.f32.mrb[12].mxu1 }
 0x466   : > { %v4934_v36 = vadd.f32 %v3480_v27, %v4930_v7  ;;  %v2144_v25 = vpop.f32.mrb[13].mxu1 }
 0x467   : > { %v2145_v31 = vadd.f32 %v4930_v7, %v2144_v25  ;;  %v3481_v29 = vpop.f32.mrb[14].mxu1 }
 0x468   : > { %vm2241_vm8 = vcmp.ge.f32.partialorder %v4934_v36, 0.0  ;;  %v2261_v38 = vmul.f32 0.1, %v4934_v36  ;;  %v4943_v34 = vadd.f32 %v3481_v29, %v4930_v7  ;;  %v2147_v0 = vpop.f32.mrb[15].mxu1 }
 0x469   : > { %vm2239_vm12 = vcmp.ge.f32.partialorder %v2145_v31, 0.0  ;;  %v2259_v10 = vmul.f32 0.1, %v2145_v31  ;;  %v2148_v24 = vadd.f32 %v4930_v7, %v2147_v0 }
 0x46a   : > { %v2281_v44 = vsel %vm2241_vm8, %v4934_v36, %v2261_v38  ;;  %vm2242_vm0 = vcmp.ge.f32.partialorder %v4943_v34, 0.0  ;;  %v2262_v32 = vmul.f32 0.1, %v4943_v34  ;;  %vm2312_vm8 = vcmp.ge.s32.totalorder %v2302_v39, 0 }
 0x46b   : > { %v2279_v57 = vsel %vm2239_vm12, %v2145_v31, %v2259_v10  ;;  %vm2240_vm1 = vcmp.ge.f32.partialorder %v2148_v24, 0.0  ;;  %v2260_v26 = vmul.f32 0.1, %v2148_v24  ;;  %v2362_v42 = vsel %vm4948_vm10, %v2281_v44, 0.0 }
 0x46c   : > { %v2282_v56 = vsel %vm2242_vm0, %v4943_v34, %v2262_v32  ;;  %v2360_v62 = vsel %vm4958_vm6, %v2279_v57, 0.0  ;;  %vm2315_vm12 = vcmp.ge.s32.totalorder %v4968_v11, 0 }
 0x46d   : > { %v2363_v13 = vsel %vm4948_vm10, %v2282_v56, 0.0  ;;  %v2280_v46 = vsel %vm2240_vm1, %v2148_v24, %v2260_v26  ;;  %v3484_v60 = vpop.f32.mrb[16].mxu1  ;;  %vm2322_vm1 = vcmp.lt.s32.totalorder %v2302_v39, 16  ;;  %vm4997_vm10 = vmand %vm2313_vm2, %vm2323_vm11 }
 0x46e   : > { %v2361_v1 = vsel %vm4958_vm6, %v2280_v46, 0.0  ;;  %v4975_v2 = vadd.f32 %v3484_v60, %v4930_v7  ;;  %v2160_v47 = vpop.f32.mrb[17].mxu1  ;;  %v2381_v3 = vpack.c.bf16 %v2363_v13, %v2362_v42  ;;  %vm2325_vm6 = vcmp.lt.s32.totalorder %v4968_v11, 16  ;;  %vm5013_vm2 = vmand %vm2312_vm8, %vm2322_vm1 }
 0x46f   : > { %v4977_v48 = vpack.c.bf16 %v2361_v1, %v2360_v62  ;;  %v4980_v5 = vadd.f32 %v4930_v7, %v2160_v47  ;;  %v3485_v54 = vpop.f32.mrb[18].mxu1  ;;  %vm2324_vm8 = vcmp.lt.s32.totalorder %v2304_v45, 16  ;;  %vm2317_vm1 = vcmp.ge.s32.totalorder %v4992_v55, 0 }
 0x470   : > { %vm2245_vm7 = vcmp.ge.f32.partialorder %v4975_v2, 0.0  ;;  %v2265_v40 = vmul.f32 0.1, %v4975_v2  ;;  %v4986_v20 = vadd.f32 %v3485_v54, %v4930_v7  ;;  %v2163_v8 = vpop.f32.mrb[19].mxu1  ;;  %v2398_v14 = vshrl.u32 %v2381_v3, 16  ;;  %vm5065_vm13 = vmand %vm2314_vm15, %vm2324_vm8 }
 0x471   : > { %vm2243_vm14 = vcmp.ge.f32.partialorder %v4980_v5, 0.0  ;;  %v2263_v63 = vmul.f32 0.1, %v4980_v5  ;;  %v5004_v18 = vadd.f32 %v4930_v7, %v2163_v8  ;;  %v2401_v39 = vshll.u32 %v2381_v3, 16 }
 0x472   : > { %v2285_v49 = vsel %vm2245_vm7, %v4975_v2, %v2265_v40  ;;  %vm2246_vm0 = vcmp.ge.f32.partialorder %v4986_v20, 0.0  ;;  %v2266_v53 = vmul.f32 0.1, %v4986_v20  ;;  %v2400_v4 = vrot.slane %v2398_v14, 7 }
 0x473   : > { %v2283_v27 = vsel %vm2243_vm14, %v4980_v5, %v2263_v63  ;;  %vm2244_vm11 = vcmp.ge.f32.partialorder %v5004_v18, 0.0  ;;  %v2264_v29 = vmul.f32 0.1, %v5004_v18  ;;  %v2366_v12 = vsel %vm4997_vm10, %v2285_v49, 0.0 }
 0x474   : > { %v2286_v31 = vsel %vm2246_vm0, %v4986_v20, %v2266_v53  ;;  %2466 = vrot.lane.b32.xlu0 %v2400_v4, %s3748_s21  ;;  %vm2327_vm7 = vcmp.lt.s32.totalorder %v4992_v55, 16  ;;  %v2364_v32 = vsel %vm5013_vm2, %v2283_v27, 0.0  ;;  %v2403_v56 = vor.u32 %v2401_v39, %v2400_v4 }
 0x475   : > { %v2367_v38 = vsel %vm4997_vm10, %v2286_v31, 0.0  ;;  %v3488_v0 = vpop.f32.mrb[20].mxu1  ;;  %v2284_v24 = vsel %vm2244_vm11, %v5004_v18, %v2264_v29  ;;  %vm2316_vm14 = vcmp.ge.s32.totalorder %v5008_v23, 0  ;;  %vm2326_vm10 = vcmp.lt.s32.totalorder %v5008_v23, 16  ;;  %vm5056_vm11 = vmand %vm2315_vm12, %vm2325_vm6 }
 0x476   : > { %v2383_v10 = vpack.c.bf16 %v2367_v38, %v2366_v12  ;;  %v5027_v44 = vadd.f32 %v3488_v0, %v4930_v7  ;;  %v2176_v30 = vpop.f32.mrb[21].mxu1  ;;  %v2365_v57 = vsel %vm5013_vm2, %v2284_v24, 0.0  ;;  %v5072_v49 = vadd.s32 9, %v4925_v19  ;;  %vm5125_vm6 = vmand %vm2316_vm14, %vm2326_vm10 }
 0x477   : > { %v5036_v15 = vadd.f32 %v4930_v7, %v2176_v30  ;;  %v3489_v26 = vpop.f32.mrb[22].mxu1  ;;  %v2382_v60 = vpack.c.bf16 %v2365_v57, %v2364_v32  ;;  %v5078_v27 = vadd.s32 8, %v4925_v19 }
 0x478   : > { %vm2249_vm0 = vcmp.ge.f32.partialorder %v5027_v44, 0.0  ;;  %v2269_v42 = vmul.f32 0.1, %v5027_v44  ;;  %v5043_v13 = vadd.f32 %v3489_v26, %v4930_v7  ;;  %v2179_v46 = vpop.f32.mrb[23].mxu1  ;;  %2464 = vrot.lane.b32.xlu0 %v2403_v56, %s3748_s21  ;;  %v2412_v47 = vshrl.u32 %v2383_v10, 16 }
 0x479   : > { %vm2247_vm2 = vcmp.ge.f32.partialorder %v5036_v15, 0.0  ;;  %v2267_v62 = vmul.f32 0.1, %v5036_v15  ;;  %v5049_v1 = vadd.f32 %v4930_v7, %v2179_v46  ;;  %v2405_v8 = vshrl.u32 %v2382_v60, 16 }
 0x47a   : > { %v2289_v3 = vsel %vm2249_vm0, %v5027_v44, %v2269_v42  ;;  %vm2250_vm9 = vcmp.ge.f32.partialorder %v5043_v13, 0.0  ;;  %v2270_v40 = vmul.f32 0.1, %v5043_v13  ;;  %v5075_v4 = vrot.slane %v2412_v47, 7 }
 0x47b   : > { %v2287_v14 = vsel %vm2247_vm2, %v5036_v15, %v2267_v62  ;;  %vm2248_vm0 = vcmp.ge.f32.partialorder %v5049_v1, 0.0  ;;  %v2268_v11 = vmul.f32 0.1, %v5049_v1  ;;  %v2407_v53 = vrot.slane %v2405_v8, 7 }
 0x47c   : > { %v2290_v16 = vsel %vm2250_vm9, %v5043_v13, %v2270_v40  ;;  %v2370_v45 = vsel %vm5056_vm11, %v2289_v3, 0.0  ;;  %v2415_v12 = vshll.u32 %v2383_v10, 16  ;;  %v2368_v38 = vsel %vm5065_vm13, %v2287_v14, 0.0 }
 0x47d   : > { %v2371_v25 = vsel %vm5056_vm11, %v2290_v16, 0.0  ;;  %v2288_v31 = vsel %vm2248_vm0, %v5049_v1, %v2268_v11  ;;  %v3492_v29 = vpop.f32.mrb[24].mxu1  ;;  %2470 = vrot.lane.b32.xlu0 %v2407_v53, %s3748_s21  ;;  %v2408_v26 = vshll.u32 %v2382_v60, 16  ;;  %vm2319_vm9 = vcmp.ge.s32.totalorder %v5072_v49, 0 }
 0x47e   : > { %v5087_v0 = vpack.c.bf16 %v2371_v25, %v2370_v45  ;;  %v2369_v39 = vsel %vm5065_vm13, %v2288_v31, 0.0  ;;  %v5093_v19 = vadd.f32 %v3492_v29, %v4930_v7  ;;  %v2192_v24 = vpop.f32.mrb[25].mxu1  ;;  %v2417_v32 = vor.u32 %v2415_v12, %v5075_v4  ;;  %vm5110_vm13 = vmand %vm2317_vm1, %vm2327_vm7 }
 0x47f   : > { %v2384_v30 = vpack.c.bf16 %v2369_v39, %v2368_v38  ;;  %v5097_v57 = vadd.f32 %v4930_v7, %v2192_v24  ;;  %v3493_v10 = vpop.f32.mrb[26].mxu1  ;;  %vm2329_vm1 = vcmp.lt.s32.totalorder %v5072_v49, 16  ;;  %v2410_v11 = vor.u32 %v2408_v26, %v2407_v53 }
 0x480   : > { %vm2253_vm15 = vcmp.ge.f32.partialorder %v5093_v19, 0.0  ;;  %v2273_v56 = vmul.f32 0.1, %v5093_v19  ;;  %v5103_v42 = vadd.f32 %v3493_v10, %v4930_v7  ;;  %v2195_v46 = vpop.f32.mrb[27].mxu1  ;;  %v2426_v62 = vshrl.u32 %v5087_v0, 16  ;;  %2472 = vrot.lane.b32.xlu1 %v2417_v32, %s3748_s21  ;;  %vm5166_vm0 = vmand %vm2319_vm9, %vm2329_vm1 }
 0x481   : > { %vm2251_vm12 = vcmp.ge.f32.partialorder %v5097_v57, 0.0  ;;  %v2271_v60 = vmul.f32 0.1, %v5097_v57  ;;  %v5118_v3 = vadd.f32 %v4930_v7, %v2195_v46  ;;  %v2419_v54 = vshrl.u32 %v2384_v30, 16 }
 0x482   : > { %v2293_v40 = vsel %vm2253_vm15, %v5093_v19, %v2273_v56  ;;  %vm2254_vm8 = vcmp.ge.f32.partialorder %v5103_v42, 0.0  ;;  %v2274_v8 = vmul.f32 0.1, %v5103_v42  ;;  %v2422_v25 = vshll.u32 %v2384_v30, 16 }
 0x483   : > { %v2291_v14 = vsel %vm2251_vm12, %v5097_v57, %v2271_v60  ;;  %vm2252_vm7 = vcmp.ge.f32.partialorder %v5118_v3, 0.0  ;;  %v2272_v63 = vmul.f32 0.1, %v5118_v3  ;;  %v2374_v23 = vsel %vm5110_vm13, %v2293_v40, 0.0 }
 0x484   : > { %v2294_v16 = vsel %vm2254_vm8, %v5103_v42, %v2274_v8  ;;  %v2421_v45 = vrot.slane %v2419_v54, 7  ;;  %v2372_v31 = vsel %vm5125_vm6, %v2291_v14, 0.0  ;;  %2468 = vrot.lane.b32.xlu1 %v2410_v11, %s3748_s21  ;;  %v2428_v39 = vrot.slane %v2426_v62, 7 }
 0x485   : > { %v2375_v29 = vsel %vm5110_vm13, %v2294_v16, 0.0  ;;  %v2292_v12 = vsel %vm2252_vm7, %v5118_v3, %v2272_v63  ;;  %v3496_v38 = vpop.f32.mrb[28].mxu1  ;;  %vm2318_vm14 = vcmp.ge.s32.totalorder %v5078_v27, 0  ;;  %vm2328_vm10 = vcmp.lt.s32.totalorder %v5078_v27, 16 }
 0x486   : > { %v2387_v53 = vpack.c.bf16 %v2375_v29, %v2374_v23  ;;  %v2373_v24 = vsel %vm5125_vm6, %v2292_v12, 0.0  ;;  %v2217_v32 = vadd.f32 %v3496_v38, %v4930_v7  ;;  %v2208_v10 = vpop.f32.mrb[29].mxu1  ;;  %v2424_v30 = vor.u32 %v2422_v25, %v2421_v45  ;;  %vm5175_vm13 = vmand %vm2318_vm14, %vm2328_vm10 }
 0x487   : > { %v2386_v26 = vpack.c.bf16 %v2373_v24, %v2372_v31  ;;  %v5148_v56 = vadd.f32 %v4930_v7, %v2208_v10  ;;  %v3497_v46 = vpop.f32.mrb[30].mxu1  ;;  %v2429_v54 = vshll.u32 %v5087_v0, 16 }
 0x488   : > { %vm2257_vm2 = vcmp.ge.f32.partialorder %v2217_v32, 0.0  ;;  %v2277_v47 = vmul.f32 0.1, %v2217_v32  ;;  %2476 = vrot.lane.b32.xlu0 %v2424_v30, %s3748_s21  ;;  %v2220_v62 = vadd.f32 %v3497_v46, %v4930_v7  ;;  %v2211_v60 = vpop.f32.mrb[31].mxu1  ;;  %2474 = vrot.lane.b32.xlu1 %v5075_v4, %s3748_s21  ;;  %v2440_v23 = vshrl.u32 %v2387_v53, 16 }
 0x489   : > { %vm2255_vm11 = vcmp.ge.f32.partialorder %v5148_v56, 0.0  ;;  %v2275_v40 = vmul.f32 0.1, %v5148_v56  ;;  %v5160_v55 = vadd.f32 %v4930_v7, %v2211_v60  ;;  %v2433_v8 = vshrl.u32 %v2386_v26, 16 }
 0x48a   : > { %v2297_v14 = vsel %vm2257_vm2, %v2217_v32, %v2277_v47  ;;  %vm2258_vm15 = vcmp.ge.f32.partialorder %v2220_v62, 0.0  ;;  %v2278_v0 = vmul.f32 0.1, %v2220_v62  ;;  %v2431_v4 = vor.u32 %v2429_v54, %v2428_v39 }
 0x48b   : > { %v2295_v11 = vsel %vm2255_vm11, %v5148_v56, %v2275_v40  ;;  %vm2256_vm12 = vcmp.ge.f32.partialorder %v5160_v55, 0.0  ;;  %v2276_v49 = vmul.f32 0.1, %v5160_v55  ;;  %v2435_v25 = vrot.slane %v2433_v8, 7 }
 0x48c   : > { %v2298_v16 = vsel %vm2258_vm15, %v2220_v62, %v2278_v0  ;;  %2478 = vrot.lane.b32.xlu0 %v2421_v45, %s3748_s21  ;;  %v2436_v31 = vshll.u32 %v2386_v26, 16  ;;  %v2378_v29 = vsel %vm5166_vm0, %v2297_v14, 0.0  ;;  %2480 = vrot.lane.b32.xlu1 %v2431_v4, %s3748_s21  ;;  %v2376_v38 = vsel %vm5175_vm13, %v2295_v11, 0.0 }
 0x48d   : > { %v2379_v27 = vsel %vm5166_vm0, %v2298_v16, 0.0  ;;  %v2296_v12 = vsel %vm2256_vm12, %v5160_v55, %v2276_v49  ;;  %v2442_v30 = vrot.slane %v2440_v23, 7  ;;  %v2443_v26 = vshll.u32 %v2387_v53, 16 }
 0x48e   : > { %v2389_v24 = vpack.c.bf16 %v2379_v27, %v2378_v29  ;;  %v2377_v32 = vsel %vm5175_vm13, %v2296_v12, 0.0  ;;  %v2438_v45 = vor.u32 %v2436_v31, %v2435_v25  ;;  %v2391_v8 = vshrl.u32 %v4977_v48, 16 }
 0x48f   : > { %v2388_v10 = vpack.c.bf16 %v2377_v32, %v2376_v38  ;;  %v2445_v62 = vor.u32 %v2443_v26, %v2442_v30  ;;  %v2394_v0 = vshll.u32 %v4977_v48, 16 }
 0x490   : > { %2484 = vrot.lane.b32.xlu0 %v2438_v45, %s3748_s21  ;;  %2482 = vrot.lane.b32.xlu1 %v2428_v39, %s3748_s21  ;;  %v2454_v47 = vshrl.u32 %v2389_v24, 16  ;;  %v2457_v63 = vshll.u32 %v2389_v24, 16  ;;  %v2393_v39 = vrot.slane %v2391_v8, 7 }
 0x491   : > { %v2447_v46 = vshrl.u32 %v2388_v10, 16  ;;  %v2450_v54 = vshll.u32 %v2388_v10, 16 }
 0x492   : > { %v2456_v14 = vrot.slane %v2454_v47, 7  ;;  %v2396_v4 = vor.u32 %v2394_v0, %v2393_v39 }
 0x493   : > { %v2449_v60 = vrot.slane %v2447_v46, 7 }
 0x494   : > { %2486 = vrot.lane.b32.xlu0 %v2435_v25, %s3748_s21  ;;  %2488 = vrot.lane.b32.xlu1 %v2445_v62, %s3748_s21  ;;  %v2459_v53 = vor.u32 %v2457_v63, %v2456_v14 }
 0x495   : > { %v2452_v40 = vor.u32 %v2450_v54, %v2449_v60 }
 0x498   : > { %2492 = vrot.lane.b32.xlu0 %v2452_v40, %s3748_s21  ;;  %2490 = vrot.lane.b32.xlu1 %v2442_v30, %s3748_s21 }
 0x49c   : > { %2494 = vrot.lane.b32.xlu0 %v2449_v60, %s3748_s21  ;;  %2496 = vrot.lane.b32.xlu1 %v2459_v53, %s3748_s21 }
 0x4a0   : > { %2460 = vrot.lane.b32.xlu0 %v2396_v4, %s3748_s21  ;;  %2498 = vrot.lane.b32.xlu1 %v2456_v14, %s3748_s21 }
 0x4a4   : > { %2462 = vrot.lane.b32.xlu1 %v2393_v39, %s3748_s21 }
 0x4e6   : > { %v2467_v11 = vpop.permute.xlu0 %2466 }
 0x4e7   : > { %v2531_v7 = vsel %vm3928_vm5, %v2467_v11, 0 }
 0x4e8   : > { %v2560_v48 = vshll.u32 %v2531_v7, 16  ;;  %v2704_v16 = vrot.slane %v2531_v7, 1 }
 0x4ea   : > { %v2465_v49 = vpop.permute.xlu0 %2464  ;;  %v2562_v38 = vrot.slane %v2560_v48, 1 }
 0x4eb   : > { %v5209_v23 = vsel %vm3928_vm5, 0, %v2465_v49 }
 0x4ec   : > { %v2555_v25 = vshll.u32 %v5209_v23, 16  ;;  %v2703_v31 = vrot.slane %v5209_v23, 1  ;;  %v2553_v29 = vshrl.u32 %v5209_v23, 16 }
 0x4ee   : > { %v2557_v27 = vrot.slane %v2555_v25, 1  ;;  %v2705_v12 = vsel %vm847_vm4, %v2703_v31, %v2704_v16 }
 0x4ef   : > { %2732 = vrot.lane.b32.xlu0 %v2705_v12, %s3746_s16  ;;  %v2471_v32 = vpop.permute.xlu0 %2470 }
 0x4f0   : > { %v2558_v24 = vor.u32 %v2557_v27, %v2553_v29  ;;  %v2532_v26 = vsel %vm3928_vm5, %v2471_v32, 0 }
 0x4f1   : > { %v2707_v60 = vrot.slane %v2532_v26, 1  ;;  %v2572_v48 = vshll.u32 %v2532_v26, 16 }
 0x4f2   : > { %v2473_v45 = vpop.permute.xlu1 %2472  ;;  %v2563_v10 = vsel %vm622_vm3, %v2558_v24, %v2562_v38 }
 0x4f3   : > { %v5219_v30 = vsel %vm3928_vm5, 0, %v2473_v45  ;;  %2662 = vrot.lane.b32.xlu0 %v2563_v10, %s5684_s12 }
 0x4f4   : > { %v2579_v46 = vshll.u32 %v5219_v30, 16  ;;  %v2577_v0 = vshrl.u32 %v5219_v30, 16 }
 0x4f6   : > { %v2469_v47 = vpop.permute.xlu1 %2468  ;;  %v2581_v8 = vrot.slane %v2579_v46, 1 }
 0x4f7   : > { %v5227_v62 = vsel %vm3928_vm5, 0, %v2469_v47 }
 0x4f8   : > { %v2567_v54 = vshll.u32 %v5227_v62, 16  ;;  %v2706_v40 = vrot.slane %v5227_v62, 1  ;;  %v2582_v16 = vor.u32 %v2581_v8, %v2577_v0  ;;  %v2565_v31 = vshrl.u32 %v5227_v62, 16 }
 0x4fa   : > { %v2477_v14 = vpop.permute.xlu0 %2476  ;;  %v2475_v63 = vpop.permute.xlu1 %2474  ;;  %v2708_v39 = vsel %vm847_vm4, %v2706_v40, %v2707_v60  ;;  %v2569_v7 = vrot.slane %v2567_v54, 1  ;;  %v2574_v60 = vrot.slane %v2572_v48, 1 }
 0x4fb   : > { %v5234_v53 = vsel %vm3928_vm5, 0, %v2477_v14  ;;  %v2533_v4 = vsel %vm3928_vm5, %v2475_v63, 0  ;;  %2734 = vrot.lane.b32.xlu0 %v2708_v39, %s3746_s16 }
 0x4fc   : > { %v2591_v11 = vshll.u32 %v5234_v53, 16  ;;  %v2584_v49 = vshll.u32 %v2533_v4, 16  ;;  %v2570_v45 = vor.u32 %v2569_v7, %v2565_v31  ;;  %v2589_v10 = vshrl.u32 %v5234_v53, 16 }
 0x4fd   : > { %v2710_v63 = vrot.slane %v2533_v4, 1  ;;  %v2712_v4 = vrot.slane %v5234_v53, 1 }
 0x4fe   : > { %v2479_v25 = vpop.permute.xlu0 %2478  ;;  %v2586_v29 = vrot.slane %v2584_v49, 1  ;;  %v2593_v27 = vrot.slane %v2591_v11, 1  ;;  %v2481_v12 = vpop.permute.xlu1 %2480  ;;  %v2575_v49 = vsel %vm622_vm3, %v2570_v45, %v2574_v60 }
 0x4ff   : > { %v2534_v38 = vsel %vm3928_vm5, %v2479_v25, 0  ;;  %v5246_v24 = vsel %vm3928_vm5, 0, %v2481_v12 }
 0x500   : > { %v2596_v32 = vshll.u32 %v2534_v38, 16  ;;  %v2587_v26 = vsel %vm622_vm3, %v2582_v16, %v2586_v29  ;;  %v2594_v54 = vor.u32 %v2593_v27, %v2589_v10  ;;  %v2603_v40 = vshll.u32 %v5246_v24, 16 }
 0x501   : > { %2666 = vrot.lane.b32.xlu1 %v2587_v26, %s5684_s12  ;;  %v2713_v11 = vrot.slane %v2534_v38, 1  ;;  %v2709_v16 = vrot.slane %v5219_v30, 1  ;;  %v2601_v10 = vshrl.u32 %v5246_v24, 16 }
 0x502   : > { %v2598_v46 = vrot.slane %v2596_v32, 1  ;;  %v2485_v47 = vpop.permute.xlu0 %2484  ;;  %v2483_v8 = vpop.permute.xlu1 %2482  ;;  %v2605_v31 = vrot.slane %v2603_v40, 1 }
 0x503   : > { %v5254_v14 = vsel %vm3928_vm5, 0, %v2485_v47  ;;  %v2535_v39 = vsel %vm3928_vm5, %v2483_v8, 0  ;;  %v2711_v45 = vsel %vm847_vm4, %v2709_v16, %v2710_v63  ;;  %v2714_v47 = vsel %vm847_vm4, %v2712_v4, %v2713_v11 }
 0x504   : > { %v2615_v0 = vshll.u32 %v5254_v14, 16  ;;  %v2608_v7 = vshll.u32 %v2535_v39, 16  ;;  %v2599_v48 = vsel %vm622_vm3, %v2594_v54, %v2598_v46  ;;  %v2613_v46 = vshrl.u32 %v5254_v14, 16 }
 0x505   : > { %2664 = vrot.lane.b32.xlu1 %v2575_v49, %s5684_s12  ;;  %2668 = vrot.lane.b32.xlu0 %v2599_v48, %s5684_s12  ;;  %v2606_v40 = vor.u32 %v2605_v31, %v2601_v10 }
 0x506   : > { %v2487_v25 = vpop.permute.xlu0 %2486  ;;  %v2617_v29 = vrot.slane %v2615_v0, 1  ;;  %v2489_v27 = vpop.permute.xlu1 %2488  ;;  %v2610_v26 = vrot.slane %v2608_v7, 1  ;;  %v2716_v7 = vrot.slane %v2535_v39, 1  ;;  %v2718_v39 = vrot.slane %v5254_v14, 1 }
 0x507   : > { %v2536_v12 = vsel %vm3928_vm5, %v2487_v25, 0  ;;  %v5269_v38 = vsel %vm3928_vm5, 0, %v2489_v27 }
 0x508   : > { %v2620_v32 = vshll.u32 %v2536_v12, 16  ;;  %v2618_v8 = vor.u32 %v2617_v29, %v2613_v46  ;;  %v2627_v0 = vshll.u32 %v5269_v38, 16  ;;  %v2719_v16 = vrot.slane %v2536_v12, 1 }
 0x509   : > { %2736 = vrot.lane.b32.xlu1 %v2711_v45, %s3746_s16  ;;  %2738 = vrot.lane.b32.xlu0 %v2714_v47, %s3746_s16  ;;  %v2611_v4 = vsel %vm622_vm3, %v2606_v40, %v2610_v26  ;;  %v2715_v29 = vrot.slane %v5246_v24, 1 }
 0x50a   : > { %v2622_v60 = vrot.slane %v2620_v32, 1  ;;  %v2493_v54 = vpop.permute.xlu0 %2492  ;;  %v2491_v49 = vpop.permute.xlu1 %2490  ;;  %v2629_v32 = vrot.slane %v2627_v0, 1 }
 0x50b   : > { %v5280_v63 = vsel %vm3928_vm5, 0, %v2493_v54  ;;  %v2537_v48 = vsel %vm3928_vm5, %v2491_v49, 0  ;;  %v2717_v47 = vsel %vm847_vm4, %v2715_v29, %v2716_v7 }
 0x50c   : > { %v2639_v11 = vshll.u32 %v5280_v63, 16  ;;  %v2632_v25 = vshll.u32 %v2537_v48, 16  ;;  %v2623_v31 = vsel %vm622_vm3, %v2618_v8, %v2622_v60  ;;  %v2625_v60 = vshrl.u32 %v5269_v38, 16 }
 0x50d   : > { %2670 = vrot.lane.b32.xlu1 %v2611_v4, %s5684_s12  ;;  %2672 = vrot.lane.b32.xlu0 %v2623_v31, %s5684_s12  ;;  %v2637_v40 = vshrl.u32 %v5280_v63, 16  ;;  %v2720_v8 = vsel %vm847_vm4, %v2718_v39, %v2719_v16 }
 0x50e   : > { %v2495_v27 = vpop.permute.xlu0 %2494  ;;  %v2641_v45 = vrot.slane %v2639_v11, 1  ;;  %v2497_v10 = vpop.permute.xlu1 %2496  ;;  %v2634_v54 = vrot.slane %v2632_v25, 1  ;;  %v2630_v11 = vor.u32 %v2629_v32, %v2625_v60  ;;  %v2722_v25 = vrot.slane %v2537_v48, 1 }
 0x50f   : > { %v2538_v12 = vsel %vm3928_vm5, %v2495_v27, 0  ;;  %v5295_v26 = vsel %vm3928_vm5, 0, %v2497_v10  ;;  %v2724_v48 = vrot.slane %v5280_v63, 1 }
 0x510   : > { %v2644_v46 = vshll.u32 %v2538_v12, 16  ;;  %v2642_v4 = vor.u32 %v2641_v45, %v2637_v40  ;;  %v2651_v31 = vshll.u32 %v5295_v26, 16  ;;  %v2725_v39 = vrot.slane %v2538_v12, 1 }
 0x511   : > { %2740 = vrot.lane.b32.xlu1 %v2717_v47, %s3746_s16  ;;  %2742 = vrot.lane.b32.xlu0 %v2720_v8, %s3746_s16  ;;  %v2721_v45 = vrot.slane %v5269_v38, 1  ;;  %v2649_v12 = vshrl.u32 %v5295_v26, 16  ;;  %v2727_v33 = vrot.slane %v5295_v26, 1 }
 0x512   : > { %v2646_v0 = vrot.slane %v2644_v46, 1  ;;  %v2461_v49 = vpop.permute.xlu0 %2460  ;;  %v2499_v27 = vpop.permute.xlu1 %2498  ;;  %v2635_v46 = vsel %vm622_vm3, %v2630_v11, %v2634_v54  ;;  %v2653_v60 = vrot.slane %v2651_v31, 1 }
 0x513   : > { %v5306_v7 = vsel %vm3928_vm5, 0, %v2461_v49  ;;  %v2539_v29 = vsel %vm3928_vm5, %v2499_v27, 0  ;;  %v2726_v27 = vsel %vm847_vm4, %v2724_v48, %v2725_v39  ;;  %v3642_v48 = vld [vmem:[%s5672_s5 + $0x18] sm:$0xff]  }
 0x514   : > { %v2543_v16 = vshll.u32 %v5306_v7, 16  ;;  %v2656_v10 = vshll.u32 %v2539_v29, 16  ;;  %v2647_v32 = vsel %vm622_vm3, %v2642_v4, %v2646_v0  ;;  %v2541_v40 = vshrl.u32 %v5306_v7, 16 }
 0x515   : > { %2674 = vrot.lane.b32.xlu1 %v2635_v46, %s5684_s12  ;;  %2676 = vrot.lane.b32.xlu0 %v2647_v32, %s5684_s12  ;;  %v2723_v0 = vsel %vm847_vm4, %v2721_v45, %v2722_v25  ;;  %v2654_v31 = vor.u32 %v2653_v60, %v2649_v12  ;;  %v2728_v46 = vrot.slane %v2539_v29, 1  ;;  %v3639_v29 = vld [vmem:[%s5672_s5] sm:$0xff]  }
 0x516   : > { %v2545_v47 = vrot.slane %v2543_v16, 1  ;;  %v2463_v8 = vpop.permute.xlu1 %2462  ;;  %v2658_v49 = vrot.slane %v2656_v10, 1  ;;  %v2700_v10 = vrot.slane %v5306_v7, 1  ;;  %3498 = vmatprep.subr.bf16.mxu0 %v3639_v29 }
 0x517   : > { %v2530_v54 = vsel %vm3928_vm5, %v2463_v8, 0  ;;  %v2729_v39 = vsel %vm847_vm4, %v2727_v33, %v2728_v46  ;;  %3499 = vmatpush3.bf16.msra.mxu0 %v3639_v29  ;;  %vm5760_vm5 = vcmask 1043456  }
 0x518   : > { %v2546_v11 = vor.u32 %v2545_v47, %v2541_v40  ;;  %v2548_v4 = vshll.u32 %v2530_v54, 16  ;;  %v2659_v32 = vsel %vm622_vm3, %v2654_v31, %v2658_v49  ;;  %v2701_v25 = vrot.slane %v2530_v54, 1  ;;  %v3641_v47 = vld [vmem:[%s5672_s5 + $0x10] sm:$0xff]   ;;  %v3643_v54 = vld [vmem:[%s5672_s5 + $0x20] ss:$0 sps:$4 sm:$0xff]   ;;  %vm5761_vm9 = vmmov %vm5760_vm5 }
 0x519   : > { %2744 = vrot.lane.b32.xlu1 %v2723_v0, %s3746_s16  ;;  %2746 = vrot.lane.b32.xlu0 %v2726_v27, %s3746_s16  ;;  %v2923_v0 = vsel %vm5761_vm9, %v3643_v54, 0 }
 0x51a   : > { %v2550_v16 = vrot.slane %v2548_v4, 1  ;;  %v2702_v45 = vsel %vm847_vm4, %v2700_v10, %v2701_v25  ;;  %vm5759_vm4 = vcmask 130048  }
 0x51b   : > { %vm5763_vm8 = vmmov %vm5759_vm4 }
 0x51c   : > { %v2551_v37 = vsel %vm622_vm3, %v2546_v11, %v2550_v16  ;;  %vm5758_vm3 = vcmask 64512   ;;  %vm5766_vm7 = vmmov %vm5759_vm4 }
 0x51d   : > { %2678 = vrot.lane.b32.xlu1 %v2659_v32, %s5684_s12  ;;  %2660 = vrot.lane.b32.xlu0 %v2551_v37, %s5684_s12  ;;  %v3640_v37 = vld [vmem:[%s5672_s5 + $0x8] sm:$0xff]   ;;  %vm5762_vm6 = vmmov %vm5758_vm3  ;;  %s5764_s12 = smov 48  }
 0x51e   : > { %3500 = vmatprep.subr.bf16.mxu0 %v3640_v37  ;;  %vm5765_vm1 = vmmov %vm5758_vm3 }
 0x51f   : > { %3501 = vmatpush3.bf16.msra.mxu0 %v3640_v37  ;;  %vm5767_vm14 = vmmov %vm5765_vm1 }
 0x520   : > { %3502 = vmatprep.subr.bf16.mxu0 %v3641_v47  ;;  %vm5768_vm10 = vmmov %vm5759_vm4 }
 0x521   : > { %2748 = vrot.lane.b32.xlu1 %v2729_v39, %s3746_s16  ;;  %vm5769_vm2 = vmmov %vm5765_vm1 }
 0x522   : > { %vm5770_vm11 = vmmov %vm5759_vm4 }
 0x523   : > { %3503 = vmatpush3.bf16.msra.mxu0 %v3641_v47  ;;  %vm5771_vm0 = vmmov %vm5765_vm1 }
 0x524   : > { %3504 = vmatprep.subr.bf16.mxu0 %v3642_v48  ;;  %vm5772_vm15 = vmmov %vm5759_vm4 }
 0x525   : > { %2730 = vrot.lane.b32.xlu1 %v2702_v45, %s3746_s16  ;;  %vm5773_vm13 = vmmov %vm5771_vm0 }
 0x526   : > { %vm5774_vm12 = vmmov %vm5759_vm4 }
 0x527   : > { %3505 = vmatpush3.bf16.msra.mxu0 %v3642_v48  ;;  %vm5777_vm9 = vmmov %vm5759_vm4 }
 0x528   : > { %3533 = vmatprep.subr.msk.bf16.mxu0 %vm5760_vm5, %v3643_v54  ;;  %vm5776_vm5 = vmmov %vm5771_vm0 }
 0x52b   : > { %3507 = vmatpush3.bf16.msra.mxu0 %v2923_v0 }
 0x561   : > { %v2733_v60 = vpop.permute.xlu0 %2732 }
 0x565   : > { %v2663_v40 = vpop.permute.xlu0 %2662 }
 0x566   : > { %v2753_v8 = vsel %vm5758_vm3, %v5209_v23, %v2663_v40  ;;  %vm5775_vm3 = vmmov %vm5771_vm0 }
 0x567   : > { %v5350_v12 = vsel %vm5759_vm4, %v2753_v8, %v2733_v60 }
 0x568   : > { %2798 = vrot.lane.b32.xlu0 %v5350_v12, %s3744_s18 }
 0x56d   : > { %v2735_v49 = vpop.permute.xlu0 %2734 }
 0x573   : > { %v2667_v11 = vpop.permute.xlu1 %2666 }
 0x574   : > { %v2757_v16 = vsel %vm5765_vm1, %v5219_v30, %v2667_v11  ;;  %vm5780_vm1 = vcmask 195584  }
 0x577   : > { %v2665_v4 = vpop.permute.xlu1 %2664  ;;  %v2669_v23 = vpop.permute.xlu0 %2668 }
 0x578   : > { %v2755_v27 = vsel %vm5762_vm6, %v5227_v62, %v2665_v4  ;;  %v2759_v39 = vsel %vm5767_vm14, %v5234_v53, %v2669_v23  ;;  %v2223_v23 = vmax.f32 %v4934_v36, 0.0  ;;  %v2229_v36 = vmax.f32 %v5036_v15, 0.0  ;;  %vm5778_vm6 = vmmov %vm5771_vm0 }
 0x579   : > { %v5362_v31 = vsel %vm5763_vm8, %v2755_v27, %v2735_v49  ;;  %v2224_v27 = vmax.f32 %v4943_v34, 0.0  ;;  %v2231_v34 = vmax.f32 %v5027_v44, 0.0  ;;  %v2234_v15 = vmax.f32 %v5118_v3, 0.0  ;;  %vm5779_vm8 = vmmov %vm5759_vm4 }
 0x57a   : > { %2815 = vrot.lane.b32.xlu0 %v5362_v31, %s5764_s12  ;;  %2800 = vrot.lane.b32.xlu1 %v5362_v31, %s3744_s18  ;;  %v2237_v44 = vmax.f32 %v5148_v56, 0.0  ;;  %vm5782_vm14 = vcmask 588800  }
 0x57b   : > { %v2737_v46 = vpop.permute.xlu1 %2736  ;;  %v2739_v32 = vpop.permute.xlu0 %2738 }
 0x57c   : > { %v5371_v33 = vsel %vm5766_vm7, %v2757_v16, %v2737_v46  ;;  %v5380_v10 = vsel %vm5768_vm10, %v2759_v39, %v2739_v32  ;;  %v2227_v16 = vmax.f32 %v4975_v2, 0.0  ;;  %v2228_v46 = vmax.f32 %v4986_v20, 0.0  ;;  %vm5783_vm10 = vmmov %vm5780_vm1 }
 0x57d   : > { %v2233_v2 = vmax.f32 %v5097_v57, 0.0  ;;  %v2235_v20 = vmax.f32 %v5093_v19, 0.0  ;;  %vm5781_vm7 = vcmask 392192  }
 0x57e   : > { %2802 = vrot.lane.b32.xlu0 %v5371_v33, %s3744_s18  ;;  %2817 = vrot.lane.b32.xlu1 %v5371_v33, %s5764_s12 }
 0x57f   : > { %v2671_v62 = vpop.permute.xlu1 %2670  ;;  %v2673_v25 = vpop.permute.xlu0 %2672 }
 0x580   : > { %v2761_v30 = vsel %vm5769_vm2, %v5246_v24, %v2671_v62  ;;  %v2763_v47 = vsel %vm5771_vm0, %v5254_v14, %v2673_v25  ;;  %vm5784_vm2 = vmmov %vm5781_vm7 }
 0x581   : > { %vm5786_vm0 = vmmov %vm5780_vm1 }
 0x582   : > { %2819 = vrot.lane.b32.xlu0 %v5380_v10, %s5764_s12  ;;  %2804 = vrot.lane.b32.xlu1 %v5380_v10, %s3744_s18 }
 0x583   : > { %v2741_v45 = vpop.permute.xlu1 %2740  ;;  %v2743_v29 = vpop.permute.xlu0 %2742 }
 0x584   : > { %v5389_v37 = vsel %vm5770_vm11, %v2761_v30, %v2741_v45  ;;  %v5398_v60 = vsel %vm5772_vm15, %v2763_v47, %v2743_v29  ;;  %vm5785_vm11 = vmmov %vm5782_vm14 }
 0x585   : > { %vm5787_vm15 = vmmov %vm5784_vm2 }
 0x586   : > { %2806 = vrot.lane.b32.xlu0 %v5389_v37, %s3744_s18  ;;  %2821 = vrot.lane.b32.xlu1 %v5389_v37, %s5764_s12 }
 0x587   : > { %v2675_v53 = vpop.permute.xlu1 %2674  ;;  %v2677_v48 = vpop.permute.xlu0 %2676 }
 0x588   : > { %v2765_v24 = vsel %vm5773_vm13, %v5269_v38, %v2675_v53  ;;  %v2767_v0 = vsel %vm5775_vm3, %v5280_v63, %v2677_v48  ;;  %v2225_v63 = vmax.f32 %v4980_v5, 0.0  ;;  %v2230_v5 = vmax.f32 %v5049_v1, 0.0  ;;  %vm5788_vm13 = vmmov %vm5785_vm11 }
 0x589   : > { %v2236_v1 = vmax.f32 %v5103_v42, 0.0  ;;  %vm5790_vm3 = vmmov %vm5784_vm2 }
 0x58a   : > { %2823 = vrot.lane.b32.xlu0 %v5398_v60, %s5764_s12  ;;  %2808 = vrot.lane.b32.xlu1 %v5398_v60, %s3744_s18 }
 0x58b   : > { %v2745_v40 = vpop.permute.xlu1 %2744  ;;  %v2747_v54 = vpop.permute.xlu0 %2746 }
 0x58c   : > { %v5407_v8 = vsel %vm5774_vm12, %v2765_v24, %v2745_v40  ;;  %v2787_v49 = vsel %vm5759_vm4, %v2767_v0, %v2747_v54  ;;  %vm5789_vm12 = vmmov %vm5786_vm0 }
 0x58d   : > { %vm5791_vm4 = vmmov %vm5785_vm11 }
 0x58e   : > { %2810 = vrot.lane.b32.xlu0 %v5407_v8, %s3744_s18  ;;  %2825 = vrot.lane.b32.xlu1 %v5407_v8, %s5764_s12 }
 0x58f   : > { %v2679_v14 = vpop.permute.xlu1 %2678  ;;  %v2661_v57 = vpop.permute.xlu0 %2660 }
 0x590   : > { %v2769_v38 = vsel %vm5776_vm5, %v5295_v26, %v2679_v14  ;;  %v2226_v26 = vmax.f32 %v5004_v18, 0.0  ;;  %v2232_v18 = vmax.f32 %v5043_v13, 0.0  ;;  %v2238_v13 = vmax.f32 %v5160_v55, 0.0  ;;  %vm5792_vm5 = vmmov %vm5786_vm0 }
 0x591   : > { %v2751_v3 = vsel %vm5778_vm6, %v5306_v7, %v2661_v57  ;;  %vm5794_vm6 = vmmov %vm5791_vm4 }
 0x592   : > { %2827 = vrot.lane.b32.xlu0 %v2787_v49, %s5764_s12  ;;  %2812 = vrot.lane.b32.xlu1 %v2787_v49, %s3744_s18 }
 0x593   : > { %v2749_v11 = vpop.permute.xlu1 %2748 }
 0x594   : > { %v2789_v4 = vsel %vm5777_vm9, %v2769_v38, %v2749_v11  ;;  %vm5793_vm9 = vmmov %vm5784_vm2 }
 0x596   : > { %3054 = vrot.lane.b32.xlu0 %v2223_v23, %s3746_s16  ;;  %2829 = vrot.lane.b32.xlu1 %v2789_v4, %s5764_s12  ;;  %s5614_s12 = scalar_lea.sflag [#allocation4], %s5837_s9 }
 0x597   : > { %v2731_v19 = vpop.permute.xlu1 %2730 }
 0x598   : > { %v2771_v62 = vsel %vm5779_vm8, %v2751_v3, %v2731_v19  ;;  %vm5795_vm8 = vmmov %vm5786_vm0 }
 0x59a   : > { %3058 = vrot.lane.b32.xlu0 %v2225_v63, %s3746_s16  ;;  %3056 = vrot.lane.b32.xlu1 %v2224_v27, %s3746_s16 }
 0x59e   : > { %3062 = vrot.lane.b32.xlu0 %v2227_v16, %s3746_s16  ;;  %3060 = vrot.lane.b32.xlu1 %v2226_v26, %s3746_s16 }
 0x5a2   : > { %3066 = vrot.lane.b32.xlu0 %v2229_v36, %s3746_s16  ;;  %3064 = vrot.lane.b32.xlu1 %v2228_v46, %s3746_s16  ;;  %v3371_v36 = vld [vmem:[%s5673_s6] ss:$0 sm:$0xff] }
 0x5a6   : > { %3070 = vrot.lane.b32.xlu0 %v2231_v34, %s3746_s16  ;;  %3068 = vrot.lane.b32.xlu1 %v2230_v5, %s3746_s16 }
 0x5aa   : > { %3074 = vrot.lane.b32.xlu0 %v2233_v2, %s3746_s16  ;;  %3072 = vrot.lane.b32.xlu1 %v2232_v18, %s3746_s16 }
 0x5ae   : > { %3078 = vrot.lane.b32.xlu0 %v2235_v20, %s3746_s16  ;;  %3076 = vrot.lane.b32.xlu1 %v2234_v15, %s3746_s16 }
 0x5b2   : > { %3082 = vrot.lane.b32.xlu0 %v2237_v44, %s3746_s16  ;;  %3080 = vrot.lane.b32.xlu1 %v2236_v1, %s3746_s16 }
 0x5b6   : > { %3084 = vrot.lane.b32.xlu1 %v2238_v13, %s3746_s16 }
 0x5da   : > { %v2799_v32 = vpop.permute.xlu0 %2798 }
 0x5db   : > { %v2832_v56 = vsel %vm5780_vm1, %v2771_v62, %v2799_v32  ;;  %vm5796_vm1 = vmmov %vm5784_vm2 }
 0x5ec   : > { %v2801_v25 = vpop.permute.xlu1 %2800  ;;  %v2816_v42 = vpop.permute.xlu0 %2815 }
 0x5ed   : > { %v2848_v39 = vsel %vm5781_vm7, %v2832_v56, %v2816_v42  ;;  %v2834_v55 = vsel %vm5783_vm10, %v5350_v12, %v2801_v25  ;;  %vm5797_vm7 = vmmov %vm5791_vm4 }
 0x5ee   : > { %3508 = vmatprep.mubr.msk.bf16.mxu0 %vm5782_vm14, %v2848_v39  ;;  %vm5798_vm14 = vmmov %vm5786_vm0 }
 0x5ef   : > { %vm5799_vm10 = vmmov %vm5796_vm1 }
 0x5f0   : > { %v2818_v30 = vpop.permute.xlu1 %2817  ;;  %v2803_v45 = vpop.permute.xlu0 %2802 }
 0x5f1   : > { %v2850_v29 = vsel %vm5784_vm2, %v2834_v55, %v2818_v30  ;;  %v2836_v7 = vsel %vm5786_vm0, %v5362_v31, %v2803_v45  ;;  %vm5800_vm2 = vmmov %vm5791_vm4 }
 0x5f2   : > { %3509 = vmatmul.mubr.msk.bf16.vlgmr.msra.gmra.mrb[12].mxu0 %vm5785_vm11, %v2850_v29  ;;  %vm5801_vm11 = vmmov %vm5786_vm0 }
 0x5f3   : > { %vm5802_vm0 = vmmov %vm5796_vm1 }
 0x5f4   : > { %v2805_v53 = vpop.permute.xlu1 %2804  ;;  %v2820_v47 = vpop.permute.xlu0 %2819 }
 0x5f5   : > { %v2852_v48 = vsel %vm5787_vm15, %v2836_v7, %v2820_v47  ;;  %v2838_v24 = vsel %vm5789_vm12, %v5371_v33, %v2805_v53  ;;  %vm5803_vm15 = vmmov %vm5800_vm2  ;;  %vm5804_vm12 = vcmask 130048  }
 0x5f6   : > { %3512 = vmatprep.mubr.msk.bf16.mxu0 %vm5788_vm13, %v2852_v48  ;;  %vm3198_vm13 = vcmask 261120  }
 0x5f8   : > { %v2822_v40 = vpop.permute.xlu1 %2821  ;;  %v2807_v12 = vpop.permute.xlu0 %2806 }
 0x5f9   : > { %v2854_v54 = vsel %vm5790_vm3, %v2838_v24, %v2822_v40  ;;  %v2840_v14 = vsel %vm5792_vm5, %v5380_v10, %v2807_v12  ;;  %vm5805_vm3 = vmmov %vm5792_vm5 }
 0x5fa   : > { %3513 = vmatmul.mubr.msk.bf16.gmra.mrb[16].mxu0 %vm5791_vm4, %v2854_v54  ;;  %vm5806_vm4 = vmmov %vm5804_vm12 }
 0x5fb   : > { %vm5807_vm5 = vmmov %vm5805_vm3 }
 0x5fc   : > { %v2809_v0 = vpop.permute.xlu1 %2808  ;;  %v2824_v31 = vpop.permute.xlu0 %2823 }
 0x5fd   : > { %v2856_v49 = vsel %vm5793_vm9, %v2840_v14, %v2824_v31  ;;  %v2842_v38 = vsel %vm5795_vm8, %v5389_v37, %v2809_v0  ;;  %vm5808_vm9 = vmmov %vm5806_vm4 }
 0x5fe   : > { %3516 = vmatprep.mubr.msk.bf16.mxu0 %vm5794_vm6, %v2856_v49  ;;  %vm5809_vm6 = vmmov %vm5805_vm3 }
 0x5ff   : > { %vm5810_vm8 = vmmov %vm5806_vm4 }
 0x600   : > { %v2826_v11 = vpop.permute.xlu1 %2825  ;;  %v2811_v33 = vpop.permute.xlu0 %2810 }
 0x601   : > { %v2858_v4 = vsel %vm5796_vm1, %v2842_v38, %v2826_v11  ;;  %v2844_v23 = vsel %vm5798_vm14, %v5398_v60, %v2811_v33  ;;  %vm5811_vm1 = vmmov %vm5805_vm3 }
 0x602   : > { %3517 = vmatmul.mubr.msk.bf16.gmra.mrb[20].mxu0 %vm5797_vm7, %v2858_v4  ;;  %vm5812_vm7 = vmmov %vm5806_vm4 }
 0x603   : > { %vm5813_vm14 = vmmov %vm5811_vm1 }
 0x604   : > { %v2813_v63 = vpop.permute.xlu1 %2812  ;;  %v2828_v10 = vpop.permute.xlu0 %2827 }
 0x605   : > { %v2860_v27 = vsel %vm5799_vm10, %v2844_v23, %v2828_v10  ;;  %v2846_v16 = vsel %vm5801_vm11, %v5407_v8, %v2813_v63  ;;  %vm5814_vm10 = vmmov %vm5806_vm4 }
 0x606   : > { %3520 = vmatprep.mubr.msk.bf16.mxu0 %vm5800_vm2, %v2860_v27  ;;  %vm5815_vm2 = vmmov %vm5811_vm1 }
 0x607   : > { %vm5816_vm11 = vmmov %vm5806_vm4 }
 0x608   : > { %v2830_v26 = vpop.permute.xlu1 %2829 }
 0x609   : > { %v2862_v37 = vsel %vm5802_vm0, %v2846_v16, %v2830_v26  ;;  %vm5817_vm0 = vmmov %vm5811_vm1 }
 0x60a   : > { %3521 = vmatmul.mubr.msk.bf16.gmra.mrb[24].mxu0 %vm5803_vm15, %v2862_v37  ;;  %vm5818_vm15 = vmmov %vm5806_vm4 }
 0x6c5   : > { %v3510_v46 = vpop.f32.mrb[12].mxu0 }
 0x6c6   : > { %v2968_v60 = vadd.f32 %v3510_v46, %v3371_v36  ;;  %v2959_v34 = vpop.f32.mrb[13].mxu0  ;;  %v3055_v46 = vpop.permute.xlu0 %3054 }
 0x6c7   : > { %v3511_v5 = vpop.f32.mrb[14].mxu0  ;;  %v2960_v18 = vadd.f32 %v3371_v36, %v2959_v34 }
 0x6c8   : > { %v3024_v2 = vmax.f32 %v2968_v60, 0.0  ;;  %v2971_v20 = vadd.f32 %v3511_v5, %v3371_v36  ;;  %v2962_v15 = vpop.f32.mrb[15].mxu0  ;;  %v3057_v60 = vpop.permute.xlu1 %3056 }
 0x6c9   : > { %v2963_v1 = vadd.f32 %v3371_v36, %v2962_v15  ;;  %v3022_v8 = vmax.f32 %v2960_v18, 0.0 }
 0x6ca   : > { %v3025_v44 = vmax.f32 %v2971_v20, 0.0  ;;  %3122 = vrot.lane.b32.xlu0 %v3024_v2, %s3744_s18  ;;  %v3059_v34 = vpop.permute.xlu0 %3058 }
 0x6cb   : > { %v3023_v57 = vmax.f32 %v2963_v1, 0.0 }
 0x6cc   : > { %3124 = vrot.lane.b32.xlu1 %v3025_v44, %s3744_s18  ;;  %v3061_v5 = vpop.permute.xlu1 %3060 }
 0x6cd   : > { %v3514_v13 = vpop.f32.mrb[16].mxu0 }
 0x6ce   : > { %v2984_v19 = vadd.f32 %v3514_v13, %v3371_v36  ;;  %3118 = vrot.lane.b32.xlu0 %v3022_v8, %s3744_s18  ;;  %v2975_v32 = vpop.f32.mrb[17].mxu0  ;;  %v3063_v2 = vpop.permute.xlu0 %3062 }
 0x6cf   : > { %v3515_v3 = vpop.f32.mrb[18].mxu0  ;;  %v2976_v56 = vadd.f32 %v3371_v36, %v2975_v32  ;;  %v1274_v32 = vmax.f32 %v4344_v43, 0.0 }
 0x6d0   : > { %v3028_v62 = vmax.f32 %v2984_v19, 0.0  ;;  %v2987_v25 = vadd.f32 %v3515_v3, %v3371_v36  ;;  %3120 = vrot.lane.b32.xlu1 %v3023_v57, %s3744_s18  ;;  %v2978_v42 = vpop.f32.mrb[19].mxu0  ;;  %v3065_v18 = vpop.permute.xlu1 %3064 }
 0x6d1   : > { %v2979_v55 = vadd.f32 %v3371_v36, %v2978_v42  ;;  %v3026_v30 = vmax.f32 %v2976_v56, 0.0  ;;  %v1275_v56 = vmax.f32 %v4355_v52, 0.0 }
 0x6d2   : > { %v3029_v39 = vmax.f32 %v2987_v25, 0.0  ;;  %3130 = vrot.lane.b32.xlu0 %v3028_v62, %s3744_s18  ;;  %v3067_v20 = vpop.permute.xlu0 %3066  ;;  %v3168_v62 = vsel %vm5804_vm12, %v1274_v32, %v3059_v34  ;;  %vm5819_vm12 = vmmov %vm5817_vm0 }
 0x6d3   : > { %v3027_v29 = vmax.f32 %v2979_v55, 0.0  ;;  %v3169_v55 = vsel %vm5806_vm4, %v1275_v56, %v3061_v5  ;;  %v1284_v5 = vmax.f32 %v4523_v28, 0.0  ;;  %v1286_v28 = vmax.f32 %v4516_v22, 0.0 }
 0x6d4   : > { %3132 = vrot.lane.b32.xlu1 %v3029_v39, %s3744_s18  ;;  %v3069_v15 = vpop.permute.xlu1 %3068  ;;  %v1272_v39 = vmax.f32 %v4349_v50, 0.0 }
 0x6d5   : > { %v3518_v45 = vpop.f32.mrb[20].mxu0 }
 0x6d6   : > { %v3000_v7 = vadd.f32 %v3518_v45, %v3371_v36  ;;  %3126 = vrot.lane.b32.xlu0 %v3026_v30, %s3744_s18  ;;  %v2991_v53 = vpop.f32.mrb[21].mxu0  ;;  %v3166_v45 = vsel %vm5808_vm9, %v1272_v39, %v3055_v46  ;;  %vm5823_vm9 = vmmov %vm5817_vm0 }
 0x6d7   : > { %v3519_v47 = vpop.f32.mrb[22].mxu0  ;;  %v2992_v24 = vadd.f32 %v3371_v36, %v2991_v53  ;;  %v1278_v53 = vmax.f32 %v4396_v6, 0.0 }
 0x6d8   : > { %v3032_v48 = vmax.f32 %v3000_v7, 0.0  ;;  %v3003_v40 = vadd.f32 %v3519_v47, %v3371_v36  ;;  %3128 = vrot.lane.b32.xlu1 %v3027_v29, %s3744_s18  ;;  %v2994_v12 = vpop.f32.mrb[23].mxu0  ;;  %v5507_v44 = vpop.permute.xlu1 %3072  ;;  %v1273_v29 = vmax.f32 %v4362_v59, 0.0  ;;  %v1279_v59 = vmax.f32 %v4416_v17, 0.0 }
 0x6d9   : > { %v2995_v14 = vadd.f32 %v3371_v36, %v2994_v12  ;;  %v3030_v0 = vmax.f32 %v2992_v24, 0.0  ;;  %v3172_v24 = vsel %vm5812_vm7, %v1278_v53, %v3067_v20  ;;  %v1277_v17 = vmax.f32 %v4422_v21, 0.0  ;;  %vm5827_vm7 = vmmov %vm5817_vm0 }
 0x6da   : > { %v3033_v54 = vmax.f32 %v3003_v40, 0.0  ;;  %3138 = vrot.lane.b32.xlu0 %v3032_v48, %s3744_s18  ;;  %v3167_v50 = vsel %vm5810_vm8, %v1273_v29, %v3057_v60  ;;  %v3173_v6 = vsel %vm5814_vm10, %v1279_v59, %v3069_v15  ;;  %v1283_v21 = vmax.f32 %v4477_v58, 0.0  ;;  %vm5825_vm8 = vmmov %vm5817_vm0 }
 0x6db   : > { %v3031_v49 = vmax.f32 %v2995_v14, 0.0  ;;  %v1281_v58 = vmax.f32 %v4482_v61, 0.0  ;;  %vm5829_vm10 = vmmov %vm5817_vm0 }
 0x6dc   : > { %3140 = vrot.lane.b32.xlu1 %v3033_v54, %s3744_s18  ;;  %v3077_v8 = vpop.permute.xlu1 %3076  ;;  %v1276_v54 = vmax.f32 %v4403_v9, 0.0  ;;  %v3171_v9 = vsel %vm5818_vm15, %v1277_v17, %v3065_v18  ;;  %v1285_v18 = vmax.f32 %v4538_v41, 0.0 }
 0x6dd   : > { %v3522_v31 = vpop.f32.mrb[24].mxu0 }
 0x6de   : > { %3134 = vrot.lane.b32.xlu0 %v3030_v0, %s3744_s18  ;;  %v3007_v38 = vpop.f32.mrb[25].mxu0  ;;  %v3016_v23 = vadd.f32 %v3522_v31, %v3371_v36  ;;  %v3170_v31 = vsel %vm5816_vm11, %v1276_v54, %v3063_v2  ;;  %vm5831_vm11 = vmmov %vm5817_vm0 }
 0x6df   : > { %v3008_v11 = vadd.f32 %v3371_v36, %v3007_v38  ;;  %v3523_v33 = vpop.f32.mrb[26].mxu0 }
 0x6e0   : > { %3136 = vrot.lane.b32.xlu1 %v3031_v49, %s3744_s18  ;;  %v3010_v4 = vpop.f32.mrb[27].mxu0  ;;  %v3019_v27 = vadd.f32 %v3523_v33, %v3371_v36  ;;  %v3036_v26 = vmax.f32 %v3016_v23, 0.0  ;;  %v5511_v57 = vpop.permute.xlu1 %3080 }
 0x6e1   : > { %v3034_v63 = vmax.f32 %v3008_v11, 0.0  ;;  %v3011_v10 = vadd.f32 %v3371_v36, %v3010_v4  ;;  %v3071_v36 = vpop.permute.xlu0 %3070  ;;  %v1282_v11 = vmax.f32 %v4456_v35, 0.0  ;;  %v1280_v35 = vmax.f32 %v4466_v51, 0.0 }
 0x6e2   : > { %v3037_v37 = vmax.f32 %v3019_v27, 0.0 }
 0x6e3   : > { %v3035_v16 = vmax.f32 %v3011_v10, 0.0  ;;  %3142 = vrot.lane.b32.xlu0 %v3034_v63, %s3744_s18 }
 0x6e4   : > { %v5516_v3 = vpop.permute.xlu1 %3084 }
 0x6e5   : > { %3144 = vrot.lane.b32.xlu1 %v3035_v16, %s3744_s18  ;;  %v3075_v1 = vpop.permute.xlu0 %3074 }
 0x6e7   : > { %3146 = vrot.lane.b32.xlu0 %v3036_v26, %s3744_s18 }
 0x6e9   : > { %3148 = vrot.lane.b32.xlu1 %v3037_v37, %s3744_s18  ;;  %v5509_v13 = vpop.permute.xlu0 %3078  ;;  %s3394_s18 = sshll.u32 %s3722_s27, 4  ;;  %s3232_s27 = sshll.u32 %s3872_s13, 4  ;;  %s5598_s27 = int_to_ptr.vmem [resolvable:$true] %s3232_s27 }
 0x6ea   : > { %s3229_s17 = sadd.s32 %s3394_s18, %s3388_s10  ;;  %s3644_s16 = scalar_lea.vmem %s5598_s27, 2048 }
 0x6eb   : > { %s3389_s28 = sshll.u32 %s3229_s17, 7  ;;  %p3645_p0 = scmp.ne.s32.totalorder %s5598_s27, %s3644_s16 }
 0x6ec   : > { %s5607_s23 = scalar_lea.hbm %s5674_s7, %s3389_s28  ;;  %s3648_s18 = sshll.u32 %s3749_s20, 4  ;;  %s3649_s18 = int_to_ptr.vmem [resolvable:$false] %s3648_s18 }
 0x6ed   : > { %v5513_v19 = vpop.permute.xlu0 %3082  ;;  %p3646_p1 = pnand %p3645_p0, %p3842_p3  ;;  %s3650_s10 = scalar_lea.vmem %s3649_s18, 4096 }
 0x6ee   : > { %p3651_p4 = scmp.lt.s32.totalorder %s5598_s27, %s3649_s18  ;;  %p3652_p5 = scmp.lt.s32.totalorder %s3650_s10, %s3644_s16 }
 0x6ef   : > { %p3647_p2 = pneg %p3646_p1 }
 0x6f0   : > { %p3653_p6 = por %p3652_p5, %p3651_p4 }
 0x6f2   : > { %p3654_p7 = pnand %p3653_p6, %p3647_p2 }
 0x73c   : > { %v3123_v25 = vpop.permute.xlu0 %3122 }
 0x73d   : > { %v3184_v42 = vsel %vm5805_vm3, %v3168_v62, %v3123_v25  ;;  %vm5820_vm3 = vmmov %vm5806_vm4 }
 0x73e   : > { %3201 = vst.msk [vmem:[%s3872_s13 + $0x10] sm:$0xff] %vm3198_vm13, %v3184_v42  ;;  %v3125_v30 = vpop.permute.xlu1 %3124  ;;  %v3176_v23 = vsel %vm5820_vm3, %v1282_v11, %v3075_v1  ;;  %vm5821_vm4 = vmmov %vm5817_vm0 }
 0x73f   : > { %v3185_v43 = vsel %vm5807_vm5, %v3169_v55, %v3125_v30  ;;  %vm5822_vm5 = vmmov %vm5820_vm3 }
 0x740   : > { %3202 = vst.msk [vmem:[%s3872_s13 + $0x18] sm:$0xff] %vm3198_vm13, %v3185_v43  ;;  %v3119_v52 = vpop.permute.xlu0 %3118  ;;  %v3177_v27 = vsel %vm5822_vm5, %v1283_v21, %v3077_v8  ;;  %v5833_v8 = vld [vmem:[#allocation7_spill] sm:$0xff]  ;;  %vm5834_vm15 = vmmov %vm5821_vm4 }
 0x741   : > { %v3182_v7 = vsel %vm5809_vm6, %v3166_v45, %v3119_v52  ;;  %vm5824_vm6 = vmmov %vm5820_vm3 }
 0x742   : > { %3199 = vst.msk [vmem:[%s3872_s13] sm:$0xff] %vm3198_vm13, %v3182_v7  ;;  %v3121_v47 = vpop.permute.xlu1 %3120  ;;  %v3174_v37 = vsel %vm5824_vm6, %v1280_v35, %v3071_v36 }
 0x743   : > { %v3183_v48 = vsel %vm5811_vm1, %v3167_v50, %v3121_v47  ;;  %vm5826_vm1 = vmmov %vm5820_vm3 }
 0x744   : > { %3200 = vst.msk [vmem:[%s3872_s13 + $0x8] sm:$0xff] %vm3198_vm13, %v3183_v48  ;;  %v3131_v40 = vpop.permute.xlu0 %3130  ;;  %v3175_v51 = vsel %vm5826_vm1, %v1281_v58, %v5507_v44  ;;  %vm5836_vm3 = vmmov %vm5821_vm4 }
 0x745   : > { %v3188_v12 = vsel %vm5813_vm14, %v3172_v24, %v3131_v40  ;;  %vm5828_vm14 = vmmov %vm5826_vm1 }
 0x746   : > { %3205 = vst.msk [vmem:[%s3872_s13 + $0x30] sm:$0xff] %vm3198_vm13, %v3188_v12  ;;  %v3133_v14 = vpop.permute.xlu1 %3132  ;;  %v3178_v61 = vsel %vm5828_vm14, %v1284_v5, %v5509_v13  ;;  %v1287_v13 = vmax.f32 %v5833_v8, 0.0 }
 0x747   : > { %v3189_v0 = vsel %vm5815_vm2, %v3173_v6, %v3133_v14  ;;  %vm5830_vm2 = vmmov %vm5826_vm1 }
 0x748   : > { %3206 = vst.msk [vmem:[%s3872_s13 + $0x38] sm:$0xff] %vm3198_vm13, %v3189_v0  ;;  %v3127_v49 = vpop.permute.xlu0 %3126  ;;  %v3179_v36 = vsel %vm5830_vm2, %v1285_v18, %v5511_v57 }
 0x749   : > { %v3186_v38 = vsel %vm5817_vm0, %v3170_v31, %v3127_v49  ;;  %vm5832_vm0 = vmmov %vm5826_vm1 }
 0x74a   : > { %3203 = vst.msk [vmem:[%s3872_s13 + $0x20] sm:$0xff] %vm3198_vm13, %v3186_v38  ;;  %v3129_v33 = vpop.permute.xlu1 %3128  ;;  %v3180_v41 = vsel %vm5832_vm0, %v1286_v28, %v5513_v19 }
 0x74b   : > { %v3187_v4 = vsel %vm5819_vm12, %v3171_v9, %v3129_v33  ;;  %vm5835_vm12 = vmmov %vm5832_vm0 }
 0x74c   : > { %3204 = vst.msk [vmem:[%s3872_s13 + $0x28] sm:$0xff] %vm3198_vm13, %v3187_v4  ;;  %v3139_v63 = vpop.permute.xlu0 %3138  ;;  %v3181_v32 = vsel %vm5835_vm12, %v1287_v13, %v5516_v3 }
 0x74d   : > { %v3192_v10 = vsel %vm5821_vm4, %v3176_v23, %v3139_v63 }
 0x74e   : > { %3209 = vst.msk [vmem:[%s3872_s13 + $0x50] sm:$0xff] %vm3198_vm13, %v3192_v10  ;;  %v3141_v16 = vpop.permute.xlu1 %3140 }
 0x74f   : > { %v3193_v26 = vsel %vm5823_vm9, %v3177_v27, %v3141_v16 }
 0x750   : > { %3210 = vst.msk [vmem:[%s3872_s13 + $0x58] sm:$0xff] %vm3198_vm13, %v3193_v26  ;;  %v3135_v46 = vpop.permute.xlu0 %3134 }
 0x751   : > { %v3190_v60 = vsel %vm5825_vm8, %v3174_v37, %v3135_v46 }
 0x752   : > { %3207 = vst.msk [vmem:[%s3872_s13 + $0x40] sm:$0xff] %vm3198_vm13, %v3190_v60  ;;  %v3137_v34 = vpop.permute.xlu1 %3136 }
 0x753   : > { %v3191_v2 = vsel %vm5827_vm7, %v3175_v51, %v3137_v34 }
 0x754   : > { %3208 = vst.msk [vmem:[%s3872_s13 + $0x48] sm:$0xff] %vm3198_vm13, %v3191_v2 }
 0x755   : > { %v3143_v20 = vpop.permute.xlu0 %3142 }
 0x756   : > { %v3194_v15 = vsel %vm5829_vm10, %v3178_v61, %v3143_v20 }
 0x757   : > { %3211 = vst.msk [vmem:[%s3872_s13 + $0x60] sm:$0xff] %vm3198_vm13, %v3194_v15  ;;  %v3145_v44 = vpop.permute.xlu1 %3144 }
 0x758   : > { %v3195_v1 = vsel %vm5831_vm11, %v3179_v36, %v3145_v44 }
 0x759   : > { %3212 = vst.msk [vmem:[%s3872_s13 + $0x68] sm:$0xff] %vm3198_vm13, %v3195_v1  ;;  %v3147_v57 = vpop.permute.xlu0 %3146 }
 0x75a   : > { %v3196_v22 = vsel %vm5834_vm15, %v3180_v41, %v3147_v57 }
 0x75b   : > { %3213 = vst.msk [vmem:[%s3872_s13 + $0x70] sm:$0xff] %vm3198_vm13, %v3196_v22  ;;  %v3149_v62 = vpop.permute.xlu1 %3148 }
 0x75c   : > { %v3197_v19 = vsel %vm5836_vm3, %v3181_v32, %v3149_v62 }
 0x75d   : > { %3214 = vst.msk [vmem:[%s3872_s13 + $0x78] sm:$0xff] %vm3198_vm13, %v3197_v19 }
 0x75e   : > { %3657 = shalt.err (!%p3654_p7)
}
 0x75f   : > { %s3658_s13 = scalar_lea.hbm %s5607_s23, 2048  ;;  %s3662_s22 = scalar_lea.hbm %s5674_s7, 8192 }
 0x760   : > { %p3659_p9 = scmp.ne.s32.totalorder %s5607_s23, %s3658_s13  ;;  %p3663_p12 = scmp.lt.u32.totalorder %s5607_s23, %s5674_s7 }
 0x761   : > { %p3664_p13 = scmp.lt.u32.totalorder %s3662_s22, %s3658_s13  ;;  %p3666_p1 = scmp.lt.u32.totalorder %s3658_s13, %s5607_s23 }
 0x762   : > { %p3660_p10 = pnand %p3659_p9, %p3842_p3 }
 0x763   : > { %p3665_p0 = por %p3664_p13, %p3663_p12 }
 0x764   : > { %p3661_p11 = pneg %p3660_p10 }
 0x765   : > { %p3667_p2 = por %p3666_p1, %p3665_p0 }
 0x767   : > { %p3668_p4 = pnand %p3667_p2, %p3661_p11 }
 0x769   : > { %3671 = shalt.err (!%p3668_p4)
}
 0x76a   : > { %s3750_s16 = smov 128   ;;  %s5838_s20 = smov 8  }
 0x76b   : > { %3534 = dma.vmem_to_hbm [thread:$0]  (%p3842_p3), %s5598_s27, 2048, %s5607_s23, %s5614_s12, %s3750_s16, %s3750_s16, %s5838_s20  }
 0x76c PF: > { %p3540_p5 = scmp.ge.s32.totalorder %s3738_s8, 2  ;;  %s3247_s18 = sand.u32 1, %s3710_s24  }
 0x76d   : > { %s3248_s10 = scalar_lea.sflag [#allocation4], %s3247_s18 }
 0x76e   : > { %p3537_p6 = pnand %p3540_p5, %p3851_p8 }
 0x770   : > { %3705 = dma.done.wait (!%p3537_p6), %s3248_s10, 2048  }
 0x771   : > { %3707 = vsyncadd (!%p3537_p6), %s3248_s10, 4294965248  ;;  %s20_s8 = sadd.s32 1, %s3738_s8   ;;  %s5839_s14 = sld [smem:[#allocation6_spill]] }
 0x772   : > { %p17_p7 = scmp.ge.s32.totalorder %s20_s8, 6   ;;  %s5840_s24 = smov %s3714_s25 }
 0x773   : > { %s5841_s25 = smov %s3718_s26  ;;  %s5842_s26 = smov %s3860_s19 }
 0x774   : > { %s5843_s27 = smov %s3730_s29  ;;  %s5844_s28 = smov %s3734_s30 }
 0x775   : > { %s5845_s29 = smov %s5848_s11  ;;  %19 = sbr.rel (!%p17_p7) target bundleno = 5 (0x5), region = 88 }
 0x777   : > { %s5846_s30 = smov %s5839_s14 }
 0x77c   :  { %3253 = vsyncpa [#allocation4], 1 }
 0x77d   :  { %3255 = vsyncpa [#allocation4 + $0x1], 1 }

</bundles_post_ra>
